<compile_context>
chip_gen: v6e
topology: v6e:2x2x1
jax: 0.10.0
libtpu: 0.0.40
codegen_flags: <defaults>
</compile_context>

<pallas_src>
import functools

import jax
import jax.numpy as jnp
from jax.experimental import pallas as pl
from jax.experimental.pallas import tpu as pltpu

EPS = 1e-5
NUM_CLASSES = 10
TM_DEFAULT = 512       # row tile (multiple of 8 sublanes); ~85%+ of HBM roofline
FC_N_PAD = 128         # pad FC output 10 -> 128 lanes for unmasked stores


def _round_up(x, m):
    return (x + m - 1) // m * m


# ---------------------------------------------------------------------------
# Pallas kernel: fused (X @ W) * scale + shift  [+ ReLU]
# ---------------------------------------------------------------------------
def _fused_matmul_kernel(x_ref, w_ref, scale_ref, shift_ref, o_ref, *, apply_relu):
    acc = jnp.dot(x_ref[...], w_ref[...], preferred_element_type=jnp.float32)
    acc = acc * scale_ref[...] + shift_ref[...]
    if apply_relu:
        acc = jnp.maximum(acc, 0.0)
    o_ref[...] = acc.astype(o_ref.dtype)


def fused_matmul(x, w, scale, shift, *, apply_relu, tm=TM_DEFAULT):
    """out[m, n] = act((x @ w)[m, n] * scale[0, n] + shift[0, n]).

    Grid over the row dim; W / scale / shift blocks use a constant index_map so
    they stay resident in VMEM across grid steps. Rows are zero-padded up to a
    multiple of the row tile and the pad is sliced off afterwards.
    """
    m, k = x.shape
    k2, n = w.shape
    assert k == k2
    tm = min(tm, _round_up(m, 8))
    m_pad = _round_up(m, tm)
    if m_pad != m:
        x = jnp.pad(x, ((0, m_pad - m), (0, 0)))

    kernel = functools.partial(_fused_matmul_kernel, apply_relu=apply_relu)
    out = pl.pallas_call(
        kernel,
        out_shape=jax.ShapeDtypeStruct((m_pad, n), jnp.float32),
        grid_spec=pltpu.PrefetchScalarGridSpec(
            num_scalar_prefetch=0,
            grid=(m_pad // tm,),
            in_specs=[
                pl.BlockSpec((tm, k), lambda i: (i, 0)),   # row tiles stream through
                pl.BlockSpec((k, n), lambda i: (0, 0)),    # weights resident
                pl.BlockSpec((1, n), lambda i: (0, 0)),    # bn scale resident
                pl.BlockSpec((1, n), lambda i: (0, 0)),    # bn shift resident
            ],
            out_specs=pl.BlockSpec((tm, n), lambda i: (i, 0)),
        ),
        compiler_params=pltpu.CompilerParams(
            # Row axis is embarrassingly parallel -> shards across v7x's 2 TCs;
            # no-op on single-TC v5e/v6e.
            dimension_semantics=("parallel",),
        ),
    )(x, w, scale, shift)
    return out[:m]


# ---------------------------------------------------------------------------
# Layout glue (wrapper side)
# ---------------------------------------------------------------------------
def _im2col_nhwc(x, k=5, pad=2):
    """(B,H,W,C) -> (B*H*W, k*k*C); feature order (kh, kw, c)."""
    b, h, w, c = x.shape
    xp = jnp.pad(x, ((0, 0), (pad, pad), (pad, pad), (0, 0)))
    cols = [xp[:, dy:dy + h, dx:dx + w, :] for dy in range(k) for dx in range(k)]
    patches = jnp.stack(cols, axis=3)                  # (B,H,W,k*k,C)
    return patches.reshape(b * h * w, k * k * c)


def _maxpool2x2_nhwc(x):
    b, h, w, c = x.shape
    return jnp.max(x.reshape(b, h // 2, 2, w // 2, 2, c), axis=(2, 4))


def _bn_fold(conv_bias, gamma, beta, mean, var):
    """Fold conv bias + inference-mode BN into per-channel scale/shift."""
    scale = gamma * jax.lax.rsqrt(var + EPS)
    shift = (conv_bias - mean) * scale + beta
    return scale.reshape(1, -1), shift.reshape(1, -1)


@jax.jit
def cnnplus_forward(x, params):
    x = x.reshape(-1, 1, 28, 28).astype(jnp.float32)    # torch: x.view(-1, 1, 28, 28)
    b = x.shape[0]
    h = jnp.transpose(x, (0, 2, 3, 1))                   # NCHW -> NHWC

    # ---- layer1: conv(1->16) + BN + ReLU (Pallas) -> maxpool ----
    p1 = _im2col_nhwc(h, 5, 2)                                           # (B*784, 25)
    w1 = jnp.transpose(params["w_conv1"], (2, 3, 1, 0)).reshape(25, 16)  # (kh,kw,Cin,Cout)
    s1, t1 = _bn_fold(params["b_conv1"], *params["bn1"])
    o1 = fused_matmul(p1, w1, s1, t1, apply_relu=True)                   # (B*784, 16)
    h = _maxpool2x2_nhwc(o1.reshape(b, 28, 28, 16))                      # (B,14,14,16)

    # ---- layer2: conv(16->64) + BN + ReLU (Pallas) -> maxpool ----
    p2 = _im2col_nhwc(h, 5, 2)                                           # (B*196, 400)
    w2 = jnp.transpose(params["w_conv2"], (2, 3, 1, 0)).reshape(400, 64)
    s2, t2 = _bn_fold(params["b_conv2"], *params["bn2"])
    o2 = fused_matmul(p2, w2, s2, t2, apply_relu=True)                   # (B*196, 64)
    h = _maxpool2x2_nhwc(o2.reshape(b, 14, 14, 64))                      # (B,7,7,64)

    # ---- fc: flatten in torch (C,H,W) order; pad out dim 10 -> 128 lanes ----
    flat = jnp.transpose(h, (0, 3, 1, 2)).reshape(b, 64 * 7 * 7)         # (B, 3136)
    wf = jnp.pad(jnp.transpose(params["w_fc"]),
                 ((0, 0), (0, FC_N_PAD - NUM_CLASSES)))                  # (3136, 128)
    bf = jnp.pad(params["b_fc"], (0, FC_N_PAD - NUM_CLASSES)).reshape(1, -1)
    ones = jnp.ones((1, FC_N_PAD), jnp.float32)
    out = fused_matmul(flat, wf, ones, bf, apply_relu=False)             # (B, 128)
    return out[:, :NUM_CLASSES]


# ---------------------------------------------------------------------------
# Reference (plain JAX / XLA conv) and parameter init
# ---------------------------------------------------------------------------
@jax.jit
def reference_forward(x, params):
    x = x.reshape(-1, 1, 28, 28).astype(jnp.float32)

    def block(h, w, bias, bn):
        gamma, beta, mean, var = bn
        o = jax.lax.conv_general_dilated(
            h, w, window_strides=(1, 1), padding=((2, 2), (2, 2)),
            dimension_numbers=("NCHW", "OIHW", "NCHW"))
        o = o + bias.reshape(1, -1, 1, 1)
        sc = (gamma * jax.lax.rsqrt(var + EPS)).reshape(1, -1, 1, 1)
        o = (o - mean.reshape(1, -1, 1, 1)) * sc + beta.reshape(1, -1, 1, 1)
        o = jnp.maximum(o, 0.0)
        bb, c, hh, ww = o.shape
        return o.reshape(bb, c, hh // 2, 2, ww // 2, 2).max(axis=(3, 5))

    h = block(x, params["w_conv1"], params["b_conv1"], params["bn1"])
    h = block(h, params["w_conv2"], params["b_conv2"], params["bn2"])
    flat = h.reshape(h.shape[0], -1)
    return flat @ params["w_fc"].T + params["b_fc"]


def init_params(key):
    """PyTorch-style init (conv/linear uniform(-1/sqrt(fan_in), .)), plus
    non-trivial synthetic BN running stats so the BN path is exercised."""
    ks = jax.random.split(key, 14)
    b1 = 1.0 / jnp.sqrt(1 * 5 * 5)
    w_conv1 = jax.random.uniform(ks[0], (16, 1, 5, 5), jnp.float32, -b1, b1)
    b_conv1 = jax.random.uniform(ks[1], (16,), jnp.float32, -b1, b1)
    bn1 = (jax.random.uniform(ks[2], (16,), jnp.float32, 0.5, 1.5),    # gamma
           jax.random.uniform(ks[3], (16,), jnp.float32, -0.1, 0.1),   # beta
           jax.random.uniform(ks[4], (16,), jnp.float32, -0.1, 0.1),   # running mean
           jax.random.uniform(ks[5], (16,), jnp.float32, 0.5, 1.5))    # running var
    b2 = 1.0 / jnp.sqrt(16 * 5 * 5)
    w_conv2 = jax.random.uniform(ks[6], (64, 16, 5, 5), jnp.float32, -b2, b2)
    b_conv2 = jax.random.uniform(ks[7], (64,), jnp.float32, -b2, b2)
    bn2 = (jax.random.uniform(ks[8], (64,), jnp.float32, 0.5, 1.5),
           jax.random.uniform(ks[9], (64,), jnp.float32, -0.1, 0.1),
           jax.random.uniform(ks[10], (64,), jnp.float32, -0.1, 0.1),
           jax.random.uniform(ks[11], (64,), jnp.float32, 0.5, 1.5))
    bf = 1.0 / jnp.sqrt(7 * 7 * 64)
    w_fc = jax.random.uniform(ks[12], (NUM_CLASSES, 7 * 7 * 64), jnp.float32, -bf, bf)
    b_fc = jax.random.uniform(ks[13], (NUM_CLASSES,), jnp.float32, -bf, bf)
    return dict(w_conv1=w_conv1, b_conv1=b_conv1, bn1=bn1,
                w_conv2=w_conv2, b_conv2=b_conv2, bn2=bn2,
                w_fc=w_fc, b_fc=b_fc)


if __name__ == "__main__":
    key = jax.random.PRNGKey(0)
    kx, kp = jax.random.split(key)

    # Small MNIST-like input (batch=8). Note: at batch this small the pallas_call
    # fixed cost dominates; the tiling only pays off at batch in the hundreds+.
    x = jax.random.normal(kx, (8, 1, 28, 28), dtype=jnp.float32)
    params = init_params(kp)

    out = cnnplus_forward(x, params)
    out = jax.block_until_ready(out)
    assert out.shape == (8, NUM_CLASSES)

    ref = reference_forward(x, params)
    max_err = float(jnp.max(jnp.abs(out - ref)))
    # Tolerance covers MXU default-precision differences between the Pallas dot
    # path and XLA's conv; real layout/semantic bugs give errors ~0.1+.
    assert jnp.allclose(out, ref, atol=2e-2, rtol=2e-2), max_err

    print("KERNEL_OK")
</pallas_src>

<mosaic_0001>
module attributes {stable_mosaic.version = 11 : i64} {
  func.func @_fused_matmul_kernel(%arg0: i32, %arg1: memref<512x25xf32, #tpu.memory_space<vmem>>, %arg2: memref<25x16xf32, #tpu.memory_space<vmem>>, %arg3: memref<1x16xf32, #tpu.memory_space<vmem>>, %arg4: memref<1x16xf32, #tpu.memory_space<vmem>>, %arg5: memref<512x16xf32, #tpu.memory_space<vmem>>) attributes {dimension_semantics = [#tpu.dimension_semantics<parallel>], iteration_bounds = array<i64: 13>, scalar_prefetch = 0 : i64, scratch_operands = 0 : i64, tpu.core_type = #tpu.core_type<tc>, window_params = [{transform_indices = @transform_0, window_bounds = array<i64: 512, 25>}, {pipeline_mode = #tpu.pipeline_mode<synchronous>, transform_indices = @transform_1, window_bounds = array<i64: 25, 16>}, {pipeline_mode = #tpu.pipeline_mode<synchronous>, transform_indices = @transform_2, window_bounds = array<i64: 1, 16>}, {pipeline_mode = #tpu.pipeline_mode<synchronous>, transform_indices = @transform_3, window_bounds = array<i64: 1, 16>}, {transform_indices = @transform_4, window_bounds = array<i64: 512, 16>}]} {
    %c0 = arith.constant 0 : index
    %c0_0 = arith.constant 0 : index
    %0 = vector.load %arg1[%c0, %c0_0] : memref<512x25xf32, #tpu.memory_space<vmem>>, vector<512x25xf32>
    %c0_1 = arith.constant 0 : index
    %c0_2 = arith.constant 0 : index
    %1 = vector.load %arg2[%c0_1, %c0_2] : memref<25x16xf32, #tpu.memory_space<vmem>>, vector<25x16xf32>
    %cst = arith.constant dense<0.000000e+00> : vector<512x16xf32>
    %2 = tpu.matmul %0, %1, %cst {dimension_numbers = #tpu.dot_dimension_numbers<[1], [0], [0], [1], [0, 0, 1, 1], [], []>} : vector<512x25xf32>, vector<25x16xf32>, vector<512x16xf32> -> vector<512x16xf32>
    %c0_3 = arith.constant 0 : index
    %c0_4 = arith.constant 0 : index
    %3 = vector.load %arg3[%c0_3, %c0_4] : memref<1x16xf32, #tpu.memory_space<vmem>>, vector<1x16xf32>
    %4 = vector.broadcast %3 : vector<1x16xf32> to vector<512x16xf32>
    %5 = arith.mulf %2, %4 : vector<512x16xf32>
    %c0_5 = arith.constant 0 : index
    %c0_6 = arith.constant 0 : index
    %6 = vector.load %arg4[%c0_5, %c0_6] : memref<1x16xf32, #tpu.memory_space<vmem>>, vector<1x16xf32>
    %7 = vector.broadcast %6 : vector<1x16xf32> to vector<512x16xf32>
    %8 = arith.addf %5, %7 : vector<512x16xf32>
    %cst_7 = arith.constant 0.000000e+00 : f32
    %9 = vector.broadcast %cst_7 : f32 to vector<512x16xf32>
    %10 = arith.maximumf %8, %9 : vector<512x16xf32>
    %c0_8 = arith.constant 0 : index
    %c0_9 = arith.constant 0 : index
    %11 = vector.load %arg5[%c0_8, %c0_9] : memref<512x16xf32, #tpu.memory_space<vmem>>, vector<512x16xf32>
    tpu.vector_store %arg5[%c0_8, %c0_9], %10 {strides = array<i32>} : memref<512x16xf32, #tpu.memory_space<vmem>>, vector<512x16xf32>,
    return
  }
  func.func @transform_0(%arg0: i32) -> (i32, i32) {
    %c0_i32 = arith.constant 0 : i32
    %c0_i32_0 = arith.constant 0 : i32
    return %arg0, %c0_i32 : i32, i32
  }
  func.func @transform_1(%arg0: i32) -> (i32, i32) {
    %c0_i32 = arith.constant 0 : i32
    %c0_i32_0 = arith.constant 0 : i32
    %c0_i32_1 = arith.constant 0 : i32
    return %c0_i32, %c0_i32_0 : i32, i32
  }
  func.func @transform_2(%arg0: i32) -> (i32, i32) {
    %c0_i32 = arith.constant 0 : i32
    %c0_i32_0 = arith.constant 0 : i32
    %c0_i32_1 = arith.constant 0 : i32
    return %c0_i32, %c0_i32_0 : i32, i32
  }
  func.func @transform_3(%arg0: i32) -> (i32, i32) {
    %c0_i32 = arith.constant 0 : i32
    %c0_i32_0 = arith.constant 0 : i32
    %c0_i32_1 = arith.constant 0 : i32
    return %c0_i32, %c0_i32_0 : i32, i32
  }
  func.func @transform_4(%arg0: i32) -> (i32, i32) {
    %c0_i32 = arith.constant 0 : i32
    %c0_i32_0 = arith.constant 0 : i32
    return %arg0, %c0_i32 : i32, i32
  }
}

module attributes {stable_mosaic.version = 11 : i64} {
  func.func @_fused_matmul_kernel(%arg0: i32, %arg1: memref<512x400xf32, #tpu.memory_space<vmem>>, %arg2: memref<400x64xf32, #tpu.memory_space<vmem>>, %arg3: memref<1x64xf32, #tpu.memory_space<vmem>>, %arg4: memref<1x64xf32, #tpu.memory_space<vmem>>, %arg5: memref<512x64xf32, #tpu.memory_space<vmem>>) attributes {dimension_semantics = [#tpu.dimension_semantics<parallel>], iteration_bounds = array<i64: 4>, scalar_prefetch = 0 : i64, scratch_operands = 0 : i64, tpu.core_type = #tpu.core_type<tc>, window_params = [{transform_indices = @transform_0, window_bounds = array<i64: 512, 400>}, {pipeline_mode = #tpu.pipeline_mode<synchronous>, transform_indices = @transform_1, window_bounds = array<i64: 400, 64>}, {pipeline_mode = #tpu.pipeline_mode<synchronous>, transform_indices = @transform_2, window_bounds = array<i64: 1, 64>}, {pipeline_mode = #tpu.pipeline_mode<synchronous>, transform_indices = @transform_3, window_bounds = array<i64: 1, 64>}, {transform_indices = @transform_4, window_bounds = array<i64: 512, 64>}]} {
    %c0 = arith.constant 0 : index
    %c0_0 = arith.constant 0 : index
    %0 = vector.load %arg1[%c0, %c0_0] : memref<512x400xf32, #tpu.memory_space<vmem>>, vector<512x400xf32>
    %c0_1 = arith.constant 0 : index
    %c0_2 = arith.constant 0 : index
    %1 = vector.load %arg2[%c0_1, %c0_2] : memref<400x64xf32, #tpu.memory_space<vmem>>, vector<400x64xf32>
    %cst = arith.constant dense<0.000000e+00> : vector<512x64xf32>
    %2 = tpu.matmul %0, %1, %cst {dimension_numbers = #tpu.dot_dimension_numbers<[1], [0], [0], [1], [0, 0, 1, 1], [], []>} : vector<512x400xf32>, vector<400x64xf32>, vector<512x64xf32> -> vector<512x64xf32>
    %c0_3 = arith.constant 0 : index
    %c0_4 = arith.constant 0 : index
    %3 = vector.load %arg3[%c0_3, %c0_4] : memref<1x64xf32, #tpu.memory_space<vmem>>, vector<1x64xf32>
    %4 = vector.broadcast %3 : vector<1x64xf32> to vector<512x64xf32>
    %5 = arith.mulf %2, %4 : vector<512x64xf32>
    %c0_5 = arith.constant 0 : index
    %c0_6 = arith.constant 0 : index
    %6 = vector.load %arg4[%c0_5, %c0_6] : memref<1x64xf32, #tpu.memory_space<vmem>>, vector<1x64xf32>
    %7 = vector.broadcast %6 : vector<1x64xf32> to vector<512x64xf32>
    %8 = arith.addf %5, %7 : vector<512x64xf32>
    %cst_7 = arith.constant 0.000000e+00 : f32
    %9 = vector.broadcast %cst_7 : f32 to vector<512x64xf32>
    %10 = arith.maximumf %8, %9 : vector<512x64xf32>
    %c0_8 = arith.constant 0 : index
    %c0_9 = arith.constant 0 : index
    %11 = vector.load %arg5[%c0_8, %c0_9] : memref<512x64xf32, #tpu.memory_space<vmem>>, vector<512x64xf32>
    tpu.vector_store %arg5[%c0_8, %c0_9], %10 {strides = array<i32>} : memref<512x64xf32, #tpu.memory_space<vmem>>, vector<512x64xf32>,
    return
  }
  func.func @transform_0(%arg0: i32) -> (i32, i32) {
    %c0_i32 = arith.constant 0 : i32
    %c0_i32_0 = arith.constant 0 : i32
    return %arg0, %c0_i32 : i32, i32
  }
  func.func @transform_1(%arg0: i32) -> (i32, i32) {
    %c0_i32 = arith.constant 0 : i32
    %c0_i32_0 = arith.constant 0 : i32
    %c0_i32_1 = arith.constant 0 : i32
    return %c0_i32, %c0_i32_0 : i32, i32
  }
  func.func @transform_2(%arg0: i32) -> (i32, i32) {
    %c0_i32 = arith.constant 0 : i32
    %c0_i32_0 = arith.constant 0 : i32
    %c0_i32_1 = arith.constant 0 : i32
    return %c0_i32, %c0_i32_0 : i32, i32
  }
  func.func @transform_3(%arg0: i32) -> (i32, i32) {
    %c0_i32 = arith.constant 0 : i32
    %c0_i32_0 = arith.constant 0 : i32
    %c0_i32_1 = arith.constant 0 : i32
    return %c0_i32, %c0_i32_0 : i32, i32
  }
  func.func @transform_4(%arg0: i32) -> (i32, i32) {
    %c0_i32 = arith.constant 0 : i32
    %c0_i32_0 = arith.constant 0 : i32
    return %arg0, %c0_i32 : i32, i32
  }
}

module attributes {stable_mosaic.version = 11 : i64} {
  func.func @_fused_matmul_kernel(%arg0: i32, %arg1: memref<8x3136xf32, #tpu.memory_space<vmem>>, %arg2: memref<3136x128xf32, #tpu.memory_space<vmem>>, %arg3: memref<1x128xf32, #tpu.memory_space<vmem>>, %arg4: memref<1x128xf32, #tpu.memory_space<vmem>>, %arg5: memref<8x128xf32, #tpu.memory_space<vmem>>) attributes {dimension_semantics = [#tpu.dimension_semantics<parallel>], iteration_bounds = array<i64: 1>, scalar_prefetch = 0 : i64, scratch_operands = 0 : i64, tpu.core_type = #tpu.core_type<tc>, window_params = [{transform_indices = @transform_0, window_bounds = array<i64: 8, 3136>}, {pipeline_mode = #tpu.pipeline_mode<synchronous>, transform_indices = @transform_1, window_bounds = array<i64: 3136, 128>}, {pipeline_mode = #tpu.pipeline_mode<synchronous>, transform_indices = @transform_2, window_bounds = array<i64: 1, 128>}, {pipeline_mode = #tpu.pipeline_mode<synchronous>, transform_indices = @transform_3, window_bounds = array<i64: 1, 128>}, {transform_indices = @transform_4, window_bounds = array<i64: 8, 128>}]} {
    %c0 = arith.constant 0 : index
    %c0_0 = arith.constant 0 : index
    %0 = vector.load %arg1[%c0, %c0_0] : memref<8x3136xf32, #tpu.memory_space<vmem>>, vector<8x3136xf32>
    %c0_1 = arith.constant 0 : index
    %c0_2 = arith.constant 0 : index
    %1 = vector.load %arg2[%c0_1, %c0_2] : memref<3136x128xf32, #tpu.memory_space<vmem>>, vector<3136x128xf32>
    %cst = arith.constant dense<0.000000e+00> : vector<8x128xf32>
    %2 = tpu.matmul %0, %1, %cst {dimension_numbers = #tpu.dot_dimension_numbers<[1], [0], [0], [1], [0, 0, 1, 1], [], []>} : vector<8x3136xf32>, vector<3136x128xf32>, vector<8x128xf32> -> vector<8x128xf32>
    %c0_3 = arith.constant 0 : index
    %c0_4 = arith.constant 0 : index
    %3 = vector.load %arg3[%c0_3, %c0_4] : memref<1x128xf32, #tpu.memory_space<vmem>>, vector<1x128xf32>
    %4 = vector.broadcast %3 : vector<1x128xf32> to vector<8x128xf32>
    %5 = arith.mulf %2, %4 : vector<8x128xf32>
    %c0_5 = arith.constant 0 : index
    %c0_6 = arith.constant 0 : index
    %6 = vector.load %arg4[%c0_5, %c0_6] : memref<1x128xf32, #tpu.memory_space<vmem>>, vector<1x128xf32>
    %7 = vector.broadcast %6 : vector<1x128xf32> to vector<8x128xf32>
    %8 = arith.addf %5, %7 : vector<8x128xf32>
    %c0_7 = arith.constant 0 : index
    %c0_8 = arith.constant 0 : index
    %9 = vector.load %arg5[%c0_7, %c0_8] : memref<8x128xf32, #tpu.memory_space<vmem>>, vector<8x128xf32>
    tpu.vector_store %arg5[%c0_7, %c0_8], %8 {strides = array<i32>} : memref<8x128xf32, #tpu.memory_space<vmem>>, vector<8x128xf32>,
    return
  }
  func.func @transform_0(%arg0: i32) -> (i32, i32) {
    %c0_i32 = arith.constant 0 : i32
    %c0_i32_0 = arith.constant 0 : i32
    return %arg0, %c0_i32 : i32, i32
  }
  func.func @transform_1(%arg0: i32) -> (i32, i32) {
    %c0_i32 = arith.constant 0 : i32
    %c0_i32_0 = arith.constant 0 : i32
    %c0_i32_1 = arith.constant 0 : i32
    return %c0_i32, %c0_i32_0 : i32, i32
  }
  func.func @transform_2(%arg0: i32) -> (i32, i32) {
    %c0_i32 = arith.constant 0 : i32
    %c0_i32_0 = arith.constant 0 : i32
    %c0_i32_1 = arith.constant 0 : i32
    return %c0_i32, %c0_i32_0 : i32, i32
  }
  func.func @transform_3(%arg0: i32) -> (i32, i32) {
    %c0_i32 = arith.constant 0 : i32
    %c0_i32_0 = arith.constant 0 : i32
    %c0_i32_1 = arith.constant 0 : i32
    return %c0_i32, %c0_i32_0 : i32, i32
  }
  func.func @transform_4(%arg0: i32) -> (i32, i32) {
    %c0_i32 = arith.constant 0 : i32
    %c0_i32_0 = arith.constant 0 : i32
    return %arg0, %c0_i32 : i32, i32
  }
}

</mosaic_0001>

<bundles_post_ra>
// kernel: cnnplus_forward.3
= control target key start
LH: loop header
LB: loop body
LE: loop exit
PB: predicated region body
PF: predicated region fallthrough
CT: control target
= control target key end

     0   :  { %s1477_s15 = smov 0   ;;  %s1911_s0 = inlined_call_operand.vmem [shape: f32[6656,25], index: 0, kind: input, shape index: {}]   ;;  %s1912_s1 = inlined_call_operand.vmem [shape: f32[25,16], index: 1, kind: input, shape index: {}]   ;;  %s1913_s2 = inlined_call_operand.vmem [shape: f32[1,16], index: 2, kind: input, shape index: {}]   ;;  %s1914_s3 = inlined_call_operand.vmem [shape: f32[1,16], index: 3, kind: input, shape index: {}]   ;;  %s1915_s4 = inlined_call_operand.vmem [shape: f32[6656,16], index: 4, kind: output, shape index: {}]  }
   0x1 LB: > { %s1178_s16 = sadd.s32 4294967295, %s1450_s15   ;;  %p1182_p0 = scmp.ge.s32.totalorder %s1450_s15, 1  ;;  %s1450_s15 = sphi %s1477_s15, %s14_s15  }
   0x2   : > { %p163_p1 = scmp.lt.s32.totalorder %s1450_s15, 14 }
   0x4   : > { %p164_p2 = pnand %p1182_p0, %p163_p1 }
   0x5   : > { %s1183_s21 = sshll.u32 (!%p164_p2), %s1178_s16, 6 }
   0x6   : > { %167 = sbr.rel (%p164_p2) target bundleno = 283 (0x11b), region = 36  ;;  %p190_p3 = scmp.lt.s32.totalorder (!%p164_p2), %s1183_s21, 831 }
   0xb   : > { %v268_v0 = vld [vmem:[%s1912_s1 + $0x18] sm:$0x1]  ;;  %vm462_vm0 = vcmask 1040384   ;;  %v267_v1 = vld [vmem:[%s1912_s1 + $0x10] sm:$0xff]  ;;  %v266_v2 = vld [vmem:[%s1912_s1 + $0x8] sm:$0xff]  ;;  %s1917_s21 = smov (!%p190_p3, %s1183_s21), 831 }
   0xc   : > { %1324 = vmatprep.subr.msk.mxu0 %vm462_vm0, %v268_v0  ;;  %1428 = vmatprep.subr.msk.mxu1 %vm462_vm0, %v268_v0  ;;  %v265_v3 = vld [vmem:[%s1912_s1] sm:$0xff]  ;;  %s1184_s26 = sshll.u32 %s1917_s21, 3  ;;  %vm269_vm1 = vcmask 203776   ;;  %vm1057_vm2 = vcmask 130048  }
   0xd   : > { %1325 = vmatpush3.msk.msra.mxu0 %vm462_vm0, %v268_v0  ;;  %1432 = vmatpush3.msk.msra.mxu1 %vm462_vm0, %v268_v0  ;;  %s1505_s29 = scalar_lea.vmem %s1911_s0, %s1184_s26  ;;  %s1656_s10 = scalar_lea.vmem %s1915_s4, %s1184_s26 }
   0xe   : > { %1326 = vmatprep.subr.mxu0 %v267_v1  ;;  %1429 = vmatprep.subr.mxu1 %v267_v1  ;;  %v201_v4 = vld [vmem:[%s1505_s29] sm:$0xff]  ;;  %v202_v6 = vld [vmem:[%s1505_s29 + $0x8] sm:$0xff]  ;;  %v203_v8 = vld [vmem:[%s1505_s29 + $0x10] sm:$0xff] }
   0xf   : > { %1327 = vmatpush3.msra.mxu0 %v267_v1  ;;  %1433 = vmatpush3.msra.mxu1 %v267_v1  ;;  %v233_v5 = vld [vmem:[%s1505_s29 + $0x100] sm:$0xff]  ;;  %v234_v7 = vld [vmem:[%s1505_s29 + $0x108] sm:$0xff]  ;;  %v235_v9 = vld [vmem:[%s1505_s29 + $0x110] sm:$0xff] }
  0x10   : > { %1328 = vmatprep.subr.mxu0 %v266_v2  ;;  %1430 = vmatprep.subr.mxu1 %v266_v2  ;;  %v204_v10 = vld [vmem:[%s1505_s29 + $0x18] sm:$0xff]  ;;  %v205_v12 = vld [vmem:[%s1505_s29 + $0x20] sm:$0xff]  ;;  %v206_v14 = vld [vmem:[%s1505_s29 + $0x28] sm:$0xff] }
  0x11   : > { %1329 = vmatpush3.msra.mxu0 %v266_v2  ;;  %1434 = vmatpush3.msra.mxu1 %v266_v2  ;;  %v236_v11 = vld [vmem:[%s1505_s29 + $0x118] sm:$0xff]  ;;  %v237_v13 = vld [vmem:[%s1505_s29 + $0x120] sm:$0xff]  ;;  %v238_v15 = vld [vmem:[%s1505_s29 + $0x128] sm:$0xff] }
  0x12   : > { %1330 = vmatprep.subr.mxu0 %v265_v3  ;;  %1431 = vmatprep.subr.mxu1 %v265_v3  ;;  %v207_v16 = vld [vmem:[%s1505_s29 + $0x30] sm:$0xff]  ;;  %v208_v18 = vld [vmem:[%s1505_s29 + $0x38] sm:$0xff]  ;;  %v209_v20 = vld [vmem:[%s1505_s29 + $0x40] sm:$0xff] }
  0x13   : > { %1331 = vmatpush3.msra.mxu0 %v265_v3  ;;  %1435 = vmatpush3.msra.mxu1 %v265_v3  ;;  %v239_v17 = vld [vmem:[%s1505_s29 + $0x130] sm:$0xff]  ;;  %v240_v19 = vld [vmem:[%s1505_s29 + $0x138] sm:$0xff]  ;;  %v241_v21 = vld [vmem:[%s1505_s29 + $0x140] sm:$0xff] }
  0x14   : > { %1332 = vmatprep.mubr.msk.f32.mxu0 %vm269_vm1, %v201_v4  ;;  %1380 = vmatprep.mubr.msk.f32.mxu1 %vm269_vm1, %v233_v5  ;;  %v210_v22 = vld [vmem:[%s1505_s29 + $0x48] sm:$0xff]  ;;  %v211_v24 = vld [vmem:[%s1505_s29 + $0x50] sm:$0xff]  ;;  %v212_v26 = vld [vmem:[%s1505_s29 + $0x58] sm:$0xff] }
  0x15   : > { %1333 = vmatmul.mubr.msk.f32.vlgmr.msra.gmra.mxu0 %vm269_vm1, %v202_v6  ;;  %1381 = vmatmul.mubr.msk.f32.vlgmr.msra.gmra.mxu1 %vm269_vm1, %v234_v7  ;;  %v242_v23 = vld [vmem:[%s1505_s29 + $0x148] sm:$0xff]  ;;  %v243_v25 = vld [vmem:[%s1505_s29 + $0x150] sm:$0xff]  ;;  %v244_v27 = vld [vmem:[%s1505_s29 + $0x158] sm:$0xff] }
  0x16   : > { %1335 = vmatprep.mubr.msk.f32.mxu0 %vm269_vm1, %v203_v8  ;;  %1383 = vmatprep.mubr.msk.f32.mxu1 %vm269_vm1, %v235_v9  ;;  %v213_v28 = vld [vmem:[%s1505_s29 + $0x60] sm:$0xff]  ;;  %v214_v30 = vld [vmem:[%s1505_s29 + $0x68] sm:$0xff]  ;;  %v215_v32 = vld [vmem:[%s1505_s29 + $0x70] sm:$0xff] }
  0x17   : > { %v245_v29 = vld [vmem:[%s1505_s29 + $0x160] sm:$0xff]  ;;  %v246_v31 = vld [vmem:[%s1505_s29 + $0x168] sm:$0xff]  ;;  %v247_v33 = vld [vmem:[%s1505_s29 + $0x170] sm:$0xff] }
  0x18   : > { %v216_v34 = vld [vmem:[%s1505_s29 + $0x78] sm:$0xff]  ;;  %v217_v36 = vld [vmem:[%s1505_s29 + $0x80] sm:$0xff]  ;;  %v218_v38 = vld [vmem:[%s1505_s29 + $0x88] sm:$0xff] }
  0x19   : > { %1336 = vmatmul.mubr.msk.f32.gmra.mxu0 %vm269_vm1, %v204_v10  ;;  %1384 = vmatmul.mubr.msk.f32.gmra.mxu1 %vm269_vm1, %v236_v11  ;;  %v248_v35 = vld [vmem:[%s1505_s29 + $0x178] sm:$0xff]  ;;  %v249_v37 = vld [vmem:[%s1505_s29 + $0x180] sm:$0xff]  ;;  %v250_v39 = vld [vmem:[%s1505_s29 + $0x188] sm:$0xff] }
  0x1a   : > { %1338 = vmatprep.mubr.msk.f32.mxu0 %vm269_vm1, %v205_v12  ;;  %1386 = vmatprep.mubr.msk.f32.mxu1 %vm269_vm1, %v237_v13  ;;  %v219_v40 = vld [vmem:[%s1505_s29 + $0x90] sm:$0xff]  ;;  %v220_v42 = vld [vmem:[%s1505_s29 + $0x98] sm:$0xff]  ;;  %v221_v44 = vld [vmem:[%s1505_s29 + $0xa0] sm:$0xff] }
  0x1b   : > { %v251_v41 = vld [vmem:[%s1505_s29 + $0x190] sm:$0xff]  ;;  %v252_v43 = vld [vmem:[%s1505_s29 + $0x198] sm:$0xff]  ;;  %v253_v45 = vld [vmem:[%s1505_s29 + $0x1a0] sm:$0xff] }
  0x1c   : > { %v222_v46 = vld [vmem:[%s1505_s29 + $0xa8] sm:$0xff]  ;;  %v223_v48 = vld [vmem:[%s1505_s29 + $0xb0] sm:$0xff]  ;;  %v224_v50 = vld [vmem:[%s1505_s29 + $0xb8] sm:$0xff] }
  0x1d   : > { %1339 = vmatmul.mubr.msk.f32.gmra.mxu0 %vm269_vm1, %v206_v14  ;;  %1387 = vmatmul.mubr.msk.f32.gmra.mxu1 %vm269_vm1, %v238_v15  ;;  %v254_v47 = vld [vmem:[%s1505_s29 + $0x1a8] sm:$0xff]  ;;  %v255_v49 = vld [vmem:[%s1505_s29 + $0x1b0] sm:$0xff]  ;;  %v256_v51 = vld [vmem:[%s1505_s29 + $0x1b8] sm:$0xff] }
  0x1e   : > { %1341 = vmatprep.mubr.msk.f32.mxu0 %vm269_vm1, %v207_v16  ;;  %1389 = vmatprep.mubr.msk.f32.mxu1 %vm269_vm1, %v239_v17  ;;  %v225_v52 = vld [vmem:[%s1505_s29 + $0xc0] sm:$0xff]  ;;  %v226_v54 = vld [vmem:[%s1505_s29 + $0xc8] sm:$0xff]  ;;  %v227_v56 = vld [vmem:[%s1505_s29 + $0xd0] sm:$0xff] }
  0x1f   : > { %v257_v53 = vld [vmem:[%s1505_s29 + $0x1c0] sm:$0xff]  ;;  %v258_v55 = vld [vmem:[%s1505_s29 + $0x1c8] sm:$0xff]  ;;  %v259_v57 = vld [vmem:[%s1505_s29 + $0x1d0] sm:$0xff] }
  0x20   : > { %v228_v58 = vld [vmem:[%s1505_s29 + $0xd8] sm:$0xff]  ;;  %v229_v60 = vld [vmem:[%s1505_s29 + $0xe0] sm:$0xff]  ;;  %v230_v62 = vld [vmem:[%s1505_s29 + $0xe8] sm:$0xff] }
  0x21   : > { %1342 = vmatmul.mubr.msk.f32.gmra.mxu0 %vm269_vm1, %v208_v18  ;;  %1390 = vmatmul.mubr.msk.f32.gmra.mxu1 %vm269_vm1, %v240_v19  ;;  %v260_v59 = vld [vmem:[%s1505_s29 + $0x1d8] sm:$0xff]  ;;  %v261_v61 = vld [vmem:[%s1505_s29 + $0x1e0] sm:$0xff]  ;;  %v262_v63 = vld [vmem:[%s1505_s29 + $0x1e8] sm:$0xff] }
  0x22   : > { %1344 = vmatprep.mubr.msk.f32.mxu0 %vm269_vm1, %v209_v20  ;;  %1392 = vmatprep.mubr.msk.f32.mxu1 %vm269_vm1, %v241_v21  ;;  %v231_v0 = vld [vmem:[%s1505_s29 + $0xf0] sm:$0xff]  ;;  %v232_v2 = vld [vmem:[%s1505_s29 + $0xf8] sm:$0xff]  ;;  %v1638_v4 = vld [vmem:[%s1913_s2] ss:$0 sm:$0xff] }
  0x23   : > { %v263_v1 = vld [vmem:[%s1505_s29 + $0x1f0] sm:$0xff]  ;;  %v264_v3 = vld [vmem:[%s1505_s29 + $0x1f8] sm:$0xff]  ;;  %v1643_v6 = vld [vmem:[%s1914_s3] ss:$0 sm:$0xff] }
  0x25   : > { %1345 = vmatmul.mubr.msk.f32.gmra.mxu0 %vm269_vm1, %v210_v22  ;;  %1393 = vmatmul.mubr.msk.f32.gmra.mxu1 %vm269_vm1, %v242_v23 }
  0x26   : > { %1347 = vmatprep.mubr.msk.f32.mxu0 %vm269_vm1, %v211_v24  ;;  %1395 = vmatprep.mubr.msk.f32.mxu1 %vm269_vm1, %v243_v25 }
  0x29   : > { %1348 = vmatmul.mubr.msk.f32.gmra.mxu0 %vm269_vm1, %v212_v26  ;;  %1396 = vmatmul.mubr.msk.f32.gmra.mxu1 %vm269_vm1, %v244_v27 }
  0x2a   : > { %1350 = vmatprep.mubr.msk.f32.mxu0 %vm269_vm1, %v213_v28  ;;  %1398 = vmatprep.mubr.msk.f32.mxu1 %vm269_vm1, %v245_v29 }
  0x2d   : > { %1351 = vmatmul.mubr.msk.f32.gmra.mxu0 %vm269_vm1, %v214_v30  ;;  %1399 = vmatmul.mubr.msk.f32.gmra.mxu1 %vm269_vm1, %v246_v31 }
  0x2e   : > { %1353 = vmatprep.mubr.msk.f32.mxu0 %vm269_vm1, %v215_v32  ;;  %1401 = vmatprep.mubr.msk.f32.mxu1 %vm269_vm1, %v247_v33 }
  0x31   : > { %1354 = vmatmul.mubr.msk.f32.gmra.mxu0 %vm269_vm1, %v216_v34  ;;  %1402 = vmatmul.mubr.msk.f32.gmra.mxu1 %vm269_vm1, %v248_v35 }
  0x32   : > { %1356 = vmatprep.mubr.msk.f32.mxu0 %vm269_vm1, %v217_v36  ;;  %1404 = vmatprep.mubr.msk.f32.mxu1 %vm269_vm1, %v249_v37 }
  0x35   : > { %1357 = vmatmul.mubr.msk.f32.gmra.mxu0 %vm269_vm1, %v218_v38  ;;  %1405 = vmatmul.mubr.msk.f32.gmra.mxu1 %vm269_vm1, %v250_v39 }
  0x36   : > { %1359 = vmatprep.mubr.msk.f32.mxu0 %vm269_vm1, %v219_v40  ;;  %1407 = vmatprep.mubr.msk.f32.mxu1 %vm269_vm1, %v251_v41 }
  0x39   : > { %1360 = vmatmul.mubr.msk.f32.gmra.mxu0 %vm269_vm1, %v220_v42  ;;  %1408 = vmatmul.mubr.msk.f32.gmra.mxu1 %vm269_vm1, %v252_v43 }
  0x3a   : > { %1362 = vmatprep.mubr.msk.f32.mxu0 %vm269_vm1, %v221_v44  ;;  %1410 = vmatprep.mubr.msk.f32.mxu1 %vm269_vm1, %v253_v45 }
  0x3d   : > { %1363 = vmatmul.mubr.msk.f32.gmra.mxu0 %vm269_vm1, %v222_v46  ;;  %1411 = vmatmul.mubr.msk.f32.gmra.mxu1 %vm269_vm1, %v254_v47 }
  0x3e   : > { %1365 = vmatprep.mubr.msk.f32.mxu0 %vm269_vm1, %v223_v48  ;;  %1413 = vmatprep.mubr.msk.f32.mxu1 %vm269_vm1, %v255_v49 }
  0x41   : > { %1366 = vmatmul.mubr.msk.f32.gmra.mxu0 %vm269_vm1, %v224_v50  ;;  %1414 = vmatmul.mubr.msk.f32.gmra.mxu1 %vm269_vm1, %v256_v51 }
  0x42   : > { %1368 = vmatprep.mubr.msk.f32.mxu0 %vm269_vm1, %v225_v52  ;;  %1416 = vmatprep.mubr.msk.f32.mxu1 %vm269_vm1, %v257_v53 }
  0x45   : > { %1369 = vmatmul.mubr.msk.f32.gmra.mxu0 %vm269_vm1, %v226_v54  ;;  %1417 = vmatmul.mubr.msk.f32.gmra.mxu1 %vm269_vm1, %v258_v55 }
  0x46   : > { %1371 = vmatprep.mubr.msk.f32.mxu0 %vm269_vm1, %v227_v56  ;;  %1419 = vmatprep.mubr.msk.f32.mxu1 %vm269_vm1, %v259_v57 }
  0x49   : > { %1372 = vmatmul.mubr.msk.f32.gmra.mxu0 %vm269_vm1, %v228_v58  ;;  %1420 = vmatmul.mubr.msk.f32.gmra.mxu1 %vm269_vm1, %v260_v59 }
  0x4a   : > { %1374 = vmatprep.mubr.msk.f32.mxu0 %vm269_vm1, %v229_v60  ;;  %1422 = vmatprep.mubr.msk.f32.mxu1 %vm269_vm1, %v261_v61 }
  0x4d   : > { %1375 = vmatmul.mubr.msk.f32.gmra.mxu0 %vm269_vm1, %v230_v62  ;;  %1423 = vmatmul.mubr.msk.f32.gmra.mxu1 %vm269_vm1, %v262_v63 }
  0x4e   : > { %1377 = vmatprep.mubr.msk.f32.mxu0 %vm269_vm1, %v231_v0  ;;  %1425 = vmatprep.mubr.msk.f32.mxu1 %vm269_vm1, %v263_v1 }
  0x51   : > { %1378 = vmatmul.mubr.msk.f32.gmra.mxu0 %vm269_vm1, %v232_v2  ;;  %1426 = vmatmul.mubr.msk.f32.gmra.mxu1 %vm269_vm1, %v264_v3 }
  0xd5   : > { %v1334_v5 = vpop.f32.mrf.mxu0  ;;  %v1382_v7 = vpop.f32.mrf.mxu1 }
  0xd6   : > { %v859_v8 = vmul.f32 %v1334_v5, %v1638_v4  ;;  %v891_v9 = vmul.f32 %v1382_v7, %v1638_v4 }
  0xd7   : > { %v532_v10 = vpop.f32.mrf.mxu0  ;;  %v692_v11 = vpop.f32.mrf.mxu1 }
  0xd8   : > { %v930_v12 = vadd.f32 %v1643_v6, %v859_v8  ;;  %v962_v13 = vadd.f32 %v1643_v6, %v891_v9  ;;  %v858_v14 = vmul.f32 %v1638_v4, %v532_v10  ;;  %v890_v15 = vmul.f32 %v1638_v4, %v692_v11 }
  0xd9   : > { %v1337_v16 = vpop.f32.mrf.mxu0  ;;  %v1385_v17 = vpop.f32.mrf.mxu1 }
  0xda   : > { %v994_v18 = vmax.f32 %v930_v12, 0.0  ;;  %v1026_v19 = vmax.f32 %v962_v13, 0.0  ;;  %v929_v20 = vadd.f32 %v1643_v6, %v858_v14  ;;  %v961_v21 = vadd.f32 %v1643_v6, %v890_v15 }
  0xdb   : > { %v861_v22 = vmul.f32 %v1337_v16, %v1638_v4  ;;  %v893_v23 = vmul.f32 %v1385_v17, %v1638_v4  ;;  %v542_v24 = vpop.f32.mrf.mxu0  ;;  %v702_v25 = vpop.f32.mrf.mxu1 }
  0xdc   : > { %1059 = vst.msk [vmem:[%s1656_s10 + $0x8] sm:$0xff] %vm1057_vm2, %v994_v18  ;;  %1091 = vst.msk [vmem:[%s1656_s10 + $0x108] sm:$0xff] %vm1057_vm2, %v1026_v19  ;;  %v993_v26 = vmax.f32 %v929_v20, 0.0  ;;  %v1025_v27 = vmax.f32 %v961_v21, 0.0  ;;  %v860_v28 = vmul.f32 %v1638_v4, %v542_v24  ;;  %v892_v29 = vmul.f32 %v1638_v4, %v702_v25 }
  0xdd   : > { %v932_v30 = vadd.f32 %v1643_v6, %v861_v22  ;;  %v964_v31 = vadd.f32 %v1643_v6, %v893_v23  ;;  %v1340_v32 = vpop.f32.mrf.mxu0  ;;  %v1388_v33 = vpop.f32.mrf.mxu1 }
  0xde   : > { %1058 = vst.msk [vmem:[%s1656_s10] sm:$0xff] %vm1057_vm2, %v993_v26  ;;  %1090 = vst.msk [vmem:[%s1656_s10 + $0x100] sm:$0xff] %vm1057_vm2, %v1025_v27  ;;  %v931_v34 = vadd.f32 %v1643_v6, %v860_v28  ;;  %v963_v35 = vadd.f32 %v1643_v6, %v892_v29  ;;  %v863_v36 = vmul.f32 %v1340_v32, %v1638_v4 }
  0xdf   : > { %v895_v37 = vmul.f32 %v1388_v33, %v1638_v4  ;;  %v996_v38 = vmax.f32 %v932_v30, 0.0  ;;  %v1028_v39 = vmax.f32 %v964_v31, 0.0  ;;  %v552_v40 = vpop.f32.mrf.mxu0  ;;  %v712_v41 = vpop.f32.mrf.mxu1 }
  0xe0   : > { %v995_v42 = vmax.f32 %v931_v34, 0.0  ;;  %v1027_v43 = vmax.f32 %v963_v35, 0.0  ;;  %v934_v44 = vadd.f32 %v1643_v6, %v863_v36  ;;  %v862_v46 = vmul.f32 %v1638_v4, %v552_v40 }
  0xe1   : > { %v966_v45 = vadd.f32 %v1643_v6, %v895_v37  ;;  %1061 = vst.msk [vmem:[%s1656_s10 + $0x18] sm:$0xff] %vm1057_vm2, %v996_v38  ;;  %1093 = vst.msk [vmem:[%s1656_s10 + $0x118] sm:$0xff] %vm1057_vm2, %v1028_v39  ;;  %v894_v47 = vmul.f32 %v1638_v4, %v712_v41  ;;  %v1343_v48 = vpop.f32.mrf.mxu0  ;;  %v1391_v49 = vpop.f32.mrf.mxu1 }
  0xe2   : > { %1060 = vst.msk [vmem:[%s1656_s10 + $0x10] sm:$0xff] %vm1057_vm2, %v995_v42  ;;  %1092 = vst.msk [vmem:[%s1656_s10 + $0x110] sm:$0xff] %vm1057_vm2, %v1027_v43  ;;  %v998_v50 = vmax.f32 %v934_v44, 0.0  ;;  %v865_v52 = vmul.f32 %v1343_v48, %v1638_v4  ;;  %v897_v53 = vmul.f32 %v1391_v49, %v1638_v4  ;;  %v933_v54 = vadd.f32 %v1643_v6, %v862_v46 }
  0xe3   : > { %v1030_v51 = vmax.f32 %v966_v45, 0.0  ;;  %v965_v55 = vadd.f32 %v1643_v6, %v894_v47  ;;  %v562_v56 = vpop.f32.mrf.mxu0  ;;  %v722_v57 = vpop.f32.mrf.mxu1 }
  0xe4   : > { %1063 = vst.msk [vmem:[%s1656_s10 + $0x28] sm:$0xff] %vm1057_vm2, %v998_v50  ;;  %v936_v58 = vadd.f32 %v1643_v6, %v865_v52  ;;  %v968_v59 = vadd.f32 %v1643_v6, %v897_v53  ;;  %v864_v60 = vmul.f32 %v1638_v4, %v562_v56  ;;  %v896_v61 = vmul.f32 %v1638_v4, %v722_v57 }
  0xe5   : > { %1095 = vst.msk [vmem:[%s1656_s10 + $0x128] sm:$0xff] %vm1057_vm2, %v1030_v51  ;;  %v997_v62 = vmax.f32 %v933_v54, 0.0  ;;  %v1029_v63 = vmax.f32 %v965_v55, 0.0  ;;  %v1346_v0 = vpop.f32.mrf.mxu0  ;;  %v1394_v1 = vpop.f32.mrf.mxu1 }
  0xe6   : > { %v1000_v2 = vmax.f32 %v936_v58, 0.0  ;;  %v1032_v3 = vmax.f32 %v968_v59, 0.0  ;;  %v935_v5 = vadd.f32 %v1643_v6, %v864_v60  ;;  %v967_v7 = vadd.f32 %v1643_v6, %v896_v61 }
  0xe7   : > { %1062 = vst.msk [vmem:[%s1656_s10 + $0x20] sm:$0xff] %vm1057_vm2, %v997_v62  ;;  %1094 = vst.msk [vmem:[%s1656_s10 + $0x120] sm:$0xff] %vm1057_vm2, %v1029_v63  ;;  %v867_v8 = vmul.f32 %v1346_v0, %v1638_v4  ;;  %v899_v9 = vmul.f32 %v1394_v1, %v1638_v4  ;;  %v572_v10 = vpop.f32.mrf.mxu0  ;;  %v732_v11 = vpop.f32.mrf.mxu1 }
  0xe8   : > { %1065 = vst.msk [vmem:[%s1656_s10 + $0x38] sm:$0xff] %vm1057_vm2, %v1000_v2  ;;  %1097 = vst.msk [vmem:[%s1656_s10 + $0x138] sm:$0xff] %vm1057_vm2, %v1032_v3  ;;  %v999_v12 = vmax.f32 %v935_v5, 0.0  ;;  %v1031_v13 = vmax.f32 %v967_v7, 0.0  ;;  %v866_v14 = vmul.f32 %v1638_v4, %v572_v10  ;;  %v898_v15 = vmul.f32 %v1638_v4, %v732_v11 }
  0xe9   : > { %v938_v16 = vadd.f32 %v1643_v6, %v867_v8  ;;  %v970_v17 = vadd.f32 %v1643_v6, %v899_v9  ;;  %v1349_v18 = vpop.f32.mrf.mxu0  ;;  %v1397_v19 = vpop.f32.mrf.mxu1 }
  0xea   : > { %1064 = vst.msk [vmem:[%s1656_s10 + $0x30] sm:$0xff] %vm1057_vm2, %v999_v12  ;;  %1096 = vst.msk [vmem:[%s1656_s10 + $0x130] sm:$0xff] %vm1057_vm2, %v1031_v13  ;;  %v937_v20 = vadd.f32 %v1643_v6, %v866_v14  ;;  %v969_v21 = vadd.f32 %v1643_v6, %v898_v15  ;;  %v869_v22 = vmul.f32 %v1349_v18, %v1638_v4 }
  0xeb   : > { %v901_v23 = vmul.f32 %v1397_v19, %v1638_v4  ;;  %v1002_v24 = vmax.f32 %v938_v16, 0.0  ;;  %v1034_v25 = vmax.f32 %v970_v17, 0.0  ;;  %v582_v26 = vpop.f32.mrf.mxu0  ;;  %v742_v27 = vpop.f32.mrf.mxu1 }
  0xec   : > { %v1001_v28 = vmax.f32 %v937_v20, 0.0  ;;  %v1033_v29 = vmax.f32 %v969_v21, 0.0  ;;  %v940_v30 = vadd.f32 %v1643_v6, %v869_v22  ;;  %v868_v32 = vmul.f32 %v1638_v4, %v582_v26 }
  0xed   : > { %v972_v31 = vadd.f32 %v1643_v6, %v901_v23  ;;  %1067 = vst.msk [vmem:[%s1656_s10 + $0x48] sm:$0xff] %vm1057_vm2, %v1002_v24  ;;  %1099 = vst.msk [vmem:[%s1656_s10 + $0x148] sm:$0xff] %vm1057_vm2, %v1034_v25  ;;  %v900_v33 = vmul.f32 %v1638_v4, %v742_v27  ;;  %v1352_v34 = vpop.f32.mrf.mxu0  ;;  %v1400_v35 = vpop.f32.mrf.mxu1 }
  0xee   : > { %1066 = vst.msk [vmem:[%s1656_s10 + $0x40] sm:$0xff] %vm1057_vm2, %v1001_v28  ;;  %1098 = vst.msk [vmem:[%s1656_s10 + $0x140] sm:$0xff] %vm1057_vm2, %v1033_v29  ;;  %v1004_v36 = vmax.f32 %v940_v30, 0.0  ;;  %v871_v38 = vmul.f32 %v1352_v34, %v1638_v4  ;;  %v903_v39 = vmul.f32 %v1400_v35, %v1638_v4  ;;  %v939_v40 = vadd.f32 %v1643_v6, %v868_v32 }
  0xef   : > { %v1036_v37 = vmax.f32 %v972_v31, 0.0  ;;  %v971_v41 = vadd.f32 %v1643_v6, %v900_v33  ;;  %v592_v42 = vpop.f32.mrf.mxu0  ;;  %v752_v43 = vpop.f32.mrf.mxu1 }
  0xf0   : > { %1069 = vst.msk [vmem:[%s1656_s10 + $0x58] sm:$0xff] %vm1057_vm2, %v1004_v36  ;;  %v942_v44 = vadd.f32 %v1643_v6, %v871_v38  ;;  %v974_v45 = vadd.f32 %v1643_v6, %v903_v39  ;;  %v870_v46 = vmul.f32 %v1638_v4, %v592_v42  ;;  %v902_v47 = vmul.f32 %v1638_v4, %v752_v43 }
  0xf1   : > { %1101 = vst.msk [vmem:[%s1656_s10 + $0x158] sm:$0xff] %vm1057_vm2, %v1036_v37  ;;  %v1003_v48 = vmax.f32 %v939_v40, 0.0  ;;  %v1035_v49 = vmax.f32 %v971_v41, 0.0  ;;  %v1355_v50 = vpop.f32.mrf.mxu0  ;;  %v1403_v51 = vpop.f32.mrf.mxu1 }
  0xf2   : > { %v1006_v52 = vmax.f32 %v942_v44, 0.0  ;;  %v1038_v53 = vmax.f32 %v974_v45, 0.0  ;;  %v941_v54 = vadd.f32 %v1643_v6, %v870_v46  ;;  %v973_v55 = vadd.f32 %v1643_v6, %v902_v47 }
  0xf3   : > { %1068 = vst.msk [vmem:[%s1656_s10 + $0x50] sm:$0xff] %vm1057_vm2, %v1003_v48  ;;  %1100 = vst.msk [vmem:[%s1656_s10 + $0x150] sm:$0xff] %vm1057_vm2, %v1035_v49  ;;  %v873_v56 = vmul.f32 %v1355_v50, %v1638_v4  ;;  %v905_v57 = vmul.f32 %v1403_v51, %v1638_v4  ;;  %v602_v58 = vpop.f32.mrf.mxu0  ;;  %v762_v59 = vpop.f32.mrf.mxu1 }
  0xf4   : > { %1071 = vst.msk [vmem:[%s1656_s10 + $0x68] sm:$0xff] %vm1057_vm2, %v1006_v52  ;;  %1103 = vst.msk [vmem:[%s1656_s10 + $0x168] sm:$0xff] %vm1057_vm2, %v1038_v53  ;;  %v1005_v60 = vmax.f32 %v941_v54, 0.0  ;;  %v1037_v61 = vmax.f32 %v973_v55, 0.0  ;;  %v872_v62 = vmul.f32 %v1638_v4, %v602_v58  ;;  %v904_v63 = vmul.f32 %v1638_v4, %v762_v59 }
  0xf5   : > { %v944_v0 = vadd.f32 %v1643_v6, %v873_v56  ;;  %v976_v1 = vadd.f32 %v1643_v6, %v905_v57  ;;  %v1358_v2 = vpop.f32.mrf.mxu0  ;;  %v1406_v3 = vpop.f32.mrf.mxu1 }
  0xf6   : > { %1070 = vst.msk [vmem:[%s1656_s10 + $0x60] sm:$0xff] %vm1057_vm2, %v1005_v60  ;;  %1102 = vst.msk [vmem:[%s1656_s10 + $0x160] sm:$0xff] %vm1057_vm2, %v1037_v61  ;;  %v943_v5 = vadd.f32 %v1643_v6, %v872_v62  ;;  %v975_v7 = vadd.f32 %v1643_v6, %v904_v63  ;;  %v875_v8 = vmul.f32 %v1358_v2, %v1638_v4 }
  0xf7   : > { %v907_v9 = vmul.f32 %v1406_v3, %v1638_v4  ;;  %v1008_v10 = vmax.f32 %v944_v0, 0.0  ;;  %v1040_v11 = vmax.f32 %v976_v1, 0.0  ;;  %v612_v12 = vpop.f32.mrf.mxu0  ;;  %v772_v13 = vpop.f32.mrf.mxu1 }
  0xf8   : > { %v1007_v14 = vmax.f32 %v943_v5, 0.0  ;;  %v1039_v15 = vmax.f32 %v975_v7, 0.0  ;;  %v946_v16 = vadd.f32 %v1643_v6, %v875_v8  ;;  %v874_v18 = vmul.f32 %v1638_v4, %v612_v12 }
  0xf9   : > { %v978_v17 = vadd.f32 %v1643_v6, %v907_v9  ;;  %1073 = vst.msk [vmem:[%s1656_s10 + $0x78] sm:$0xff] %vm1057_vm2, %v1008_v10  ;;  %1105 = vst.msk [vmem:[%s1656_s10 + $0x178] sm:$0xff] %vm1057_vm2, %v1040_v11  ;;  %v906_v19 = vmul.f32 %v1638_v4, %v772_v13  ;;  %v1361_v20 = vpop.f32.mrf.mxu0  ;;  %v1409_v21 = vpop.f32.mrf.mxu1 }
  0xfa   : > { %1072 = vst.msk [vmem:[%s1656_s10 + $0x70] sm:$0xff] %vm1057_vm2, %v1007_v14  ;;  %1104 = vst.msk [vmem:[%s1656_s10 + $0x170] sm:$0xff] %vm1057_vm2, %v1039_v15  ;;  %v1010_v22 = vmax.f32 %v946_v16, 0.0  ;;  %v877_v24 = vmul.f32 %v1361_v20, %v1638_v4  ;;  %v909_v25 = vmul.f32 %v1409_v21, %v1638_v4  ;;  %v945_v26 = vadd.f32 %v1643_v6, %v874_v18 }
  0xfb   : > { %v1042_v23 = vmax.f32 %v978_v17, 0.0  ;;  %v977_v27 = vadd.f32 %v1643_v6, %v906_v19  ;;  %v622_v28 = vpop.f32.mrf.mxu0  ;;  %v782_v29 = vpop.f32.mrf.mxu1 }
  0xfc   : > { %1075 = vst.msk [vmem:[%s1656_s10 + $0x88] sm:$0xff] %vm1057_vm2, %v1010_v22  ;;  %v948_v30 = vadd.f32 %v1643_v6, %v877_v24  ;;  %v980_v31 = vadd.f32 %v1643_v6, %v909_v25  ;;  %v876_v32 = vmul.f32 %v1638_v4, %v622_v28  ;;  %v908_v33 = vmul.f32 %v1638_v4, %v782_v29 }
  0xfd   : > { %1107 = vst.msk [vmem:[%s1656_s10 + $0x188] sm:$0xff] %vm1057_vm2, %v1042_v23  ;;  %v1009_v34 = vmax.f32 %v945_v26, 0.0  ;;  %v1041_v35 = vmax.f32 %v977_v27, 0.0  ;;  %v1364_v36 = vpop.f32.mrf.mxu0  ;;  %v1412_v37 = vpop.f32.mrf.mxu1 }
  0xfe   : > { %v1012_v38 = vmax.f32 %v948_v30, 0.0  ;;  %v1044_v39 = vmax.f32 %v980_v31, 0.0  ;;  %v947_v40 = vadd.f32 %v1643_v6, %v876_v32  ;;  %v979_v41 = vadd.f32 %v1643_v6, %v908_v33 }
  0xff   : > { %1074 = vst.msk [vmem:[%s1656_s10 + $0x80] sm:$0xff] %vm1057_vm2, %v1009_v34  ;;  %1106 = vst.msk [vmem:[%s1656_s10 + $0x180] sm:$0xff] %vm1057_vm2, %v1041_v35  ;;  %v879_v42 = vmul.f32 %v1364_v36, %v1638_v4  ;;  %v911_v43 = vmul.f32 %v1412_v37, %v1638_v4  ;;  %v632_v44 = vpop.f32.mrf.mxu0  ;;  %v792_v45 = vpop.f32.mrf.mxu1 }
 0x100   : > { %1077 = vst.msk [vmem:[%s1656_s10 + $0x98] sm:$0xff] %vm1057_vm2, %v1012_v38  ;;  %1109 = vst.msk [vmem:[%s1656_s10 + $0x198] sm:$0xff] %vm1057_vm2, %v1044_v39  ;;  %v1011_v46 = vmax.f32 %v947_v40, 0.0  ;;  %v1043_v47 = vmax.f32 %v979_v41, 0.0  ;;  %v878_v48 = vmul.f32 %v1638_v4, %v632_v44  ;;  %v910_v49 = vmul.f32 %v1638_v4, %v792_v45 }
 0x101   : > { %v950_v50 = vadd.f32 %v1643_v6, %v879_v42  ;;  %v982_v51 = vadd.f32 %v1643_v6, %v911_v43  ;;  %v1367_v52 = vpop.f32.mrf.mxu0  ;;  %v1415_v53 = vpop.f32.mrf.mxu1 }
 0x102   : > { %1076 = vst.msk [vmem:[%s1656_s10 + $0x90] sm:$0xff] %vm1057_vm2, %v1011_v46  ;;  %1108 = vst.msk [vmem:[%s1656_s10 + $0x190] sm:$0xff] %vm1057_vm2, %v1043_v47  ;;  %v949_v54 = vadd.f32 %v1643_v6, %v878_v48  ;;  %v981_v55 = vadd.f32 %v1643_v6, %v910_v49  ;;  %v881_v56 = vmul.f32 %v1367_v52, %v1638_v4 }
 0x103   : > { %v913_v57 = vmul.f32 %v1415_v53, %v1638_v4  ;;  %v1014_v58 = vmax.f32 %v950_v50, 0.0  ;;  %v1046_v59 = vmax.f32 %v982_v51, 0.0  ;;  %v642_v60 = vpop.f32.mrf.mxu0  ;;  %v802_v61 = vpop.f32.mrf.mxu1 }
 0x104   : > { %v1013_v62 = vmax.f32 %v949_v54, 0.0  ;;  %v1045_v63 = vmax.f32 %v981_v55, 0.0  ;;  %v952_v0 = vadd.f32 %v1643_v6, %v881_v56  ;;  %v880_v2 = vmul.f32 %v1638_v4, %v642_v60 }
 0x105   : > { %v984_v1 = vadd.f32 %v1643_v6, %v913_v57  ;;  %1079 = vst.msk [vmem:[%s1656_s10 + $0xa8] sm:$0xff] %vm1057_vm2, %v1014_v58  ;;  %1111 = vst.msk [vmem:[%s1656_s10 + $0x1a8] sm:$0xff] %vm1057_vm2, %v1046_v59  ;;  %v912_v3 = vmul.f32 %v1638_v4, %v802_v61  ;;  %v1370_v5 = vpop.f32.mrf.mxu0  ;;  %v1418_v7 = vpop.f32.mrf.mxu1 }
 0x106   : > { %1078 = vst.msk [vmem:[%s1656_s10 + $0xa0] sm:$0xff] %vm1057_vm2, %v1013_v62  ;;  %1110 = vst.msk [vmem:[%s1656_s10 + $0x1a0] sm:$0xff] %vm1057_vm2, %v1045_v63  ;;  %v1016_v8 = vmax.f32 %v952_v0, 0.0  ;;  %v883_v10 = vmul.f32 %v1370_v5, %v1638_v4  ;;  %v915_v11 = vmul.f32 %v1418_v7, %v1638_v4  ;;  %v951_v12 = vadd.f32 %v1643_v6, %v880_v2 }
 0x107   : > { %v1048_v9 = vmax.f32 %v984_v1, 0.0  ;;  %v983_v13 = vadd.f32 %v1643_v6, %v912_v3  ;;  %v652_v14 = vpop.f32.mrf.mxu0  ;;  %v812_v15 = vpop.f32.mrf.mxu1 }
 0x108   : > { %1081 = vst.msk [vmem:[%s1656_s10 + $0xb8] sm:$0xff] %vm1057_vm2, %v1016_v8  ;;  %v954_v16 = vadd.f32 %v1643_v6, %v883_v10  ;;  %v986_v17 = vadd.f32 %v1643_v6, %v915_v11  ;;  %v882_v18 = vmul.f32 %v1638_v4, %v652_v14  ;;  %v914_v19 = vmul.f32 %v1638_v4, %v812_v15 }
 0x109   : > { %1113 = vst.msk [vmem:[%s1656_s10 + $0x1b8] sm:$0xff] %vm1057_vm2, %v1048_v9  ;;  %v1015_v20 = vmax.f32 %v951_v12, 0.0  ;;  %v1047_v21 = vmax.f32 %v983_v13, 0.0  ;;  %v1373_v22 = vpop.f32.mrf.mxu0  ;;  %v1421_v23 = vpop.f32.mrf.mxu1 }
 0x10a   : > { %v1018_v24 = vmax.f32 %v954_v16, 0.0  ;;  %v1050_v25 = vmax.f32 %v986_v17, 0.0  ;;  %v953_v26 = vadd.f32 %v1643_v6, %v882_v18  ;;  %v985_v27 = vadd.f32 %v1643_v6, %v914_v19 }
 0x10b   : > { %1080 = vst.msk [vmem:[%s1656_s10 + $0xb0] sm:$0xff] %vm1057_vm2, %v1015_v20  ;;  %1112 = vst.msk [vmem:[%s1656_s10 + $0x1b0] sm:$0xff] %vm1057_vm2, %v1047_v21  ;;  %v885_v28 = vmul.f32 %v1373_v22, %v1638_v4  ;;  %v917_v29 = vmul.f32 %v1421_v23, %v1638_v4  ;;  %v662_v30 = vpop.f32.mrf.mxu0  ;;  %v822_v31 = vpop.f32.mrf.mxu1 }
 0x10c   : > { %1083 = vst.msk [vmem:[%s1656_s10 + $0xc8] sm:$0xff] %vm1057_vm2, %v1018_v24  ;;  %1115 = vst.msk [vmem:[%s1656_s10 + $0x1c8] sm:$0xff] %vm1057_vm2, %v1050_v25  ;;  %v1017_v32 = vmax.f32 %v953_v26, 0.0  ;;  %v1049_v33 = vmax.f32 %v985_v27, 0.0  ;;  %v884_v34 = vmul.f32 %v1638_v4, %v662_v30  ;;  %v916_v35 = vmul.f32 %v1638_v4, %v822_v31 }
 0x10d   : > { %v956_v36 = vadd.f32 %v1643_v6, %v885_v28  ;;  %v988_v37 = vadd.f32 %v1643_v6, %v917_v29  ;;  %v1376_v38 = vpop.f32.mrf.mxu0  ;;  %v1424_v39 = vpop.f32.mrf.mxu1 }
 0x10e   : > { %1082 = vst.msk [vmem:[%s1656_s10 + $0xc0] sm:$0xff] %vm1057_vm2, %v1017_v32  ;;  %1114 = vst.msk [vmem:[%s1656_s10 + $0x1c0] sm:$0xff] %vm1057_vm2, %v1049_v33  ;;  %v955_v40 = vadd.f32 %v1643_v6, %v884_v34  ;;  %v987_v41 = vadd.f32 %v1643_v6, %v916_v35  ;;  %v887_v42 = vmul.f32 %v1376_v38, %v1638_v4 }
 0x10f   : > { %v919_v43 = vmul.f32 %v1424_v39, %v1638_v4  ;;  %v1020_v44 = vmax.f32 %v956_v36, 0.0  ;;  %v1052_v45 = vmax.f32 %v988_v37, 0.0  ;;  %v672_v46 = vpop.f32.mrf.mxu0  ;;  %v832_v47 = vpop.f32.mrf.mxu1 }
 0x110   : > { %v1019_v48 = vmax.f32 %v955_v40, 0.0  ;;  %v1051_v49 = vmax.f32 %v987_v41, 0.0  ;;  %v958_v50 = vadd.f32 %v1643_v6, %v887_v42  ;;  %v886_v52 = vmul.f32 %v1638_v4, %v672_v46 }
 0x111   : > { %v990_v51 = vadd.f32 %v1643_v6, %v919_v43  ;;  %1085 = vst.msk [vmem:[%s1656_s10 + $0xd8] sm:$0xff] %vm1057_vm2, %v1020_v44  ;;  %1117 = vst.msk [vmem:[%s1656_s10 + $0x1d8] sm:$0xff] %vm1057_vm2, %v1052_v45  ;;  %v918_v53 = vmul.f32 %v1638_v4, %v832_v47  ;;  %v1379_v54 = vpop.f32.mrf.mxu0  ;;  %v1427_v55 = vpop.f32.mrf.mxu1 }
 0x112   : > { %1084 = vst.msk [vmem:[%s1656_s10 + $0xd0] sm:$0xff] %vm1057_vm2, %v1019_v48  ;;  %1116 = vst.msk [vmem:[%s1656_s10 + $0x1d0] sm:$0xff] %vm1057_vm2, %v1051_v49  ;;  %v1022_v56 = vmax.f32 %v958_v50, 0.0  ;;  %v889_v58 = vmul.f32 %v1379_v54, %v1638_v4  ;;  %v921_v59 = vmul.f32 %v1427_v55, %v1638_v4  ;;  %v957_v60 = vadd.f32 %v1643_v6, %v886_v52 }
 0x113   : > { %v1054_v57 = vmax.f32 %v990_v51, 0.0  ;;  %v989_v61 = vadd.f32 %v1643_v6, %v918_v53  ;;  %v682_v62 = vpop.f32.mrf.mxu0  ;;  %v842_v63 = vpop.f32.mrf.mxu1 }
 0x114   : > { %1087 = vst.msk [vmem:[%s1656_s10 + $0xe8] sm:$0xff] %vm1057_vm2, %v1022_v56  ;;  %v960_v0 = vadd.f32 %v1643_v6, %v889_v58  ;;  %v992_v1 = vadd.f32 %v1643_v6, %v921_v59  ;;  %v888_v2 = vmul.f32 %v1638_v4, %v682_v62  ;;  %v920_v3 = vmul.f32 %v1638_v4, %v842_v63 }
 0x115   : > { %1119 = vst.msk [vmem:[%s1656_s10 + $0x1e8] sm:$0xff] %vm1057_vm2, %v1054_v57  ;;  %v1021_v5 = vmax.f32 %v957_v60, 0.0  ;;  %v1053_v7 = vmax.f32 %v989_v61, 0.0 }
 0x116   : > { %v1024_v8 = vmax.f32 %v960_v0, 0.0  ;;  %v1056_v9 = vmax.f32 %v992_v1, 0.0  ;;  %v959_v10 = vadd.f32 %v1643_v6, %v888_v2  ;;  %v991_v11 = vadd.f32 %v1643_v6, %v920_v3 }
 0x117   : > { %1086 = vst.msk [vmem:[%s1656_s10 + $0xe0] sm:$0xff] %vm1057_vm2, %v1021_v5  ;;  %1118 = vst.msk [vmem:[%s1656_s10 + $0x1e0] sm:$0xff] %vm1057_vm2, %v1053_v7 }
 0x118   : > { %1089 = vst.msk [vmem:[%s1656_s10 + $0xf8] sm:$0xff] %vm1057_vm2, %v1024_v8  ;;  %1121 = vst.msk [vmem:[%s1656_s10 + $0x1f8] sm:$0xff] %vm1057_vm2, %v1056_v9  ;;  %v1023_v12 = vmax.f32 %v959_v10, 0.0  ;;  %v1055_v13 = vmax.f32 %v991_v11, 0.0 }
 0x11a   : > { %1088 = vst.msk [vmem:[%s1656_s10 + $0xf0] sm:$0xff] %vm1057_vm2, %v1023_v12  ;;  %1120 = vst.msk [vmem:[%s1656_s10 + $0x1f0] sm:$0xff] %vm1057_vm2, %v1055_v13 }
 0x11b PF: > { %s14_s15 = sadd.s32 1, %s1450_s15  }
 0x11c   : > { %p11_p4 = scmp.ge.s32.totalorder %s14_s15, 15  }
 0x11e   :  { %13 = sbr.rel (!%p11_p4) target bundleno = 1 (0x1), region = 66 }

// kernel: cnnplus_forward.4
= control target key start
LH: loop header
LB: loop body
LE: loop exit
PB: predicated region body
PF: predicated region fallthrough
CT: control target
= control target key end

     0   :  { %s1924_s15 = smov 0   ;;  %s2807_s0 = inlined_call_operand.vmem [shape: f32[2048,400], index: 0, kind: input, shape index: {}]   ;;  %s2808_s1 = inlined_call_operand.vmem [shape: f32[400,64], index: 1, kind: input, shape index: {}]   ;;  %s2809_s2 = inlined_call_operand.vmem [shape: f32[1,64], index: 2, kind: input, shape index: {}]   ;;  %s2810_s3 = inlined_call_operand.vmem [shape: f32[1,64], index: 3, kind: input, shape index: {}]   ;;  %s2811_s4 = inlined_call_operand.vmem [shape: f32[2048,64], index: 4, kind: output, shape index: {}]  }
   0x1 LB: > { %s1800_s16 = sadd.s32 4294967295, %s1896_s15   ;;  %p1804_p0 = scmp.ge.s32.totalorder %s1896_s15, 1  ;;  %s1896_s15 = sphi %s1924_s15, %s14_s15  }
   0x2   : > { %p164_p1 = scmp.lt.s32.totalorder %s1896_s15, 5 }
   0x4   : > { %p165_p2 = pnand %p1804_p0, %p164_p1 }
   0x5   : > { %s1805_s9 = sshll.u32 (!%p165_p2), %s1800_s16, 6 }
   0x6   : > { %168 = sbr.rel (%p165_p2) target bundleno = 530 (0x212), region = 36  ;;  %p192_p3 = scmp.lt.s32.totalorder (!%p165_p2), %s1805_s9, 255 }
   0xb   : > { %v475_v0 = vld [vmem:[%s2808_s1 + $0x78] sm:$0xff]  ;;  %v1898_v1 = vmov 0.0   ;;  %v474_v2 = vld [vmem:[%s2808_s1 + $0x70] sm:$0xff]  ;;  %v473_v3 = vld [vmem:[%s2808_s1 + $0x68] sm:$0xff]  ;;  %s2813_s9 = smov (!%p192_p3, %s1805_s9), 255  ;;  %vm510_vm0 = vcmask 130048  }
   0xc   : > { %703 = vmatprep.subr.mxu0 %v1898_v1  ;;  %1088 = vmatprep.subr.mxu1 %v1898_v1  ;;  %v507_v4 = vld [vmem:[%s2808_s1 + $0x178] sm:$0xff]  ;;  %v472_v5 = vld [vmem:[%s2808_s1 + $0x60] sm:$0xff]  ;;  %v506_v6 = vld [vmem:[%s2808_s1 + $0x170] sm:$0xff]  ;;  %s1878_s7 = sshll.u32 %s2813_s9, 5  ;;  %s1809_s30 = sshll.u32 %s2813_s9, 3  ;;  %vm1679_vm1 = vcmask 523264  }
   0xd   : > { %704 = vmatpush1.msra.mxu0 %v475_v0  ;;  %1089 = vmatpush1.msra.mxu1 %v507_v4  ;;  %v505_v7 = vld [vmem:[%s2808_s1 + $0x168] sm:$0xff]  ;;  %v471_v8 = vld [vmem:[%s2808_s1 + $0x58] sm:$0xff]  ;;  %v504_v9 = vld [vmem:[%s2808_s1 + $0x160] sm:$0xff]  ;;  %s2078_s18 = scalar_lea.vmem %s2807_s0, %s1878_s7  ;;  %s2449_s9 = scalar_lea.vmem %s2811_s4, %s1809_s30 }
   0xe   : > { %705 = vmatprep.subr.mxu0 %v1898_v1  ;;  %1090 = vmatprep.subr.mxu1 %v1898_v1  ;;  %v470_v10 = vld [vmem:[%s2808_s1 + $0x50] sm:$0xff]  ;;  %v503_v11 = vld [vmem:[%s2808_s1 + $0x158] sm:$0xff]  ;;  %v469_v12 = vld [vmem:[%s2808_s1 + $0x48] sm:$0xff] }
   0xf   : > { %706 = vmatpush1.msra.mxu0 %v474_v2  ;;  %1091 = vmatpush1.msra.mxu1 %v506_v6  ;;  %v502_v13 = vld [vmem:[%s2808_s1 + $0x150] sm:$0xff]  ;;  %v468_v14 = vld [vmem:[%s2808_s1 + $0x40] sm:$0xff]  ;;  %v501_v15 = vld [vmem:[%s2808_s1 + $0x148] sm:$0xff] }
  0x10   : > { %707 = vmatprep.subr.mxu0 %v1898_v1  ;;  %1092 = vmatprep.subr.mxu1 %v1898_v1  ;;  %v467_v16 = vld [vmem:[%s2808_s1 + $0x38] sm:$0xff]  ;;  %v500_v17 = vld [vmem:[%s2808_s1 + $0x140] sm:$0xff]  ;;  %v466_v18 = vld [vmem:[%s2808_s1 + $0x30] sm:$0xff] }
  0x11   : > { %708 = vmatpush1.msra.mxu0 %v473_v3  ;;  %1093 = vmatpush1.msra.mxu1 %v505_v7  ;;  %v499_v19 = vld [vmem:[%s2808_s1 + $0x138] sm:$0xff]  ;;  %v465_v20 = vld [vmem:[%s2808_s1 + $0x28] sm:$0xff]  ;;  %v498_v21 = vld [vmem:[%s2808_s1 + $0x130] sm:$0xff] }
  0x12   : > { %709 = vmatprep.subr.mxu0 %v1898_v1  ;;  %1094 = vmatprep.subr.mxu1 %v1898_v1  ;;  %v464_v22 = vld [vmem:[%s2808_s1 + $0x20] sm:$0xff]  ;;  %v497_v23 = vld [vmem:[%s2808_s1 + $0x128] sm:$0xff]  ;;  %v463_v24 = vld [vmem:[%s2808_s1 + $0x18] sm:$0xff] }
  0x13   : > { %710 = vmatpush1.msra.mxu0 %v472_v5  ;;  %1095 = vmatpush1.msra.mxu1 %v504_v9  ;;  %v496_v25 = vld [vmem:[%s2808_s1 + $0x120] sm:$0xff]  ;;  %v462_v26 = vld [vmem:[%s2808_s1 + $0x10] sm:$0xff]  ;;  %v495_v27 = vld [vmem:[%s2808_s1 + $0x118] sm:$0xff] }
  0x14   : > { %711 = vmatprep.subr.mxu0 %v1898_v1  ;;  %1096 = vmatprep.subr.mxu1 %v1898_v1  ;;  %v461_v28 = vld [vmem:[%s2808_s1 + $0x8] sm:$0xff]  ;;  %v494_v29 = vld [vmem:[%s2808_s1 + $0x110] sm:$0xff]  ;;  %v460_v30 = vld [vmem:[%s2808_s1] sm:$0xff] }
  0x15   : > { %712 = vmatpush1.msra.mxu0 %v471_v8  ;;  %1097 = vmatpush1.msra.mxu1 %v503_v11  ;;  %v493_v31 = vld [vmem:[%s2808_s1 + $0x108] sm:$0xff]  ;;  %v491_v32 = vld [vmem:[%s2808_s1 + $0xf8] sm:$0xff]  ;;  %v492_v33 = vld [vmem:[%s2808_s1 + $0x100] sm:$0xff] }
  0x16   : > { %713 = vmatprep.subr.mxu0 %v1898_v1  ;;  %1098 = vmatprep.subr.mxu1 %v1898_v1  ;;  %v490_v34 = vld [vmem:[%s2808_s1 + $0xf0] sm:$0xff]  ;;  %v509_v35 = vld [vmem:[%s2808_s1 + $0x188] sm:$0xff]  ;;  %v508_v37 = vld [vmem:[%s2808_s1 + $0x180] sm:$0xff] }
  0x17   : > { %714 = vmatpush1.msra.mxu0 %v470_v10  ;;  %1099 = vmatpush1.msra.mxu1 %v502_v13  ;;  %v489_v36 = vld [vmem:[%s2808_s1 + $0xe8] sm:$0xff]  ;;  %v488_v38 = vld [vmem:[%s2808_s1 + $0xe0] sm:$0xff]  ;;  %v207_v39 = vld [vmem:[%s2078_s18 + $0x18] sm:$0xff] }
  0x18   : > { %715 = vmatprep.subr.mxu0 %v1898_v1  ;;  %1100 = vmatprep.subr.mxu1 %v1898_v1  ;;  %v206_v40 = vld [vmem:[%s2078_s18 + $0x10] sm:$0xff]  ;;  %v487_v41 = vld [vmem:[%s2808_s1 + $0xd8] sm:$0xff]  ;;  %v205_v42 = vld [vmem:[%s2078_s18 + $0x8] sm:$0xff] }
  0x19   : > { %716 = vmatpush1.msra.mxu0 %v469_v12  ;;  %1101 = vmatpush1.msra.mxu1 %v501_v15  ;;  %v211_v43 = vld [vmem:[%s2078_s18 + $0x38] sm:$0xff]  ;;  %v486_v44 = vld [vmem:[%s2808_s1 + $0xd0] sm:$0xff]  ;;  %v485_v46 = vld [vmem:[%s2808_s1 + $0xc8] sm:$0xff] }
  0x1a   : > { %717 = vmatprep.subr.mxu0 %v1898_v1  ;;  %1102 = vmatprep.subr.mxu1 %v1898_v1  ;;  %v210_v45 = vld [vmem:[%s2078_s18 + $0x30] sm:$0xff]  ;;  %v215_v47 = vld [vmem:[%s2078_s18 + $0x58] sm:$0xff]  ;;  %v484_v48 = vld [vmem:[%s2808_s1 + $0xc0] sm:$0xff] }
  0x1b   : > { %718 = vmatpush1.msra.mxu0 %v468_v14  ;;  %1103 = vmatpush1.msra.mxu1 %v500_v17  ;;  %v214_v49 = vld [vmem:[%s2078_s18 + $0x50] sm:$0xff]  ;;  %v483_v50 = vld [vmem:[%s2808_s1 + $0xb8] sm:$0xff]  ;;  %v481_v54 = vld [vmem:[%s2808_s1 + $0xa8] sm:$0xff] }
  0x1c   : > { %719 = vmatprep.subr.mxu0 %v1898_v1  ;;  %1104 = vmatprep.subr.mxu1 %v1898_v1  ;;  %v219_v51 = vld [vmem:[%s2078_s18 + $0x78] sm:$0xff]  ;;  %v482_v52 = vld [vmem:[%s2808_s1 + $0xb0] sm:$0xff]  ;;  %v480_v56 = vld [vmem:[%s2808_s1 + $0xa0] sm:$0xff] }
  0x1d   : > { %720 = vmatpush1.msra.mxu0 %v467_v16  ;;  %1105 = vmatpush1.msra.mxu1 %v499_v19  ;;  %v218_v53 = vld [vmem:[%s2078_s18 + $0x70] sm:$0xff]  ;;  %v223_v55 = vld [vmem:[%s2078_s18 + $0x98] sm:$0xff]  ;;  %v477_v62 = vld [vmem:[%s2808_s1 + $0x88] sm:$0xff] }
  0x1e   : > { %721 = vmatprep.subr.mxu0 %v1898_v1  ;;  %1106 = vmatprep.subr.mxu1 %v1898_v1  ;;  %v222_v57 = vld [vmem:[%s2078_s18 + $0x90] sm:$0xff]  ;;  %v479_v58 = vld [vmem:[%s2808_s1 + $0x98] sm:$0xff]  ;;  %v476_v0 = vld [vmem:[%s2808_s1 + $0x80] sm:$0xff] }
  0x1f   : > { %722 = vmatpush1.msra.mxu0 %v466_v18  ;;  %1107 = vmatpush1.msra.mxu1 %v498_v21  ;;  %v227_v59 = vld [vmem:[%s2078_s18 + $0xb8] sm:$0xff]  ;;  %v478_v60 = vld [vmem:[%s2808_s1 + $0x90] sm:$0xff]  ;;  %v204_v2 = vld [vmem:[%s2078_s18] sm:$0xff] }
  0x20   : > { %723 = vmatprep.subr.mxu0 %v1898_v1  ;;  %1108 = vmatprep.subr.mxu1 %v1898_v1  ;;  %v226_v61 = vld [vmem:[%s2078_s18 + $0xb0] sm:$0xff]  ;;  %v231_v63 = vld [vmem:[%s2078_s18 + $0xd8] sm:$0xff]  ;;  %v209_v4 = vld [vmem:[%s2078_s18 + $0x28] sm:$0xff] }
  0x21   : > { %724 = vmatpush1.msra.mxu0 %v465_v20  ;;  %1109 = vmatpush1.msra.mxu1 %v497_v23  ;;  %v230_v3 = vld [vmem:[%s2078_s18 + $0xd0] sm:$0xff]  ;;  %v235_v5 = vld [vmem:[%s2078_s18 + $0xf8] sm:$0xff]  ;;  %v208_v6 = vld [vmem:[%s2078_s18 + $0x20] sm:$0xff] }
  0x22   : > { %725 = vmatprep.subr.mxu0 %v1898_v1  ;;  %1110 = vmatprep.subr.mxu1 %v1898_v1  ;;  %v234_v7 = vld [vmem:[%s2078_s18 + $0xf0] sm:$0xff]  ;;  %v213_v8 = vld [vmem:[%s2078_s18 + $0x48] sm:$0xff]  ;;  %v239_v9 = vld [vmem:[%s2078_s18 + $0x118] sm:$0xff] }
  0x23   : > { %726 = vmatpush1.msra.mxu0 %v464_v22  ;;  %1111 = vmatpush1.msra.mxu1 %v496_v25  ;;  %v238_v10 = vld [vmem:[%s2078_s18 + $0x110] sm:$0xff]  ;;  %v217_v11 = vld [vmem:[%s2078_s18 + $0x68] sm:$0xff]  ;;  %v243_v12 = vld [vmem:[%s2078_s18 + $0x138] sm:$0xff] }
  0x24   : > { %727 = vmatprep.subr.mxu0 %v1898_v1  ;;  %1112 = vmatprep.subr.mxu1 %v1898_v1  ;;  %v216_v13 = vld [vmem:[%s2078_s18 + $0x60] sm:$0xff]  ;;  %v242_v14 = vld [vmem:[%s2078_s18 + $0x130] sm:$0xff]  ;;  %v221_v15 = vld [vmem:[%s2078_s18 + $0x88] sm:$0xff] }
  0x25   : > { %728 = vmatpush1.msra.mxu0 %v463_v24  ;;  %1113 = vmatpush1.msra.mxu1 %v495_v27  ;;  %v247_v16 = vld [vmem:[%s2078_s18 + $0x158] sm:$0xff]  ;;  %v220_v17 = vld [vmem:[%s2078_s18 + $0x80] sm:$0xff]  ;;  %v246_v18 = vld [vmem:[%s2078_s18 + $0x150] sm:$0xff] }
  0x26   : > { %729 = vmatprep.subr.mxu0 %v1898_v1  ;;  %1114 = vmatprep.subr.mxu1 %v1898_v1  ;;  %v225_v19 = vld [vmem:[%s2078_s18 + $0xa8] sm:$0xff]  ;;  %v251_v20 = vld [vmem:[%s2078_s18 + $0x178] sm:$0xff]  ;;  %v224_v21 = vld [vmem:[%s2078_s18 + $0xa0] sm:$0xff] }
  0x27   : > { %730 = vmatpush1.msra.mxu0 %v462_v26  ;;  %1115 = vmatpush1.msra.mxu1 %v494_v29  ;;  %v250_v22 = vld [vmem:[%s2078_s18 + $0x170] sm:$0xff]  ;;  %v229_v23 = vld [vmem:[%s2078_s18 + $0xc8] sm:$0xff]  ;;  %v255_v24 = vld [vmem:[%s2078_s18 + $0x198] sm:$0xff] }
  0x28   : > { %731 = vmatprep.subr.mxu0 %v1898_v1  ;;  %1116 = vmatprep.subr.mxu1 %v1898_v1  ;;  %v228_v25 = vld [vmem:[%s2078_s18 + $0xc0] sm:$0xff]  ;;  %v254_v26 = vld [vmem:[%s2078_s18 + $0x190] sm:$0xff]  ;;  %v233_v27 = vld [vmem:[%s2078_s18 + $0xe8] sm:$0xff] }
  0x29   : > { %732 = vmatpush1.msra.mxu0 %v461_v28  ;;  %1117 = vmatpush1.msra.mxu1 %v493_v31  ;;  %v259_v28 = vld [vmem:[%s2078_s18 + $0x1b8] sm:$0xff]  ;;  %v232_v29 = vld [vmem:[%s2078_s18 + $0xe0] sm:$0xff]  ;;  %v237_v31 = vld [vmem:[%s2078_s18 + $0x108] sm:$0xff] }
  0x2a   : > { %733 = vmatprep.subr.mxu0 %v1898_v1  ;;  %1118 = vmatprep.subr.mxu1 %v1898_v1 }
  0x2b   : > { %734 = vmatpush1.msra.mxu0 %v460_v30  ;;  %1119 = vmatpush1.msra.mxu1 %v492_v33  ;;  %v258_v30 = vld [vmem:[%s2078_s18 + $0x1b0] sm:$0xff]  ;;  %v236_v33 = vld [vmem:[%s2078_s18 + $0x100] sm:$0xff] }
  0x2c   : > { %735 = vmatprep.subr.mxu0 %v1898_v1  ;;  %1148 = vmatprep.subr.mxu1 %v1898_v1 }
  0x2d   : > { %736 = vmatpush2.msra.mxu0 %v491_v32  ;;  %1149 = vmatpush2.msra.mxu1 %v509_v35  ;;  %v263_v32 = vld [vmem:[%s2078_s18 + $0x1d8] sm:$0xff]  ;;  %v241_v35 = vld [vmem:[%s2078_s18 + $0x128] sm:$0xff] }
  0x2e   : > { %737 = vmatprep.subr.mxu0 %v1898_v1  ;;  %1150 = vmatprep.subr.mxu1 %v1898_v1 }
  0x2f   : > { %738 = vmatpush2.msra.mxu0 %v490_v34  ;;  %1151 = vmatpush2.msra.mxu1 %v508_v37  ;;  %v262_v34 = vld [vmem:[%s2078_s18 + $0x1d0] sm:$0xff]  ;;  %v240_v37 = vld [vmem:[%s2078_s18 + $0x120] sm:$0xff] }
  0x30   : > { %739 = vmatprep.subr.mxu0 %v1898_v1  ;;  %1810 = vmatprep.mubr.msk.f32.mxu1 %vm510_vm0, %v207_v39  ;;  %v245_v39 = vld [vmem:[%s2078_s18 + $0x148] sm:$0xff] }
  0x31   : > { %740 = vmatpush2.msra.mxu0 %v489_v36  ;;  %1153 = vmatmul.mubr.f32.vlgmr.msra.gmra.mxu1 %v206_v40  ;;  %v267_v36 = vld [vmem:[%s2078_s18 + $0x1f8] sm:$0xff] }
  0x32   : > { %741 = vmatprep.subr.mxu0 %v1898_v1  ;;  %767 = vmatprep.mubr.f32.mxu0 %v205_v42  ;;  %v271_v40 = vld [vmem:[%s2078_s18 + $0x218] sm:$0xff]  ;;  %v270_v42 = vld [vmem:[%s2078_s18 + $0x210] sm:$0xff] }
  0x33   : > { %742 = vmatpush2.msra.mxu0 %v488_v38  ;;  %1811 = vmatprep.mubr.msk.f32.mxu1 %vm510_vm0, %v211_v43  ;;  %v266_v38 = vld [vmem:[%s2078_s18 + $0x1f0] sm:$0xff]  ;;  %v249_v43 = vld [vmem:[%s2078_s18 + $0x168] sm:$0xff] }
  0x34   : > { %743 = vmatprep.subr.mxu0 %v1898_v1 }
  0x35   : > { %744 = vmatpush2.msra.mxu0 %v487_v41  ;;  %1158 = vmatmul.mubr.f32.gmra.mxu1 %v210_v45  ;;  %v244_v41 = vld [vmem:[%s2078_s18 + $0x140] sm:$0xff] }
  0x36   : > { %745 = vmatprep.subr.mxu0 %v1898_v1  ;;  %1812 = vmatprep.mubr.msk.f32.mxu1 %vm510_vm0, %v215_v47  ;;  %v248_v45 = vld [vmem:[%s2078_s18 + $0x160] sm:$0xff]  ;;  %v253_v47 = vld [vmem:[%s2078_s18 + $0x188] sm:$0xff] }
  0x37   : > { %746 = vmatpush2.msra.mxu0 %v486_v44  ;;  %v275_v44 = vld [vmem:[%s2078_s18 + $0x238] sm:$0xff] }
  0x38   : > { %747 = vmatprep.subr.mxu0 %v1898_v1 }
  0x39   : > { %748 = vmatpush2.msra.mxu0 %v485_v46  ;;  %1163 = vmatmul.mubr.f32.gmra.mxu1 %v214_v49  ;;  %v274_v46 = vld [vmem:[%s2078_s18 + $0x230] sm:$0xff]  ;;  %v252_v49 = vld [vmem:[%s2078_s18 + $0x180] sm:$0xff] }
  0x3a   : > { %749 = vmatprep.subr.mxu0 %v1898_v1  ;;  %1813 = vmatprep.mubr.msk.f32.mxu1 %vm510_vm0, %v219_v51  ;;  %v257_v51 = vld [vmem:[%s2078_s18 + $0x1a8] sm:$0xff] }
  0x3b   : > { %750 = vmatpush2.msra.mxu0 %v484_v48  ;;  %v279_v48 = vld [vmem:[%s2078_s18 + $0x258] sm:$0xff] }
  0x3c   : > { %751 = vmatprep.subr.mxu0 %v1898_v1 }
  0x3d   : > { %752 = vmatpush2.msra.mxu0 %v483_v50  ;;  %1168 = vmatmul.mubr.f32.gmra.mxu1 %v218_v53  ;;  %v278_v50 = vld [vmem:[%s2078_s18 + $0x250] sm:$0xff]  ;;  %v256_v53 = vld [vmem:[%s2078_s18 + $0x1a0] sm:$0xff] }
  0x3e   : > { %753 = vmatprep.subr.mxu0 %v1898_v1  ;;  %1814 = vmatprep.mubr.msk.f32.mxu1 %vm510_vm0, %v223_v55  ;;  %v261_v55 = vld [vmem:[%s2078_s18 + $0x1c8] sm:$0xff] }
  0x3f   : > { %754 = vmatpush2.msra.mxu0 %v482_v52  ;;  %v283_v52 = vld [vmem:[%s2078_s18 + $0x278] sm:$0xff] }
  0x40   : > { %755 = vmatprep.subr.mxu0 %v1898_v1 }
  0x41   : > { %756 = vmatpush2.msra.mxu0 %v481_v54  ;;  %1173 = vmatmul.mubr.f32.gmra.mxu1 %v222_v57  ;;  %v282_v54 = vld [vmem:[%s2078_s18 + $0x270] sm:$0xff]  ;;  %v260_v57 = vld [vmem:[%s2078_s18 + $0x1c0] sm:$0xff] }
  0x42   : > { %757 = vmatprep.subr.mxu0 %v1898_v1  ;;  %1815 = vmatprep.mubr.msk.f32.mxu1 %vm510_vm0, %v227_v59  ;;  %v265_v59 = vld [vmem:[%s2078_s18 + $0x1e8] sm:$0xff] }
  0x43   : > { %758 = vmatpush2.msra.mxu0 %v480_v56  ;;  %v287_v56 = vld [vmem:[%s2078_s18 + $0x298] sm:$0xff] }
  0x44   : > { %759 = vmatprep.subr.mxu0 %v1898_v1 }
  0x45   : > { %760 = vmatpush2.msra.mxu0 %v479_v58  ;;  %1178 = vmatmul.mubr.f32.gmra.mxu1 %v226_v61  ;;  %v286_v58 = vld [vmem:[%s2078_s18 + $0x290] sm:$0xff]  ;;  %v264_v61 = vld [vmem:[%s2078_s18 + $0x1e0] sm:$0xff] }
  0x46   : > { %761 = vmatprep.subr.mxu0 %v1898_v1  ;;  %1816 = vmatprep.mubr.msk.f32.mxu1 %vm510_vm0, %v231_v63  ;;  %v269_v63 = vld [vmem:[%s2078_s18 + $0x208] sm:$0xff] }
  0x47   : > { %762 = vmatpush2.msra.mxu0 %v478_v60  ;;  %v291_v60 = vld [vmem:[%s2078_s18 + $0x2b8] sm:$0xff] }
  0x48   : > { %763 = vmatprep.subr.mxu0 %v1898_v1 }
  0x49   : > { %764 = vmatpush2.msra.mxu0 %v477_v62  ;;  %1183 = vmatmul.mubr.f32.gmra.mxu1 %v230_v3  ;;  %v290_v62 = vld [vmem:[%s2078_s18 + $0x2b0] sm:$0xff] }
  0x4a   : > { %765 = vmatprep.subr.mxu0 %v1898_v1  ;;  %1817 = vmatprep.mubr.msk.f32.mxu1 %vm510_vm0, %v235_v5  ;;  %v212_v1 = vld [vmem:[%s2078_s18 + $0x40] sm:$0xff]  ;;  %v294_v3 = vld [vmem:[%s2078_s18 + $0x2d0] sm:$0xff]  ;;  %v299_v5 = vld [vmem:[%s2078_s18 + $0x2f8] sm:$0xff] }
  0x4b   : > { %766 = vmatpush2.msra.mxu0 %v476_v0  ;;  %v295_v0 = vld [vmem:[%s2078_s18 + $0x2d8] sm:$0xff] }
  0x4c   : > { %768 = vmatmul.mubr.f32.vlgmr.msra.gmra.mxu0 %v204_v2  ;;  %v268_v2 = vld [vmem:[%s2078_s18 + $0x200] sm:$0xff] }
  0x4d   : > { %772 = vmatprep.mubr.f32.mxu0 %v209_v4  ;;  %1188 = vmatmul.mubr.f32.gmra.mxu1 %v234_v7  ;;  %v273_v4 = vld [vmem:[%s2078_s18 + $0x228] sm:$0xff]  ;;  %v298_v7 = vld [vmem:[%s2078_s18 + $0x2f0] sm:$0xff] }
  0x4e   : > { %1818 = vmatprep.mubr.msk.f32.mxu1 %vm510_vm0, %v239_v9  ;;  %v303_v9 = vld [vmem:[%s2078_s18 + $0x318] sm:$0xff] }
  0x50   : > { %773 = vmatmul.mubr.f32.gmra.mxu0 %v208_v6  ;;  %v272_v6 = vld [vmem:[%s2078_s18 + $0x220] sm:$0xff] }
  0x51   : > { %777 = vmatprep.mubr.f32.mxu0 %v213_v8  ;;  %1193 = vmatmul.mubr.f32.gmra.mxu1 %v238_v10  ;;  %v277_v8 = vld [vmem:[%s2078_s18 + $0x248] sm:$0xff]  ;;  %v302_v10 = vld [vmem:[%s2078_s18 + $0x310] sm:$0xff] }
  0x52   : > { %1819 = vmatprep.mubr.msk.f32.mxu1 %vm510_vm0, %v243_v12  ;;  %v307_v12 = vld [vmem:[%s2078_s18 + $0x338] sm:$0xff] }
  0x54   : > { %778 = vmatmul.mubr.f32.gmra.mxu0 %v212_v1  ;;  %v276_v1 = vld [vmem:[%s2078_s18 + $0x240] sm:$0xff] }
  0x55   : > { %782 = vmatprep.mubr.f32.mxu0 %v217_v11  ;;  %1198 = vmatmul.mubr.f32.gmra.mxu1 %v242_v14  ;;  %v281_v11 = vld [vmem:[%s2078_s18 + $0x268] sm:$0xff]  ;;  %v306_v14 = vld [vmem:[%s2078_s18 + $0x330] sm:$0xff] }
  0x56   : > { %1820 = vmatprep.mubr.msk.f32.mxu1 %vm510_vm0, %v247_v16  ;;  %v311_v16 = vld [vmem:[%s2078_s18 + $0x358] sm:$0xff] }
  0x58   : > { %783 = vmatmul.mubr.f32.gmra.mxu0 %v216_v13  ;;  %v280_v13 = vld [vmem:[%s2078_s18 + $0x260] sm:$0xff] }
  0x59   : > { %787 = vmatprep.mubr.f32.mxu0 %v221_v15  ;;  %1203 = vmatmul.mubr.f32.gmra.mxu1 %v246_v18  ;;  %v285_v15 = vld [vmem:[%s2078_s18 + $0x288] sm:$0xff]  ;;  %v310_v18 = vld [vmem:[%s2078_s18 + $0x350] sm:$0xff] }
  0x5a   : > { %1821 = vmatprep.mubr.msk.f32.mxu1 %vm510_vm0, %v251_v20  ;;  %v315_v20 = vld [vmem:[%s2078_s18 + $0x378] sm:$0xff] }
  0x5c   : > { %788 = vmatmul.mubr.f32.gmra.mxu0 %v220_v17  ;;  %v284_v17 = vld [vmem:[%s2078_s18 + $0x280] sm:$0xff] }
  0x5d   : > { %792 = vmatprep.mubr.f32.mxu0 %v225_v19  ;;  %1208 = vmatmul.mubr.f32.gmra.mxu1 %v250_v22  ;;  %v289_v19 = vld [vmem:[%s2078_s18 + $0x2a8] sm:$0xff]  ;;  %v314_v22 = vld [vmem:[%s2078_s18 + $0x370] sm:$0xff] }
  0x5e   : > { %1822 = vmatprep.mubr.msk.f32.mxu1 %vm510_vm0, %v255_v24  ;;  %v319_v24 = vld [vmem:[%s2078_s18 + $0x398] sm:$0xff] }
  0x60   : > { %793 = vmatmul.mubr.f32.gmra.mxu0 %v224_v21  ;;  %v288_v21 = vld [vmem:[%s2078_s18 + $0x2a0] sm:$0xff] }
  0x61   : > { %797 = vmatprep.mubr.f32.mxu0 %v229_v23  ;;  %1213 = vmatmul.mubr.f32.gmra.mxu1 %v254_v26  ;;  %v293_v23 = vld [vmem:[%s2078_s18 + $0x2c8] sm:$0xff]  ;;  %v318_v26 = vld [vmem:[%s2078_s18 + $0x390] sm:$0xff] }
  0x62   : > { %1823 = vmatprep.mubr.msk.f32.mxu1 %vm510_vm0, %v259_v28  ;;  %v323_v28 = vld [vmem:[%s2078_s18 + $0x3b8] sm:$0xff] }
  0x64   : > { %798 = vmatmul.mubr.f32.gmra.mxu0 %v228_v25  ;;  %v292_v25 = vld [vmem:[%s2078_s18 + $0x2c0] sm:$0xff] }
  0x65   : > { %802 = vmatprep.mubr.f32.mxu0 %v233_v27  ;;  %1218 = vmatmul.mubr.f32.gmra.mxu1 %v258_v30  ;;  %v297_v27 = vld [vmem:[%s2078_s18 + $0x2e8] sm:$0xff]  ;;  %v322_v30 = vld [vmem:[%s2078_s18 + $0x3b0] sm:$0xff] }
  0x66   : > { %1824 = vmatprep.mubr.msk.f32.mxu1 %vm510_vm0, %v263_v32  ;;  %v327_v32 = vld [vmem:[%s2078_s18 + $0x3d8] sm:$0xff] }
  0x68   : > { %803 = vmatmul.mubr.f32.gmra.mxu0 %v232_v29  ;;  %v296_v29 = vld [vmem:[%s2078_s18 + $0x2e0] sm:$0xff] }
  0x69   : > { %807 = vmatprep.mubr.f32.mxu0 %v237_v31  ;;  %1223 = vmatmul.mubr.f32.gmra.mxu1 %v262_v34  ;;  %v301_v31 = vld [vmem:[%s2078_s18 + $0x308] sm:$0xff]  ;;  %v326_v34 = vld [vmem:[%s2078_s18 + $0x3d0] sm:$0xff] }
  0x6a   : > { %1825 = vmatprep.mubr.msk.f32.mxu1 %vm510_vm0, %v267_v36  ;;  %v331_v36 = vld [vmem:[%s2078_s18 + $0x3f8] sm:$0xff] }
  0x6c   : > { %808 = vmatmul.mubr.f32.gmra.mxu0 %v236_v33  ;;  %v300_v33 = vld [vmem:[%s2078_s18 + $0x300] sm:$0xff] }
  0x6d   : > { %812 = vmatprep.mubr.f32.mxu0 %v241_v35  ;;  %1228 = vmatmul.mubr.f32.gmra.mxu1 %v266_v38  ;;  %v305_v35 = vld [vmem:[%s2078_s18 + $0x328] sm:$0xff]  ;;  %v330_v38 = vld [vmem:[%s2078_s18 + $0x3f0] sm:$0xff] }
  0x6e   : > { %1826 = vmatprep.mubr.msk.f32.mxu1 %vm510_vm0, %v271_v40  ;;  %v335_v40 = vld [vmem:[%s2078_s18 + $0x418] sm:$0xff] }
  0x70   : > { %813 = vmatmul.mubr.f32.gmra.mxu0 %v240_v37  ;;  %v304_v37 = vld [vmem:[%s2078_s18 + $0x320] sm:$0xff] }
  0x71   : > { %817 = vmatprep.mubr.f32.mxu0 %v245_v39  ;;  %1233 = vmatmul.mubr.f32.gmra.mxu1 %v270_v42  ;;  %v309_v39 = vld [vmem:[%s2078_s18 + $0x348] sm:$0xff]  ;;  %v334_v42 = vld [vmem:[%s2078_s18 + $0x410] sm:$0xff] }
  0x72   : > { %1827 = vmatprep.mubr.msk.f32.mxu1 %vm510_vm0, %v275_v44  ;;  %v339_v44 = vld [vmem:[%s2078_s18 + $0x438] sm:$0xff] }
  0x74   : > { %818 = vmatmul.mubr.f32.gmra.mxu0 %v244_v41  ;;  %v308_v41 = vld [vmem:[%s2078_s18 + $0x340] sm:$0xff] }
  0x75   : > { %822 = vmatprep.mubr.f32.mxu0 %v249_v43  ;;  %1238 = vmatmul.mubr.f32.gmra.mxu1 %v274_v46  ;;  %v313_v43 = vld [vmem:[%s2078_s18 + $0x368] sm:$0xff]  ;;  %v338_v46 = vld [vmem:[%s2078_s18 + $0x430] sm:$0xff] }
  0x76   : > { %1828 = vmatprep.mubr.msk.f32.mxu1 %vm510_vm0, %v279_v48  ;;  %v343_v48 = vld [vmem:[%s2078_s18 + $0x458] sm:$0xff] }
  0x78   : > { %823 = vmatmul.mubr.f32.gmra.mxu0 %v248_v45  ;;  %v312_v45 = vld [vmem:[%s2078_s18 + $0x360] sm:$0xff] }
  0x79   : > { %827 = vmatprep.mubr.f32.mxu0 %v253_v47  ;;  %1243 = vmatmul.mubr.f32.gmra.mxu1 %v278_v50  ;;  %v317_v47 = vld [vmem:[%s2078_s18 + $0x388] sm:$0xff]  ;;  %v342_v50 = vld [vmem:[%s2078_s18 + $0x450] sm:$0xff] }
  0x7a   : > { %1829 = vmatprep.mubr.msk.f32.mxu1 %vm510_vm0, %v283_v52  ;;  %v347_v52 = vld [vmem:[%s2078_s18 + $0x478] sm:$0xff] }
  0x7c   : > { %828 = vmatmul.mubr.f32.gmra.mxu0 %v252_v49  ;;  %v316_v49 = vld [vmem:[%s2078_s18 + $0x380] sm:$0xff] }
  0x7d   : > { %832 = vmatprep.mubr.f32.mxu0 %v257_v51  ;;  %1248 = vmatmul.mubr.f32.gmra.mxu1 %v282_v54  ;;  %v321_v51 = vld [vmem:[%s2078_s18 + $0x3a8] sm:$0xff]  ;;  %v346_v54 = vld [vmem:[%s2078_s18 + $0x470] sm:$0xff] }
  0x7e   : > { %1830 = vmatprep.mubr.msk.f32.mxu1 %vm510_vm0, %v287_v56  ;;  %v351_v56 = vld [vmem:[%s2078_s18 + $0x498] sm:$0xff] }
  0x80   : > { %833 = vmatmul.mubr.f32.gmra.mxu0 %v256_v53  ;;  %v320_v53 = vld [vmem:[%s2078_s18 + $0x3a0] sm:$0xff] }
  0x81   : > { %837 = vmatprep.mubr.f32.mxu0 %v261_v55  ;;  %1253 = vmatmul.mubr.f32.gmra.mxu1 %v286_v58  ;;  %v325_v55 = vld [vmem:[%s2078_s18 + $0x3c8] sm:$0xff]  ;;  %v350_v58 = vld [vmem:[%s2078_s18 + $0x490] sm:$0xff] }
  0x82   : > { %1831 = vmatprep.mubr.msk.f32.mxu1 %vm510_vm0, %v291_v60  ;;  %v355_v60 = vld [vmem:[%s2078_s18 + $0x4b8] sm:$0xff] }
  0x84   : > { %838 = vmatmul.mubr.f32.gmra.mxu0 %v260_v57  ;;  %v324_v57 = vld [vmem:[%s2078_s18 + $0x3c0] sm:$0xff] }
  0x85   : > { %842 = vmatprep.mubr.f32.mxu0 %v265_v59  ;;  %1258 = vmatmul.mubr.f32.gmra.mxu1 %v290_v62  ;;  %v329_v59 = vld [vmem:[%s2078_s18 + $0x3e8] sm:$0xff]  ;;  %v354_v62 = vld [vmem:[%s2078_s18 + $0x4b0] sm:$0xff] }
  0x86   : > { %1832 = vmatprep.mubr.msk.f32.mxu1 %vm510_vm0, %v295_v0  ;;  %v359_v0 = vld [vmem:[%s2078_s18 + $0x4d8] sm:$0xff] }
  0x88   : > { %843 = vmatmul.mubr.f32.gmra.mxu0 %v264_v61  ;;  %v328_v61 = vld [vmem:[%s2078_s18 + $0x3e0] sm:$0xff] }
  0x89   : > { %847 = vmatprep.mubr.f32.mxu0 %v269_v63  ;;  %1263 = vmatmul.mubr.f32.gmra.mxu1 %v294_v3  ;;  %v333_v63 = vld [vmem:[%s2078_s18 + $0x408] sm:$0xff]  ;;  %v358_v3 = vld [vmem:[%s2078_s18 + $0x4d0] sm:$0xff] }
  0x8a   : > { %1833 = vmatprep.mubr.msk.f32.mxu1 %vm510_vm0, %v299_v5  ;;  %v363_v5 = vld [vmem:[%s2078_s18 + $0x4f8] sm:$0xff] }
  0x8c   : > { %848 = vmatmul.mubr.f32.gmra.mxu0 %v268_v2  ;;  %v332_v2 = vld [vmem:[%s2078_s18 + $0x400] sm:$0xff] }
  0x8d   : > { %852 = vmatprep.mubr.f32.mxu0 %v273_v4  ;;  %1268 = vmatmul.mubr.f32.gmra.mxu1 %v298_v7  ;;  %v337_v4 = vld [vmem:[%s2078_s18 + $0x428] sm:$0xff]  ;;  %v362_v7 = vld [vmem:[%s2078_s18 + $0x4f0] sm:$0xff] }
  0x8e   : > { %1834 = vmatprep.mubr.msk.f32.mxu1 %vm510_vm0, %v303_v9  ;;  %v367_v9 = vld [vmem:[%s2078_s18 + $0x518] sm:$0xff] }
  0x90   : > { %853 = vmatmul.mubr.f32.gmra.mxu0 %v272_v6  ;;  %v336_v6 = vld [vmem:[%s2078_s18 + $0x420] sm:$0xff] }
  0x91   : > { %857 = vmatprep.mubr.f32.mxu0 %v277_v8  ;;  %1273 = vmatmul.mubr.f32.gmra.mxu1 %v302_v10  ;;  %v341_v8 = vld [vmem:[%s2078_s18 + $0x448] sm:$0xff]  ;;  %v366_v10 = vld [vmem:[%s2078_s18 + $0x510] sm:$0xff] }
  0x92   : > { %1835 = vmatprep.mubr.msk.f32.mxu1 %vm510_vm0, %v307_v12  ;;  %v371_v12 = vld [vmem:[%s2078_s18 + $0x538] sm:$0xff] }
  0x94   : > { %858 = vmatmul.mubr.f32.gmra.mxu0 %v276_v1  ;;  %v340_v1 = vld [vmem:[%s2078_s18 + $0x440] sm:$0xff] }
  0x95   : > { %862 = vmatprep.mubr.f32.mxu0 %v281_v11  ;;  %1278 = vmatmul.mubr.f32.gmra.mxu1 %v306_v14  ;;  %v345_v11 = vld [vmem:[%s2078_s18 + $0x468] sm:$0xff]  ;;  %v370_v14 = vld [vmem:[%s2078_s18 + $0x530] sm:$0xff] }
  0x96   : > { %1836 = vmatprep.mubr.msk.f32.mxu1 %vm510_vm0, %v311_v16  ;;  %v375_v16 = vld [vmem:[%s2078_s18 + $0x558] sm:$0xff] }
  0x98   : > { %863 = vmatmul.mubr.f32.gmra.mxu0 %v280_v13  ;;  %v344_v13 = vld [vmem:[%s2078_s18 + $0x460] sm:$0xff] }
  0x99   : > { %867 = vmatprep.mubr.f32.mxu0 %v285_v15  ;;  %1283 = vmatmul.mubr.f32.gmra.mxu1 %v310_v18  ;;  %v349_v15 = vld [vmem:[%s2078_s18 + $0x488] sm:$0xff]  ;;  %v374_v18 = vld [vmem:[%s2078_s18 + $0x550] sm:$0xff] }
  0x9a   : > { %1837 = vmatprep.mubr.msk.f32.mxu1 %vm510_vm0, %v315_v20  ;;  %v379_v20 = vld [vmem:[%s2078_s18 + $0x578] sm:$0xff] }
  0x9c   : > { %868 = vmatmul.mubr.f32.gmra.mxu0 %v284_v17  ;;  %v348_v17 = vld [vmem:[%s2078_s18 + $0x480] sm:$0xff] }
  0x9d   : > { %872 = vmatprep.mubr.f32.mxu0 %v289_v19  ;;  %1288 = vmatmul.mubr.f32.gmra.mxu1 %v314_v22  ;;  %v353_v19 = vld [vmem:[%s2078_s18 + $0x4a8] sm:$0xff]  ;;  %v378_v22 = vld [vmem:[%s2078_s18 + $0x570] sm:$0xff] }
  0x9e   : > { %1838 = vmatprep.mubr.msk.f32.mxu1 %vm510_vm0, %v319_v24  ;;  %v383_v24 = vld [vmem:[%s2078_s18 + $0x598] sm:$0xff] }
  0xa0   : > { %873 = vmatmul.mubr.f32.gmra.mxu0 %v288_v21  ;;  %v352_v21 = vld [vmem:[%s2078_s18 + $0x4a0] sm:$0xff] }
  0xa1   : > { %877 = vmatprep.mubr.f32.mxu0 %v293_v23  ;;  %1293 = vmatmul.mubr.f32.gmra.mxu1 %v318_v26  ;;  %v357_v23 = vld [vmem:[%s2078_s18 + $0x4c8] sm:$0xff]  ;;  %v382_v26 = vld [vmem:[%s2078_s18 + $0x590] sm:$0xff] }
  0xa2   : > { %1839 = vmatprep.mubr.msk.f32.mxu1 %vm510_vm0, %v323_v28  ;;  %v387_v28 = vld [vmem:[%s2078_s18 + $0x5b8] sm:$0xff] }
  0xa4   : > { %878 = vmatmul.mubr.f32.gmra.mxu0 %v292_v25  ;;  %v356_v25 = vld [vmem:[%s2078_s18 + $0x4c0] sm:$0xff] }
  0xa5   : > { %882 = vmatprep.mubr.f32.mxu0 %v297_v27  ;;  %1298 = vmatmul.mubr.f32.gmra.mxu1 %v322_v30  ;;  %v361_v27 = vld [vmem:[%s2078_s18 + $0x4e8] sm:$0xff]  ;;  %v386_v30 = vld [vmem:[%s2078_s18 + $0x5b0] sm:$0xff] }
  0xa6   : > { %1840 = vmatprep.mubr.msk.f32.mxu1 %vm510_vm0, %v327_v32  ;;  %v391_v32 = vld [vmem:[%s2078_s18 + $0x5d8] sm:$0xff] }
  0xa8   : > { %883 = vmatmul.mubr.f32.gmra.mxu0 %v296_v29  ;;  %v360_v29 = vld [vmem:[%s2078_s18 + $0x4e0] sm:$0xff] }
  0xa9   : > { %887 = vmatprep.mubr.f32.mxu0 %v301_v31  ;;  %1303 = vmatmul.mubr.f32.gmra.mxu1 %v326_v34  ;;  %v365_v31 = vld [vmem:[%s2078_s18 + $0x508] sm:$0xff]  ;;  %v390_v34 = vld [vmem:[%s2078_s18 + $0x5d0] sm:$0xff] }
  0xaa   : > { %1841 = vmatprep.mubr.msk.f32.mxu1 %vm510_vm0, %v331_v36  ;;  %v395_v36 = vld [vmem:[%s2078_s18 + $0x5f8] sm:$0xff] }
  0xac   : > { %888 = vmatmul.mubr.f32.gmra.mxu0 %v300_v33  ;;  %v364_v33 = vld [vmem:[%s2078_s18 + $0x500] sm:$0xff] }
  0xad   : > { %892 = vmatprep.mubr.f32.mxu0 %v305_v35  ;;  %1308 = vmatmul.mubr.f32.gmra.mxu1 %v330_v38  ;;  %v369_v35 = vld [vmem:[%s2078_s18 + $0x528] sm:$0xff]  ;;  %v394_v38 = vld [vmem:[%s2078_s18 + $0x5f0] sm:$0xff] }
  0xae   : > { %1842 = vmatprep.mubr.msk.f32.mxu1 %vm510_vm0, %v335_v40  ;;  %v399_v40 = vld [vmem:[%s2078_s18 + $0x618] sm:$0xff] }
  0xb0   : > { %893 = vmatmul.mubr.f32.gmra.mxu0 %v304_v37  ;;  %v368_v37 = vld [vmem:[%s2078_s18 + $0x520] sm:$0xff] }
  0xb1   : > { %897 = vmatprep.mubr.f32.mxu0 %v309_v39  ;;  %1313 = vmatmul.mubr.f32.gmra.mxu1 %v334_v42  ;;  %v373_v39 = vld [vmem:[%s2078_s18 + $0x548] sm:$0xff]  ;;  %v398_v42 = vld [vmem:[%s2078_s18 + $0x610] sm:$0xff] }
  0xb2   : > { %1843 = vmatprep.mubr.msk.f32.mxu1 %vm510_vm0, %v339_v44  ;;  %v403_v44 = vld [vmem:[%s2078_s18 + $0x638] sm:$0xff] }
  0xb4   : > { %898 = vmatmul.mubr.f32.gmra.mxu0 %v308_v41  ;;  %v372_v41 = vld [vmem:[%s2078_s18 + $0x540] sm:$0xff] }
  0xb5   : > { %902 = vmatprep.mubr.f32.mxu0 %v313_v43  ;;  %1318 = vmatmul.mubr.f32.gmra.mxu1 %v338_v46  ;;  %v377_v43 = vld [vmem:[%s2078_s18 + $0x568] sm:$0xff]  ;;  %v376_v46 = vld [vmem:[%s2078_s18 + $0x560] sm:$0xff] }
  0xb6   : > { %1844 = vmatprep.mubr.msk.f32.mxu1 %vm510_vm0, %v343_v48  ;;  %v381_v48 = vld [vmem:[%s2078_s18 + $0x588] sm:$0xff] }
  0xb8   : > { %903 = vmatmul.mubr.f32.gmra.mxu0 %v312_v45 }
  0xb9   : > { %907 = vmatprep.mubr.f32.mxu0 %v317_v47  ;;  %1323 = vmatmul.mubr.f32.gmra.mxu1 %v342_v50  ;;  %v402_v47 = vld [vmem:[%s2078_s18 + $0x630] sm:$0xff]  ;;  %v407_v50 = vld [vmem:[%s2078_s18 + $0x658] sm:$0xff] }
  0xba   : > { %1845 = vmatprep.mubr.msk.f32.mxu1 %vm510_vm0, %v347_v52  ;;  %v380_v52 = vld [vmem:[%s2078_s18 + $0x580] sm:$0xff] }
  0xbc   : > { %908 = vmatmul.mubr.f32.gmra.mxu0 %v316_v49 }
  0xbd   : > { %912 = vmatprep.mubr.f32.mxu0 %v321_v51  ;;  %1328 = vmatmul.mubr.f32.gmra.mxu1 %v346_v54  ;;  %v385_v54 = vld [vmem:[%s2078_s18 + $0x5a8] sm:$0xff] }
  0xbe   : > { %1846 = vmatprep.mubr.msk.f32.mxu1 %vm510_vm0, %v351_v56  ;;  %v411_v56 = vld [vmem:[%s2078_s18 + $0x678] sm:$0xff] }
  0xc0   : > { %913 = vmatmul.mubr.f32.gmra.mxu0 %v320_v53  ;;  %v406_v53 = vld [vmem:[%s2078_s18 + $0x650] sm:$0xff] }
  0xc1   : > { %917 = vmatprep.mubr.f32.mxu0 %v325_v55  ;;  %1333 = vmatmul.mubr.f32.gmra.mxu1 %v350_v58  ;;  %v384_v58 = vld [vmem:[%s2078_s18 + $0x5a0] sm:$0xff] }
  0xc2   : > { %1847 = vmatprep.mubr.msk.f32.mxu1 %vm510_vm0, %v355_v60  ;;  %v389_v60 = vld [vmem:[%s2078_s18 + $0x5c8] sm:$0xff] }
  0xc4   : > { %918 = vmatmul.mubr.f32.gmra.mxu0 %v324_v57 }
  0xc5   : > { %922 = vmatprep.mubr.f32.mxu0 %v329_v59  ;;  %1338 = vmatmul.mubr.f32.gmra.mxu1 %v354_v62  ;;  %v410_v59 = vld [vmem:[%s2078_s18 + $0x670] sm:$0xff]  ;;  %v415_v62 = vld [vmem:[%s2078_s18 + $0x698] sm:$0xff] }
  0xc6   : > { %1848 = vmatprep.mubr.msk.f32.mxu1 %vm510_vm0, %v359_v0  ;;  %v388_v0 = vld [vmem:[%s2078_s18 + $0x5c0] sm:$0xff] }
  0xc8   : > { %923 = vmatmul.mubr.f32.gmra.mxu0 %v328_v61 }
  0xc9   : > { %927 = vmatprep.mubr.f32.mxu0 %v333_v63  ;;  %1343 = vmatmul.mubr.f32.gmra.mxu1 %v358_v3  ;;  %v393_v3 = vld [vmem:[%s2078_s18 + $0x5e8] sm:$0xff] }
  0xca   : > { %1849 = vmatprep.mubr.msk.f32.mxu1 %vm510_vm0, %v363_v5  ;;  %v419_v5 = vld [vmem:[%s2078_s18 + $0x6b8] sm:$0xff] }
  0xcc   : > { %928 = vmatmul.mubr.f32.gmra.mxu0 %v332_v2  ;;  %v414_v2 = vld [vmem:[%s2078_s18 + $0x690] sm:$0xff] }
  0xcd   : > { %932 = vmatprep.mubr.f32.mxu0 %v337_v4  ;;  %1348 = vmatmul.mubr.f32.gmra.mxu1 %v362_v7  ;;  %v392_v7 = vld [vmem:[%s2078_s18 + $0x5e0] sm:$0xff] }
  0xce   : > { %1850 = vmatprep.mubr.msk.f32.mxu1 %vm510_vm0, %v367_v9  ;;  %v397_v9 = vld [vmem:[%s2078_s18 + $0x608] sm:$0xff] }
  0xd0   : > { %933 = vmatmul.mubr.f32.gmra.mxu0 %v336_v6 }
  0xd1   : > { %937 = vmatprep.mubr.f32.mxu0 %v341_v8  ;;  %1353 = vmatmul.mubr.f32.gmra.mxu1 %v366_v10  ;;  %v418_v8 = vld [vmem:[%s2078_s18 + $0x6b0] sm:$0xff]  ;;  %v423_v10 = vld [vmem:[%s2078_s18 + $0x6d8] sm:$0xff] }
  0xd2   : > { %1851 = vmatprep.mubr.msk.f32.mxu1 %vm510_vm0, %v371_v12  ;;  %v396_v12 = vld [vmem:[%s2078_s18 + $0x600] sm:$0xff] }
  0xd4   : > { %938 = vmatmul.mubr.f32.gmra.mxu0 %v340_v1 }
  0xd5   : > { %942 = vmatprep.mubr.f32.mxu0 %v345_v11  ;;  %1358 = vmatmul.mubr.f32.gmra.mxu1 %v370_v14  ;;  %v401_v14 = vld [vmem:[%s2078_s18 + $0x628] sm:$0xff] }
  0xd6   : > { %1852 = vmatprep.mubr.msk.f32.mxu1 %vm510_vm0, %v375_v16  ;;  %v427_v16 = vld [vmem:[%s2078_s18 + $0x6f8] sm:$0xff] }
  0xd8   : > { %943 = vmatmul.mubr.f32.gmra.mxu0 %v344_v13  ;;  %v422_v13 = vld [vmem:[%s2078_s18 + $0x6d0] sm:$0xff] }
  0xd9   : > { %947 = vmatprep.mubr.f32.mxu0 %v349_v15  ;;  %1363 = vmatmul.mubr.f32.gmra.mxu1 %v374_v18  ;;  %v2422_v18 = vld [vmem:[%s2809_s2] ss:$0 sm:$0xff] }
  0xda   : > { %1853 = vmatprep.mubr.msk.f32.mxu1 %vm510_vm0, %v379_v20 }
  0xdc   : > { %948 = vmatmul.mubr.f32.gmra.mxu0 %v348_v17 }
  0xdd   : > { %952 = vmatprep.mubr.f32.mxu0 %v353_v19  ;;  %1368 = vmatmul.mubr.f32.gmra.mxu1 %v378_v22  ;;  %v426_v22 = vld [vmem:[%s2078_s18 + $0x6f0] sm:$0xff] }
  0xde   : > { %1854 = vmatprep.mubr.msk.f32.mxu1 %vm510_vm0, %v383_v24 }
  0xe0   : > { %953 = vmatmul.mubr.f32.gmra.mxu0 %v352_v21  ;;  %v400_v21 = vld [vmem:[%s2078_s18 + $0x620] sm:$0xff] }
  0xe1   : > { %957 = vmatprep.mubr.f32.mxu0 %v357_v23  ;;  %1373 = vmatmul.mubr.f32.gmra.mxu1 %v382_v26  ;;  %v2433_v23 = vld [vmem:[%s2810_s3] ss:$0 sm:$0xff] }
  0xe2   : > { %1855 = vmatprep.mubr.msk.f32.mxu1 %vm510_vm0, %v387_v28 }
  0xe4   : > { %958 = vmatmul.mubr.f32.gmra.mxu0 %v356_v25  ;;  %v405_v25 = vld [vmem:[%s2078_s18 + $0x648] sm:$0xff] }
  0xe5   : > { %962 = vmatprep.mubr.f32.mxu0 %v361_v27  ;;  %1378 = vmatmul.mubr.f32.gmra.mxu1 %v386_v30  ;;  %v431_v27 = vld [vmem:[%s2078_s18 + $0x718] sm:$0xff] }
  0xe6   : > { %1856 = vmatprep.mubr.msk.f32.mxu1 %vm510_vm0, %v391_v32 }
  0xe8   : > { %963 = vmatmul.mubr.f32.gmra.mxu0 %v360_v29 }
  0xe9   : > { %967 = vmatprep.mubr.f32.mxu0 %v365_v31  ;;  %1383 = vmatmul.mubr.f32.gmra.mxu1 %v390_v34  ;;  %v430_v34 = vld [vmem:[%s2078_s18 + $0x710] sm:$0xff] }
  0xea   : > { %1857 = vmatprep.mubr.msk.f32.mxu1 %vm510_vm0, %v395_v36  ;;  %v409_v36 = vld [vmem:[%s2078_s18 + $0x668] sm:$0xff] }
  0xec   : > { %968 = vmatmul.mubr.f32.gmra.mxu0 %v364_v33  ;;  %v404_v33 = vld [vmem:[%s2078_s18 + $0x640] sm:$0xff] }
  0xed   : > { %972 = vmatprep.mubr.f32.mxu0 %v369_v35  ;;  %1388 = vmatmul.mubr.f32.gmra.mxu1 %v394_v38  ;;  %v435_v38 = vld [vmem:[%s2078_s18 + $0x738] sm:$0xff] }
  0xee   : > { %1858 = vmatprep.mubr.msk.f32.mxu1 %vm510_vm0, %v399_v40 }
  0xf0   : > { %973 = vmatmul.mubr.f32.gmra.mxu0 %v368_v37 }
  0xf1   : > { %977 = vmatprep.mubr.f32.mxu0 %v373_v39  ;;  %v2377_v45 = vpop.f32.mrf.mxu1  ;;  %1393 = vmatmul.mubr.f32.gmra.mxu1 %v398_v42 }
  0xf2   : > { %1859 = vmatprep.mubr.msk.f32.mxu1 %vm510_vm0, %v403_v44 }
  0xf3   : > { %v1156_v49 = vpop.f32.mrf.mxu1 }
  0xf4   : > { %978 = vmatmul.mubr.f32.gmra.mxu0 %v372_v41 }
  0xf5   : > { %982 = vmatprep.mubr.f32.mxu0 %v377_v43  ;;  %v2384_v51 = vpop.f32.mrf.mxu1  ;;  %1398 = vmatmul.mubr.f32.gmra.mxu1 %v402_v47 }
  0xf6   : > { %1860 = vmatprep.mubr.msk.f32.mxu1 %vm510_vm0, %v407_v50  ;;  %v439_v50 = vld [vmem:[%s2078_s18 + $0x758] sm:$0xff] }
  0xf7   : > { %v1161_v55 = vpop.f32.mrf.mxu1 }
  0xf8   : > { %983 = vmatmul.mubr.f32.gmra.mxu0 %v376_v46  ;;  %v434_v46 = vld [vmem:[%s2078_s18 + $0x730] sm:$0xff] }
  0xf9   : > { %987 = vmatprep.mubr.f32.mxu0 %v381_v48  ;;  %v2391_v57 = vpop.f32.mrf.mxu1  ;;  %1403 = vmatmul.mubr.f32.gmra.mxu1 %v406_v53  ;;  %v413_v48 = vld [vmem:[%s2078_s18 + $0x688] sm:$0xff] }
  0xfa   : > { %1861 = vmatprep.mubr.msk.f32.mxu1 %vm510_vm0, %v411_v56 }
  0xfb   : > { %v1166_v61 = vpop.f32.mrf.mxu1 }
  0xfc   : > { %988 = vmatmul.mubr.f32.gmra.mxu0 %v380_v52 }
  0xfd   : > { %992 = vmatprep.mubr.f32.mxu0 %v385_v54  ;;  %v2398_v63 = vpop.f32.mrf.mxu1  ;;  %1408 = vmatmul.mubr.f32.gmra.mxu1 %v410_v59 }
  0xfe   : > { %1862 = vmatprep.mubr.msk.f32.mxu1 %vm510_vm0, %v415_v62  ;;  %v443_v62 = vld [vmem:[%s2078_s18 + $0x778] sm:$0xff] }
  0xff   : > { %v1171_v4 = vpop.f32.mrf.mxu1 }
 0x100   : > { %993 = vmatmul.mubr.f32.gmra.mxu0 %v384_v58  ;;  %v438_v58 = vld [vmem:[%s2078_s18 + $0x750] sm:$0xff] }
 0x101   : > { %997 = vmatprep.mubr.f32.mxu0 %v389_v60  ;;  %v2405_v6 = vpop.f32.mrf.mxu1  ;;  %1413 = vmatmul.mubr.f32.gmra.mxu1 %v414_v2  ;;  %v417_v60 = vld [vmem:[%s2078_s18 + $0x6a8] sm:$0xff] }
 0x102   : > { %1863 = vmatprep.mubr.msk.f32.mxu1 %vm510_vm0, %v419_v5 }
 0x103   : > { %v1176_v1 = vpop.f32.mrf.mxu1 }
 0x104   : > { %998 = vmatmul.mubr.f32.gmra.mxu0 %v388_v0  ;;  %v421_v1 = vld [vmem:[%s2078_s18 + $0x6c8] sm:$0xff] }
 0x105   : > { %1002 = vmatprep.mubr.f32.mxu0 %v393_v3  ;;  %v2412_v11 = vpop.f32.mrf.mxu1  ;;  %1418 = vmatmul.mubr.f32.gmra.mxu1 %v418_v8  ;;  %v442_v8 = vld [vmem:[%s2078_s18 + $0x770] sm:$0xff] }
 0x106   : > { %1864 = vmatprep.mubr.msk.f32.mxu1 %vm510_vm0, %v423_v10 }
 0x107   : > { %v1181_v15 = vpop.f32.mrf.mxu1 }
 0x108   : > { %1003 = vmatmul.mubr.f32.gmra.mxu0 %v392_v7  ;;  %v416_v7 = vld [vmem:[%s2078_s18 + $0x6a0] sm:$0xff] }
 0x109   : > { %1007 = vmatprep.mubr.f32.mxu0 %v397_v9  ;;  %v2424_v19 = vpop.f32.mrf.mxu1  ;;  %1423 = vmatmul.mubr.f32.gmra.mxu1 %v422_v13 }
 0x10a   : > { %1865 = vmatprep.mubr.msk.f32.mxu1 %vm510_vm0, %v427_v16 }
 0x10b   : > { %v1186_v26 = vpop.f32.mrf.mxu1 }
 0x10c   : > { %v769_v17 = vpop.f32.mrf.mxu0  ;;  %1008 = vmatmul.mubr.f32.gmra.mxu0 %v396_v12  ;;  %v447_v12 = vld [vmem:[%s2078_s18 + $0x798] sm:$0xff] }
 0x10d   : > { %v1155_v20 = vadd.f32 %v2377_v45, %v769_v17  ;;  %1012 = vmatprep.mubr.f32.mxu0 %v401_v14  ;;  %v2439_v30 = vpop.f32.mrf.mxu1  ;;  %1428 = vmatmul.mubr.f32.gmra.mxu1 %v426_v22  ;;  %v408_v45 = vld [vmem:[%s2078_s18 + $0x660] sm:$0xff]  ;;  %v451_v26 = vld [vmem:[%s2078_s18 + $0x7b8] sm:$0xff] }
 0x10e   : > { %v771_v24 = vpop.f32.mrf.mxu0  ;;  %1866 = vmatprep.mubr.msk.f32.mxu1 %vm510_vm0, %v431_v27 }
 0x10f   : > { %v1480_v28 = vmul.f32 %v2422_v18, %v1155_v20  ;;  %v1191_v37 = vpop.f32.mrf.mxu1  ;;  %v420_v20 = vld [vmem:[%s2078_s18 + $0x6c0] sm:$0xff]  ;;  %v425_v24 = vld [vmem:[%s2078_s18 + $0x6e8] sm:$0xff] }
 0x110   : > { %v774_v29 = vpop.f32.mrf.mxu0  ;;  %1013 = vmatmul.mubr.f32.gmra.mxu0 %v400_v21  ;;  %v446_v21 = vld [vmem:[%s2078_s18 + $0x790] sm:$0xff] }
 0x111   : > { %v1551_v31 = vadd.f32 %v2433_v23, %v1480_v28  ;;  %v1160_v32 = vadd.f32 %v2384_v51, %v774_v29  ;;  %1017 = vmatprep.mubr.f32.mxu0 %v405_v25  ;;  %v2454_v42 = vpop.f32.mrf.mxu1  ;;  %1433 = vmatmul.mubr.f32.gmra.mxu1 %v430_v34  ;;  %v450_v34 = vld [vmem:[%s2078_s18 + $0x7b0] sm:$0xff] }
 0x112   : > { %v776_v35 = vpop.f32.mrf.mxu0  ;;  %1867 = vmatprep.mubr.msk.f32.mxu1 %vm510_vm0, %v435_v38  ;;  %v455_v38 = vld [vmem:[%s2078_s18 + $0x7d8] sm:$0xff] }
 0x113   : > { %v1615_v39 = vmax.f32 %v1551_v31, 0.0  ;;  %v1481_v40 = vmul.f32 %v2422_v18, %v1160_v32  ;;  %v1196_v49 = vpop.f32.mrf.mxu1 }
 0x114   : > { %v779_v41 = vpop.f32.mrf.mxu0  ;;  %1018 = vmatmul.mubr.f32.gmra.mxu0 %v404_v33  ;;  %v424_v33 = vld [vmem:[%s2078_s18 + $0x6e0] sm:$0xff] }
 0x115   : > { %1680 = vst.msk [vmem:[%s2449_s9] sm:$0xff] %vm1679_vm1, %v1615_v39  ;;  %v1552_v43 = vadd.f32 %v2433_v23, %v1481_v40  ;;  %v1165_v44 = vadd.f32 %v2391_v57, %v779_v41  ;;  %1022 = vmatprep.mubr.f32.mxu0 %v409_v36  ;;  %v2466_v54 = vpop.f32.mrf.mxu1  ;;  %1438 = vmatmul.mubr.f32.gmra.mxu1 %v434_v46  ;;  %v412_v57 = vld [vmem:[%s2078_s18 + $0x680] sm:$0xff]  ;;  %v429_v36 = vld [vmem:[%s2078_s18 + $0x708] sm:$0xff]  ;;  %v454_v46 = vld [vmem:[%s2078_s18 + $0x7d0] sm:$0xff] }
 0x116   : > { %v781_v47 = vpop.f32.mrf.mxu0  ;;  %1868 = vmatprep.mubr.msk.f32.mxu1 %vm510_vm0, %v439_v50  ;;  %v459_v50 = vld [vmem:[%s2078_s18 + $0x7f8] sm:$0xff] }
 0x117   : > { %v1616_v51 = vmax.f32 %v1552_v43, 0.0  ;;  %v1482_v52 = vmul.f32 %v2422_v18, %v1165_v44  ;;  %v1201_v61 = vpop.f32.mrf.mxu1 }
 0x118   : > { %v784_v53 = vpop.f32.mrf.mxu0  ;;  %1023 = vmatmul.mubr.f32.gmra.mxu0 %v408_v45  ;;  %v428_v45 = vld [vmem:[%s2078_s18 + $0x700] sm:$0xff] }
 0x119   : > { %1681 = vst.msk [vmem:[%s2449_s9 + $0x8] sm:$0xff] %vm1679_vm1, %v1616_v51  ;;  %v1553_v55 = vadd.f32 %v2433_v23, %v1482_v52  ;;  %v1170_v56 = vadd.f32 %v2398_v63, %v784_v53  ;;  %1027 = vmatprep.mubr.f32.mxu0 %v413_v48  ;;  %v2478_v4 = vpop.f32.mrf.mxu1  ;;  %1443 = vmatmul.mubr.f32.gmra.mxu1 %v438_v58  ;;  %v433_v48 = vld [vmem:[%s2078_s18 + $0x728] sm:$0xff]  ;;  %v458_v58 = vld [vmem:[%s2078_s18 + $0x7f0] sm:$0xff] }
 0x11a   : > { %v786_v59 = vpop.f32.mrf.mxu0  ;;  %1869 = vmatprep.mubr.msk.f32.mxu1 %vm510_vm0, %v443_v62 }
 0x11b   : > { %v1617_v0 = vmax.f32 %v1553_v55, 0.0  ;;  %v1483_v2 = vmul.f32 %v2422_v18, %v1170_v56  ;;  %v1206_v10 = vpop.f32.mrf.mxu1 }
 0x11c   : > { %v789_v3 = vpop.f32.mrf.mxu0  ;;  %1028 = vmatmul.mubr.f32.gmra.mxu0 %v412_v57  ;;  %v432_v57 = vld [vmem:[%s2078_s18 + $0x720] sm:$0xff] }
 0x11d   : > { %1682 = vst.msk [vmem:[%s2449_s9 + $0x10] sm:$0xff] %vm1679_vm1, %v1617_v0  ;;  %v1554_v63 = vadd.f32 %v2433_v23, %v1483_v2  ;;  %v1175_v5 = vadd.f32 %v2405_v6, %v789_v3  ;;  %1032 = vmatprep.mubr.f32.mxu0 %v417_v60  ;;  %v2490_v16 = vpop.f32.mrf.mxu1  ;;  %1448 = vmatmul.mubr.f32.gmra.mxu1 %v442_v8  ;;  %v437_v60 = vld [vmem:[%s2078_s18 + $0x748] sm:$0xff] }
 0x11e   : > { %v791_v9 = vpop.f32.mrf.mxu0  ;;  %1870 = vmatprep.mubr.msk.f32.mxu1 %vm510_vm0, %v447_v12  ;;  %v441_v8 = vld [vmem:[%s2078_s18 + $0x768] sm:$0xff] }
 0x11f   : > { %v1618_v13 = vmax.f32 %v1554_v63, 0.0  ;;  %v1484_v14 = vmul.f32 %v2422_v18, %v1175_v5  ;;  %v1211_v25 = vpop.f32.mrf.mxu1  ;;  %v436_v5 = vld [vmem:[%s2078_s18 + $0x740] sm:$0xff] }
 0x120   : > { %v794_v15 = vpop.f32.mrf.mxu0  ;;  %1033 = vmatmul.mubr.f32.gmra.mxu0 %v416_v7 }
 0x121   : > { %1683 = vst.msk [vmem:[%s2449_s9 + $0x18] sm:$0xff] %vm1679_vm1, %v1618_v13  ;;  %v1555_v6 = vadd.f32 %v2433_v23, %v1484_v14  ;;  %v1180_v17 = vadd.f32 %v2412_v11, %v794_v15  ;;  %1037 = vmatprep.mubr.f32.mxu0 %v421_v1  ;;  %v2502_v31 = vpop.f32.mrf.mxu1  ;;  %1453 = vmatmul.mubr.f32.gmra.mxu1 %v446_v21  ;;  %v440_v15 = vld [vmem:[%s2078_s18 + $0x760] sm:$0xff] }
 0x122   : > { %v796_v22 = vpop.f32.mrf.mxu0  ;;  %1871 = vmatprep.mubr.msk.f32.mxu1 %vm510_vm0, %v451_v26 }
 0x123   : > { %v1619_v27 = vmax.f32 %v1555_v6, 0.0  ;;  %v1485_v28 = vmul.f32 %v2422_v18, %v1180_v17  ;;  %v1216_v37 = vpop.f32.mrf.mxu1  ;;  %v445_v17 = vld [vmem:[%s2078_s18 + $0x788] sm:$0xff] }
 0x124   : > { %v799_v29 = vpop.f32.mrf.mxu0  ;;  %1038 = vmatmul.mubr.f32.gmra.mxu0 %v420_v20  ;;  %v448_v37 = vld [vmem:[%s2078_s18 + $0x7a0] sm:$0xff] }
 0x125   : > { %1684 = vst.msk [vmem:[%s2449_s9 + $0x20] sm:$0xff] %vm1679_vm1, %v1619_v27  ;;  %v1556_v11 = vadd.f32 %v2433_v23, %v1485_v28  ;;  %v1185_v32 = vadd.f32 %v2424_v19, %v799_v29  ;;  %1042 = vmatprep.mubr.f32.mxu0 %v425_v24  ;;  %v2514_v43 = vpop.f32.mrf.mxu1  ;;  %1458 = vmatmul.mubr.f32.gmra.mxu1 %v450_v34  ;;  %v444_v27 = vld [vmem:[%s2078_s18 + $0x780] sm:$0xff]  ;;  %v449_v29 = vld [vmem:[%s2078_s18 + $0x7a8] sm:$0xff] }
 0x126   : > { %v801_v35 = vpop.f32.mrf.mxu0  ;;  %1872 = vmatprep.mubr.msk.f32.mxu1 %vm510_vm0, %v455_v38 }
 0x127   : > { %v1620_v39 = vmax.f32 %v1556_v11, 0.0  ;;  %v1486_v40 = vmul.f32 %v2422_v18, %v1185_v32  ;;  %v1221_v49 = vpop.f32.mrf.mxu1 }
 0x128   : > { %v804_v41 = vpop.f32.mrf.mxu0  ;;  %1043 = vmatmul.mubr.f32.gmra.mxu0 %v424_v33  ;;  %v457_v49 = vld [vmem:[%s2078_s18 + $0x7e8] sm:$0xff] }
 0x129   : > { %1685 = vst.msk [vmem:[%s2449_s9 + $0x28] sm:$0xff] %vm1679_vm1, %v1620_v39  ;;  %v1557_v19 = vadd.f32 %v2433_v23, %v1486_v40  ;;  %v1190_v44 = vadd.f32 %v2439_v30, %v804_v41  ;;  %1047 = vmatprep.mubr.f32.mxu0 %v429_v36  ;;  %v2526_v55 = vpop.f32.mrf.mxu1  ;;  %1463 = vmatmul.mubr.f32.gmra.mxu1 %v454_v46  ;;  %v453_v39 = vld [vmem:[%s2078_s18 + $0x7c8] sm:$0xff] }
 0x12a   : > { %v806_v47 = vpop.f32.mrf.mxu0  ;;  %1873 = vmatprep.mubr.msk.f32.mxu1 %vm510_vm0, %v459_v50 }
 0x12b   : > { %v1621_v51 = vmax.f32 %v1557_v19, 0.0  ;;  %v1487_v52 = vmul.f32 %v2422_v18, %v1190_v44  ;;  %v1226_v61 = vpop.f32.mrf.mxu1  ;;  %v452_v47 = vld [vmem:[%s2078_s18 + $0x7c0] sm:$0xff] }
 0x12c   : > { %v809_v53 = vpop.f32.mrf.mxu0  ;;  %1048 = vmatmul.mubr.f32.gmra.mxu0 %v428_v45 }
 0x12d   : > { %1686 = vst.msk [vmem:[%s2449_s9 + $0x30] sm:$0xff] %vm1679_vm1, %v1621_v51  ;;  %v1558_v30 = vadd.f32 %v2433_v23, %v1487_v52  ;;  %v1195_v56 = vadd.f32 %v2454_v42, %v809_v53  ;;  %1052 = vmatprep.mubr.f32.mxu0 %v433_v48  ;;  %v2537_v3 = vpop.f32.mrf.mxu1  ;;  %1468 = vmatmul.mubr.f32.gmra.mxu1 %v458_v58 }
 0x12e   : > { %v811_v59 = vpop.f32.mrf.mxu0 }
 0x12f   : > { %v1622_v62 = vmax.f32 %v1558_v30, 0.0  ;;  %v1488_v0 = vmul.f32 %v2422_v18, %v1195_v56  ;;  %v1231_v9 = vpop.f32.mrf.mxu1 }
 0x130   : > { %v814_v2 = vpop.f32.mrf.mxu0  ;;  %1053 = vmatmul.mubr.f32.gmra.mxu0 %v432_v57 }
 0x131   : > { %1687 = vst.msk [vmem:[%s2449_s9 + $0x38] sm:$0xff] %vm1679_vm1, %v1622_v62  ;;  %v1559_v42 = vadd.f32 %v2433_v23, %v1488_v0  ;;  %v1200_v63 = vadd.f32 %v2466_v54, %v814_v2  ;;  %1057 = vmatprep.mubr.f32.mxu0 %v437_v60  ;;  %v2546_v13 = vpop.f32.mrf.mxu1 }
 0x132   : > { %v816_v7 = vpop.f32.mrf.mxu0 }
 0x133   : > { %v1623_v1 = vmax.f32 %v1559_v42, 0.0  ;;  %v1489_v10 = vmul.f32 %v2422_v18, %v1200_v63  ;;  %v1236_v20 = vpop.f32.mrf.mxu1 }
 0x134   : > { %v819_v12 = vpop.f32.mrf.mxu0  ;;  %1058 = vmatmul.mubr.f32.gmra.mxu0 %v436_v5 }
 0x135   : > { %1688 = vst.msk [vmem:[%s2449_s9 + $0x40] sm:$0xff] %vm1679_vm1, %v1623_v1  ;;  %v1560_v14 = vadd.f32 %v2433_v23, %v1489_v10  ;;  %v1205_v54 = vadd.f32 %v2478_v4, %v819_v12  ;;  %1062 = vmatprep.mubr.f32.mxu0 %v441_v8  ;;  %v2555_v25 = vpop.f32.mrf.mxu1 }
 0x136   : > { %v821_v6 = vpop.f32.mrf.mxu0 }
 0x137   : > { %v1624_v21 = vmax.f32 %v1560_v14, 0.0  ;;  %v1490_v22 = vmul.f32 %v2422_v18, %v1205_v54  ;;  %v1241_v11 = vpop.f32.mrf.mxu1 }
 0x138   : > { %v824_v24 = vpop.f32.mrf.mxu0  ;;  %1063 = vmatmul.mubr.f32.gmra.mxu0 %v440_v15 }
 0x139   : > { %1689 = vst.msk [vmem:[%s2449_s9 + $0x48] sm:$0xff] %vm1679_vm1, %v1624_v21  ;;  %v1561_v26 = vadd.f32 %v2433_v23, %v1490_v22  ;;  %v1210_v4 = vadd.f32 %v2490_v16, %v824_v24  ;;  %1067 = vmatprep.mubr.f32.mxu0 %v445_v17  ;;  %v2564_v35 = vpop.f32.mrf.mxu1 }
 0x13a   : > { %v826_v28 = vpop.f32.mrf.mxu0 }
 0x13b   : > { %v1625_v32 = vmax.f32 %v1561_v26, 0.0  ;;  %v1491_v33 = vmul.f32 %v2422_v18, %v1210_v4  ;;  %v1246_v40 = vpop.f32.mrf.mxu1 }
 0x13c   : > { %v829_v34 = vpop.f32.mrf.mxu0  ;;  %1068 = vmatmul.mubr.f32.gmra.mxu0 %v444_v27 }
 0x13d   : > { %1690 = vst.msk [vmem:[%s2449_s9 + $0x50] sm:$0xff] %vm1679_vm1, %v1625_v32  ;;  %v1562_v36 = vadd.f32 %v2433_v23, %v1491_v33  ;;  %v1215_v16 = vadd.f32 %v2502_v31, %v829_v34  ;;  %1072 = vmatprep.mubr.f32.mxu0 %v449_v29  ;;  %v2573_v45 = vpop.f32.mrf.mxu1 }
 0x13e   : > { %v831_v38 = vpop.f32.mrf.mxu0 }
 0x13f   : > { %v1626_v41 = vmax.f32 %v1562_v36, 0.0  ;;  %v1492_v19 = vmul.f32 %v2422_v18, %v1215_v16  ;;  %v1251_v50 = vpop.f32.mrf.mxu1 }
 0x140   : > { %v834_v44 = vpop.f32.mrf.mxu0  ;;  %1073 = vmatmul.mubr.f32.gmra.mxu0 %v448_v37 }
 0x141   : > { %1691 = vst.msk [vmem:[%s2449_s9 + $0x58] sm:$0xff] %vm1679_vm1, %v1626_v41  ;;  %v1563_v46 = vadd.f32 %v2433_v23, %v1492_v19  ;;  %v1220_v31 = vadd.f32 %v2514_v43, %v834_v44  ;;  %1077 = vmatprep.mubr.f32.mxu0 %v453_v39  ;;  %v1254_v30 = vpop.f32.mrf.mxu1  ;;  %v456_v43 = vld [vmem:[%s2078_s18 + $0x7e0] sm:$0xff] }
 0x142   : > { %v836_v48 = vpop.f32.mrf.mxu0 }
 0x143   : > { %v1627_v51 = vmax.f32 %v1563_v46, 0.0  ;;  %v1493_v52 = vmul.f32 %v2422_v18, %v1220_v31  ;;  %v1256_v59 = vpop.f32.mrf.mxu1 }
 0x144   : > { %v839_v53 = vpop.f32.mrf.mxu0  ;;  %1078 = vmatmul.mubr.f32.gmra.mxu0 %v452_v47 }
 0x145   : > { %1692 = vst.msk [vmem:[%s2449_s9 + $0x60] sm:$0xff] %vm1679_vm1, %v1627_v51  ;;  %v1564_v56 = vadd.f32 %v2433_v23, %v1493_v52  ;;  %v1225_v57 = vadd.f32 %v2526_v55, %v839_v53  ;;  %1082 = vmatprep.mubr.f32.mxu0 %v457_v49  ;;  %v1259_v0 = vpop.f32.mrf.mxu1 }
 0x146   : > { %v841_v58 = vpop.f32.mrf.mxu0 }
 0x147   : > { %v1628_v60 = vmax.f32 %v1564_v56, 0.0  ;;  %v1494_v61 = vmul.f32 %v2422_v18, %v1225_v57  ;;  %v1261_v55 = vpop.f32.mrf.mxu1 }
 0x148   : > { %v844_v62 = vpop.f32.mrf.mxu0  ;;  %1083 = vmatmul.mubr.f32.gmra.mxu0 %v456_v43 }
 0x149   : > { %1693 = vst.msk [vmem:[%s2449_s9 + $0x68] sm:$0xff] %vm1679_vm1, %v1628_v60  ;;  %v1565_v2 = vadd.f32 %v2433_v23, %v1494_v61  ;;  %v1230_v42 = vadd.f32 %v2537_v3, %v844_v62  ;;  %v1264_v9 = vpop.f32.mrf.mxu1 }
 0x14a   : > { %v846_v63 = vpop.f32.mrf.mxu0 }
 0x14b   : > { %v1629_v5 = vmax.f32 %v1565_v2, 0.0  ;;  %v1495_v7 = vmul.f32 %v2422_v18, %v1230_v42  ;;  %v1266_v14 = vpop.f32.mrf.mxu1 }
 0x14c   : > { %v849_v8 = vpop.f32.mrf.mxu0 }
 0x14d   : > { %1694 = vst.msk [vmem:[%s2449_s9 + $0x70] sm:$0xff] %vm1679_vm1, %v1629_v5  ;;  %v1566_v1 = vadd.f32 %v2433_v23, %v1495_v7  ;;  %v1235_v10 = vadd.f32 %v2546_v13, %v849_v8  ;;  %v1269_v6 = vpop.f32.mrf.mxu1 }
 0x14e   : > { %v851_v12 = vpop.f32.mrf.mxu0 }
 0x14f   : > { %v1630_v54 = vmax.f32 %v1566_v1, 0.0  ;;  %v1496_v3 = vmul.f32 %v2422_v18, %v1235_v10  ;;  %v1271_v22 = vpop.f32.mrf.mxu1 }
 0x150   : > { %v854_v15 = vpop.f32.mrf.mxu0 }
 0x151   : > { %1695 = vst.msk [vmem:[%s2449_s9 + $0x78] sm:$0xff] %vm1679_vm1, %v1630_v54  ;;  %v1567_v17 = vadd.f32 %v2433_v23, %v1496_v3  ;;  %v1240_v20 = vadd.f32 %v2555_v25, %v854_v15  ;;  %v1274_v4 = vpop.f32.mrf.mxu1 }
 0x152   : > { %v856_v21 = vpop.f32.mrf.mxu0 }
 0x153   : > { %v1631_v24 = vmax.f32 %v1567_v17, 0.0  ;;  %v1497_v13 = vmul.f32 %v2422_v18, %v1240_v20  ;;  %v1276_v11 = vpop.f32.mrf.mxu1 }
 0x154   : > { %v859_v26 = vpop.f32.mrf.mxu0 }
 0x155   : > { %1696 = vst.msk [vmem:[%s2449_s9 + $0x80] sm:$0xff] %vm1679_vm1, %v1631_v24  ;;  %v1568_v27 = vadd.f32 %v2433_v23, %v1497_v13  ;;  %v1245_v28 = vadd.f32 %v2564_v35, %v859_v26  ;;  %v1279_v34 = vpop.f32.mrf.mxu1 }
 0x156   : > { %v861_v29 = vpop.f32.mrf.mxu0 }
 0x157   : > { %v1632_v32 = vmax.f32 %v1568_v27, 0.0  ;;  %v1498_v25 = vmul.f32 %v2422_v18, %v1245_v28  ;;  %v1281_v38 = vpop.f32.mrf.mxu1 }
 0x158   : > { %v864_v33 = vpop.f32.mrf.mxu0 }
 0x159   : > { %1697 = vst.msk [vmem:[%s2449_s9 + $0x88] sm:$0xff] %vm1679_vm1, %v1632_v32  ;;  %v1569_v36 = vadd.f32 %v2433_v23, %v1498_v25  ;;  %v1250_v16 = vadd.f32 %v2573_v45, %v864_v33  ;;  %v1284_v41 = vpop.f32.mrf.mxu1 }
 0x15a   : > { %v866_v37 = vpop.f32.mrf.mxu0 }
 0x15b   : > { %v1633_v39 = vmax.f32 %v1569_v36, 0.0  ;;  %v1499_v35 = vmul.f32 %v2422_v18, %v1250_v16  ;;  %v1286_v31 = vpop.f32.mrf.mxu1 }
 0x15c   : > { %v869_v40 = vpop.f32.mrf.mxu0 }
 0x15d   : > { %1698 = vst.msk [vmem:[%s2449_s9 + $0x90] sm:$0xff] %vm1679_vm1, %v1633_v39  ;;  %v1570_v19 = vadd.f32 %v2433_v23, %v1499_v35  ;;  %v1255_v44 = vadd.f32 %v1254_v30, %v869_v40  ;;  %v1289_v49 = vpop.f32.mrf.mxu1 }
 0x15e   : > { %v871_v46 = vpop.f32.mrf.mxu0 }
 0x15f   : > { %v1634_v47 = vmax.f32 %v1570_v19, 0.0  ;;  %v1500_v48 = vmul.f32 %v2422_v18, %v1255_v44  ;;  %v1291_v53 = vpop.f32.mrf.mxu1 }
 0x160   : > { %v874_v45 = vpop.f32.mrf.mxu0 }
 0x161   : > { %1699 = vst.msk [vmem:[%s2449_s9 + $0x98] sm:$0xff] %vm1679_vm1, %v1634_v47  ;;  %v1571_v50 = vadd.f32 %v2433_v23, %v1500_v48  ;;  %v1260_v51 = vadd.f32 %v1259_v0, %v874_v45  ;;  %v1294_v43 = vpop.f32.mrf.mxu1 }
 0x162   : > { %v876_v52 = vpop.f32.mrf.mxu0 }
 0x163   : > { %v1635_v56 = vmax.f32 %v1571_v50, 0.0  ;;  %v1501_v57 = vmul.f32 %v2422_v18, %v1260_v51  ;;  %v1296_v61 = vpop.f32.mrf.mxu1 }
 0x164   : > { %v879_v30 = vpop.f32.mrf.mxu0 }
 0x165   : > { %1700 = vst.msk [vmem:[%s2449_s9 + $0xa0] sm:$0xff] %vm1679_vm1, %v1635_v56  ;;  %v1572_v58 = vadd.f32 %v2433_v23, %v1501_v57  ;;  %v1265_v59 = vadd.f32 %v1264_v9, %v879_v30  ;;  %v1299_v42 = vpop.f32.mrf.mxu1 }
 0x166   : > { %v881_v60 = vpop.f32.mrf.mxu0 }
 0x167   : > { %v1636_v62 = vmax.f32 %v1572_v58, 0.0  ;;  %v1502_v2 = vmul.f32 %v2422_v18, %v1265_v59  ;;  %v1301_v7 = vpop.f32.mrf.mxu1 }
 0x168   : > { %v884_v0 = vpop.f32.mrf.mxu0 }
 0x169   : > { %1701 = vst.msk [vmem:[%s2449_s9 + $0xa8] sm:$0xff] %vm1679_vm1, %v1636_v62  ;;  %v1573_v63 = vadd.f32 %v2433_v23, %v1502_v2  ;;  %v1270_v55 = vadd.f32 %v1269_v6, %v884_v0  ;;  %v1304_v10 = vpop.f32.mrf.mxu1 }
 0x16a   : > { %v886_v5 = vpop.f32.mrf.mxu0 }
 0x16b   : > { %v1637_v8 = vmax.f32 %v1573_v63, 0.0  ;;  %v1503_v1 = vmul.f32 %v2422_v18, %v1270_v55  ;;  %v1306_v3 = vpop.f32.mrf.mxu1 }
 0x16c   : > { %v889_v9 = vpop.f32.mrf.mxu0 }
 0x16d   : > { %1702 = vst.msk [vmem:[%s2449_s9 + $0xb0] sm:$0xff] %vm1679_vm1, %v1637_v8  ;;  %v1574_v12 = vadd.f32 %v2433_v23, %v1503_v1  ;;  %v1275_v14 = vadd.f32 %v1274_v4, %v889_v9  ;;  %v1309_v20 = vpop.f32.mrf.mxu1 }
 0x16e   : > { %v891_v54 = vpop.f32.mrf.mxu0 }
 0x16f   : > { %v1638_v15 = vmax.f32 %v1574_v12, 0.0  ;;  %v1504_v17 = vmul.f32 %v2422_v18, %v1275_v14  ;;  %v1311_v13 = vpop.f32.mrf.mxu1 }
 0x170   : > { %v894_v6 = vpop.f32.mrf.mxu0 }
 0x171   : > { %1703 = vst.msk [vmem:[%s2449_s9 + $0xb8] sm:$0xff] %vm1679_vm1, %v1638_v15  ;;  %v1575_v21 = vadd.f32 %v2433_v23, %v1504_v17  ;;  %v1280_v22 = vadd.f32 %v1279_v34, %v894_v6  ;;  %v1314_v28 = vpop.f32.mrf.mxu1 }
 0x172   : > { %v896_v24 = vpop.f32.mrf.mxu0 }
 0x173   : > { %v1639_v26 = vmax.f32 %v1575_v21, 0.0  ;;  %v1505_v27 = vmul.f32 %v2422_v18, %v1280_v22  ;;  %v1316_v25 = vpop.f32.mrf.mxu1 }
 0x174   : > { %v899_v4 = vpop.f32.mrf.mxu0 }
 0x175   : > { %1704 = vst.msk [vmem:[%s2449_s9 + $0xc0] sm:$0xff] %vm1679_vm1, %v1639_v26  ;;  %v1576_v29 = vadd.f32 %v2433_v23, %v1505_v27  ;;  %v1285_v11 = vadd.f32 %v1284_v41, %v899_v4  ;;  %v1319_v16 = vpop.f32.mrf.mxu1 }
 0x176   : > { %v901_v32 = vpop.f32.mrf.mxu0 }
 0x177   : > { %v1640_v33 = vmax.f32 %v1576_v29, 0.0  ;;  %v1506_v36 = vmul.f32 %v2422_v18, %v1285_v11  ;;  %v1321_v35 = vpop.f32.mrf.mxu1 }
 0x178   : > { %v904_v34 = vpop.f32.mrf.mxu0 }
 0x179   : > { %1705 = vst.msk [vmem:[%s2449_s9 + $0xc8] sm:$0xff] %vm1679_vm1, %v1640_v33  ;;  %v1577_v37 = vadd.f32 %v2433_v23, %v1506_v36  ;;  %v1290_v38 = vadd.f32 %v1289_v49, %v904_v34  ;;  %v1324_v44 = vpop.f32.mrf.mxu1 }
 0x17a   : > { %v906_v39 = vpop.f32.mrf.mxu0 }
 0x17b   : > { %v1641_v40 = vmax.f32 %v1577_v37, 0.0  ;;  %v1507_v19 = vmul.f32 %v2422_v18, %v1290_v38  ;;  %v1326_v48 = vpop.f32.mrf.mxu1 }
 0x17c   : > { %v909_v41 = vpop.f32.mrf.mxu0 }
 0x17d   : > { %1706 = vst.msk [vmem:[%s2449_s9 + $0xd0] sm:$0xff] %vm1679_vm1, %v1641_v40  ;;  %v1578_v46 = vadd.f32 %v2433_v23, %v1507_v19  ;;  %v1295_v31 = vadd.f32 %v1294_v43, %v909_v41  ;;  %v1329_v51 = vpop.f32.mrf.mxu1 }
 0x17e   : > { %v911_v47 = vpop.f32.mrf.mxu0 }
 0x17f   : > { %v1642_v45 = vmax.f32 %v1578_v46, 0.0  ;;  %v1508_v50 = vmul.f32 %v2422_v18, %v1295_v31  ;;  %v1331_v57 = vpop.f32.mrf.mxu1 }
 0x180   : > { %v914_v49 = vpop.f32.mrf.mxu0 }
 0x181   : > { %1707 = vst.msk [vmem:[%s2449_s9 + $0xd8] sm:$0xff] %vm1679_vm1, %v1642_v45  ;;  %v1579_v52 = vadd.f32 %v2433_v23, %v1508_v50  ;;  %v1300_v53 = vadd.f32 %v1299_v42, %v914_v49  ;;  %v1334_v59 = vpop.f32.mrf.mxu1 }
 0x182   : > { %v916_v56 = vpop.f32.mrf.mxu0 }
 0x183   : > { %v1643_v30 = vmax.f32 %v1579_v52, 0.0  ;;  %v1509_v58 = vmul.f32 %v2422_v18, %v1300_v53  ;;  %v1336_v2 = vpop.f32.mrf.mxu1 }
 0x184   : > { %v919_v43 = vpop.f32.mrf.mxu0 }
 0x185   : > { %1708 = vst.msk [vmem:[%s2449_s9 + $0xe0] sm:$0xff] %vm1679_vm1, %v1643_v30  ;;  %v1580_v60 = vadd.f32 %v2433_v23, %v1509_v58  ;;  %v1305_v61 = vadd.f32 %v1304_v10, %v919_v43  ;;  %v1339_v55 = vpop.f32.mrf.mxu1 }
 0x186   : > { %v921_v62 = vpop.f32.mrf.mxu0 }
 0x187   : > { %v1644_v0 = vmax.f32 %v1580_v60, 0.0  ;;  %v1510_v63 = vmul.f32 %v2422_v18, %v1305_v61  ;;  %v1341_v1 = vpop.f32.mrf.mxu1 }
 0x188   : > { %v924_v42 = vpop.f32.mrf.mxu0 }
 0x189   : > { %1709 = vst.msk [vmem:[%s2449_s9 + $0xe8] sm:$0xff] %vm1679_vm1, %v1644_v0  ;;  %v1581_v5 = vadd.f32 %v2433_v23, %v1510_v63  ;;  %v1310_v7 = vadd.f32 %v1309_v20, %v924_v42  ;;  %v1344_v14 = vpop.f32.mrf.mxu1 }
 0x18a   : > { %v926_v8 = vpop.f32.mrf.mxu0 }
 0x18b   : > { %v1645_v9 = vmax.f32 %v1581_v5, 0.0  ;;  %v1511_v12 = vmul.f32 %v2422_v18, %v1310_v7  ;;  %v1346_v17 = vpop.f32.mrf.mxu1 }
 0x18c   : > { %v929_v10 = vpop.f32.mrf.mxu0 }
 0x18d   : > { %1710 = vst.msk [vmem:[%s2449_s9 + $0xf0] sm:$0xff] %vm1679_vm1, %v1645_v9  ;;  %v1582_v54 = vadd.f32 %v2433_v23, %v1511_v12  ;;  %v1315_v3 = vadd.f32 %v1314_v28, %v929_v10  ;;  %v1349_v22 = vpop.f32.mrf.mxu1 }
 0x18e   : > { %v931_v15 = vpop.f32.mrf.mxu0 }
 0x18f   : > { %v1646_v6 = vmax.f32 %v1582_v54, 0.0  ;;  %v1512_v21 = vmul.f32 %v2422_v18, %v1315_v3  ;;  %v1351_v27 = vpop.f32.mrf.mxu1 }
 0x190   : > { %v934_v20 = vpop.f32.mrf.mxu0 }
 0x191   : > { %1711 = vst.msk [vmem:[%s2449_s9 + $0xf8] sm:$0xff] %vm1679_vm1, %v1646_v6  ;;  %v1583_v24 = vadd.f32 %v2433_v23, %v1512_v21  ;;  %v1320_v13 = vadd.f32 %v1319_v16, %v934_v20  ;;  %v1354_v11 = vpop.f32.mrf.mxu1 }
 0x192   : > { %v936_v26 = vpop.f32.mrf.mxu0 }
 0x193   : > { %v1647_v4 = vmax.f32 %v1583_v24, 0.0  ;;  %v1513_v29 = vmul.f32 %v2422_v18, %v1320_v13  ;;  %v1356_v36 = vpop.f32.mrf.mxu1 }
 0x194   : > { %v939_v28 = vpop.f32.mrf.mxu0 }
 0x195   : > { %1712 = vst.msk [vmem:[%s2449_s9 + $0x100] sm:$0xff] %vm1679_vm1, %v1647_v4  ;;  %v1584_v32 = vadd.f32 %v2433_v23, %v1513_v29  ;;  %v1325_v25 = vadd.f32 %v1324_v44, %v939_v28  ;;  %v1359_v38 = vpop.f32.mrf.mxu1 }
 0x196   : > { %v941_v33 = vpop.f32.mrf.mxu0 }
 0x197   : > { %v1648_v34 = vmax.f32 %v1584_v32, 0.0  ;;  %v1514_v37 = vmul.f32 %v2422_v18, %v1325_v25  ;;  %v1361_v19 = vpop.f32.mrf.mxu1 }
 0x198   : > { %v944_v16 = vpop.f32.mrf.mxu0 }
 0x199   : > { %1713 = vst.msk [vmem:[%s2449_s9 + $0x108] sm:$0xff] %vm1679_vm1, %v1648_v34  ;;  %v1585_v39 = vadd.f32 %v2433_v23, %v1514_v37  ;;  %v1330_v35 = vadd.f32 %v1329_v51, %v944_v16  ;;  %v1364_v31 = vpop.f32.mrf.mxu1 }
 0x19a   : > { %v946_v40 = vpop.f32.mrf.mxu0 }
 0x19b   : > { %v1649_v41 = vmax.f32 %v1585_v39, 0.0  ;;  %v1515_v46 = vmul.f32 %v2422_v18, %v1330_v35  ;;  %v1366_v50 = vpop.f32.mrf.mxu1 }
 0x19c   : > { %v949_v44 = vpop.f32.mrf.mxu0 }
 0x19d   : > { %1714 = vst.msk [vmem:[%s2449_s9 + $0x110] sm:$0xff] %vm1679_vm1, %v1649_v41  ;;  %v1586_v47 = vadd.f32 %v2433_v23, %v1515_v46  ;;  %v1335_v48 = vadd.f32 %v1334_v59, %v949_v44  ;;  %v1369_v53 = vpop.f32.mrf.mxu1 }
 0x19e   : > { %v951_v45 = vpop.f32.mrf.mxu0 }
 0x19f   : > { %v1650_v49 = vmax.f32 %v1586_v47, 0.0  ;;  %v1516_v52 = vmul.f32 %v2422_v18, %v1335_v48  ;;  %v1371_v58 = vpop.f32.mrf.mxu1 }
 0x1a0   : > { %v954_v51 = vpop.f32.mrf.mxu0 }
 0x1a1   : > { %1715 = vst.msk [vmem:[%s2449_s9 + $0x118] sm:$0xff] %vm1679_vm1, %v1650_v49  ;;  %v1587_v56 = vadd.f32 %v2433_v23, %v1516_v52  ;;  %v1340_v57 = vadd.f32 %v1339_v55, %v954_v51  ;;  %v1374_v61 = vpop.f32.mrf.mxu1 }
 0x1a2   : > { %v956_v30 = vpop.f32.mrf.mxu0 }
 0x1a3   : > { %v1651_v43 = vmax.f32 %v1587_v56, 0.0  ;;  %v1517_v60 = vmul.f32 %v2422_v18, %v1340_v57  ;;  %v1376_v63 = vpop.f32.mrf.mxu1 }
 0x1a4   : > { %v959_v59 = vpop.f32.mrf.mxu0 }
 0x1a5   : > { %1716 = vst.msk [vmem:[%s2449_s9 + $0x120] sm:$0xff] %vm1679_vm1, %v1651_v43  ;;  %v1588_v62 = vadd.f32 %v2433_v23, %v1517_v60  ;;  %v1345_v2 = vadd.f32 %v1344_v14, %v959_v59  ;;  %v1379_v7 = vpop.f32.mrf.mxu1 }
 0x1a6   : > { %v961_v0 = vpop.f32.mrf.mxu0 }
 0x1a7   : > { %v1652_v42 = vmax.f32 %v1588_v62, 0.0  ;;  %v1518_v5 = vmul.f32 %v2422_v18, %v1345_v2  ;;  %v1381_v12 = vpop.f32.mrf.mxu1 }
 0x1a8   : > { %v964_v55 = vpop.f32.mrf.mxu0 }
 0x1a9   : > { %1717 = vst.msk [vmem:[%s2449_s9 + $0x128] sm:$0xff] %vm1679_vm1, %v1652_v42  ;;  %v1589_v8 = vadd.f32 %v2433_v23, %v1518_v5  ;;  %v1350_v1 = vadd.f32 %v1349_v22, %v964_v55  ;;  %v1384_v3 = vpop.f32.mrf.mxu1 }
 0x1aa   : > { %v966_v9 = vpop.f32.mrf.mxu0 }
 0x1ab   : > { %v1653_v10 = vmax.f32 %v1589_v8, 0.0  ;;  %v1519_v54 = vmul.f32 %v2422_v18, %v1350_v1  ;;  %v1386_v21 = vpop.f32.mrf.mxu1 }
 0x1ac   : > { %v969_v14 = vpop.f32.mrf.mxu0 }
 0x1ad   : > { %1718 = vst.msk [vmem:[%s2449_s9 + $0x130] sm:$0xff] %vm1679_vm1, %v1653_v10  ;;  %v1590_v15 = vadd.f32 %v2433_v23, %v1519_v54  ;;  %v1355_v17 = vadd.f32 %v1354_v11, %v969_v14  ;;  %v1389_v13 = vpop.f32.mrf.mxu1 }
 0x1ae   : > { %v971_v6 = vpop.f32.mrf.mxu0 }
 0x1af   : > { %v1654_v20 = vmax.f32 %v1590_v15, 0.0  ;;  %v1520_v24 = vmul.f32 %v2422_v18, %v1355_v17  ;;  %v1391_v29 = vpop.f32.mrf.mxu1 }
 0x1b0   : > { %v974_v22 = vpop.f32.mrf.mxu0 }
 0x1b1   : > { %1719 = vst.msk [vmem:[%s2449_s9 + $0x138] sm:$0xff] %vm1679_vm1, %v1654_v20  ;;  %v1591_v26 = vadd.f32 %v2433_v23, %v1520_v24  ;;  %v1360_v27 = vadd.f32 %v1359_v38, %v974_v22  ;;  %v1394_v25 = vpop.f32.mrf.mxu1 }
 0x1b2   : > { %v976_v4 = vpop.f32.mrf.mxu0 }
 0x1b3   : > { %v1655_v28 = vmax.f32 %v1591_v26, 0.0  ;;  %v1521_v32 = vmul.f32 %v2422_v18, %v1360_v27  ;;  %v1396_v37 = vpop.f32.mrf.mxu1 }
 0x1b4   : > { %v979_v11 = vpop.f32.mrf.mxu0 }
 0x1b5   : > { %1720 = vst.msk [vmem:[%s2449_s9 + $0x140] sm:$0xff] %vm1679_vm1, %v1655_v28  ;;  %v1592_v33 = vadd.f32 %v2433_v23, %v1521_v32  ;;  %v1365_v36 = vadd.f32 %v1364_v31, %v979_v11  ;;  %v1399_v35 = vpop.f32.mrf.mxu1 }
 0x1b6   : > { %v981_v34 = vpop.f32.mrf.mxu0 }
 0x1b7   : > { %v1656_v16 = vmax.f32 %v1592_v33, 0.0  ;;  %v1522_v39 = vmul.f32 %v2422_v18, %v1365_v36  ;;  %v1401_v46 = vpop.f32.mrf.mxu1 }
 0x1b8   : > { %v984_v38 = vpop.f32.mrf.mxu0 }
 0x1b9   : > { %1721 = vst.msk [vmem:[%s2449_s9 + $0x148] sm:$0xff] %vm1679_vm1, %v1656_v16  ;;  %v1593_v40 = vadd.f32 %v2433_v23, %v1522_v39  ;;  %v1370_v19 = vadd.f32 %v1369_v53, %v984_v38  ;;  %v1404_v48 = vpop.f32.mrf.mxu1 }
 0x1ba   : > { %v986_v41 = vpop.f32.mrf.mxu0 }
 0x1bb   : > { %v1657_v44 = vmax.f32 %v1593_v40, 0.0  ;;  %v1523_v47 = vmul.f32 %v2422_v18, %v1370_v19  ;;  %v1406_v52 = vpop.f32.mrf.mxu1 }
 0x1bc   : > { %v989_v31 = vpop.f32.mrf.mxu0 }
 0x1bd   : > { %1722 = vst.msk [vmem:[%s2449_s9 + $0x150] sm:$0xff] %vm1679_vm1, %v1657_v44  ;;  %v1594_v45 = vadd.f32 %v2433_v23, %v1523_v47  ;;  %v1375_v50 = vadd.f32 %v1374_v61, %v989_v31  ;;  %v1409_v57 = vpop.f32.mrf.mxu1 }
 0x1be   : > { %v991_v49 = vpop.f32.mrf.mxu0 }
 0x1bf   : > { %v1658_v51 = vmax.f32 %v1594_v45, 0.0  ;;  %v1524_v56 = vmul.f32 %v2422_v18, %v1375_v50  ;;  %v1411_v60 = vpop.f32.mrf.mxu1 }
 0x1c0   : > { %v994_v53 = vpop.f32.mrf.mxu0 }
 0x1c1   : > { %1723 = vst.msk [vmem:[%s2449_s9 + $0x158] sm:$0xff] %vm1679_vm1, %v1658_v51  ;;  %v1595_v30 = vadd.f32 %v2433_v23, %v1524_v56  ;;  %v1380_v58 = vadd.f32 %v1379_v7, %v994_v53  ;;  %v1414_v2 = vpop.f32.mrf.mxu1  ;;  %v2723_v7 = vld [vmem:[%s2809_s2] ss:$0 sm:$0xff] }
 0x1c2   : > { %v996_v43 = vpop.f32.mrf.mxu0 }
 0x1c3   : > { %v1659_v59 = vmax.f32 %v1595_v30, 0.0  ;;  %v1525_v62 = vmul.f32 %v2422_v18, %v1380_v58  ;;  %v1416_v5 = vpop.f32.mrf.mxu1 }
 0x1c4   : > { %v999_v61 = vpop.f32.mrf.mxu0 }
 0x1c5   : > { %1724 = vst.msk [vmem:[%s2449_s9 + $0x160] sm:$0xff] %vm1679_vm1, %v1659_v59  ;;  %v1596_v0 = vadd.f32 %v2433_v23, %v1525_v62  ;;  %v1385_v63 = vadd.f32 %v1384_v3, %v999_v61  ;;  %v1419_v18 = vpop.f32.mrf.mxu1  ;;  %v2731_v23 = vld [vmem:[%s2810_s3] ss:$0 sm:$0xff] }
 0x1c6   : > { %v1001_v42 = vpop.f32.mrf.mxu0 }
 0x1c7   : > { %v1660_v55 = vmax.f32 %v1596_v0, 0.0  ;;  %v1526_v8 = vmul.f32 %v2723_v7, %v1385_v63  ;;  %v1421_v54 = vpop.f32.mrf.mxu1 }
 0x1c8   : > { %v1004_v1 = vpop.f32.mrf.mxu0 }
 0x1c9   : > { %1725 = vst.msk [vmem:[%s2449_s9 + $0x168] sm:$0xff] %vm1679_vm1, %v1660_v55  ;;  %v1597_v9 = vadd.f32 %v2731_v23, %v1526_v8  ;;  %v1390_v12 = vadd.f32 %v1389_v13, %v1004_v1  ;;  %v1424_v17 = vpop.f32.mrf.mxu1 }
 0x1ca   : > { %v1006_v10 = vpop.f32.mrf.mxu0 }
 0x1cb   : > { %v1661_v14 = vmax.f32 %v1597_v9, 0.0  ;;  %v1527_v3 = vmul.f32 %v2723_v7, %v1390_v12  ;;  %v1426_v24 = vpop.f32.mrf.mxu1 }
 0x1cc   : > { %v1009_v15 = vpop.f32.mrf.mxu0 }
 0x1cd   : > { %1726 = vst.msk [vmem:[%s2449_s9 + $0x170] sm:$0xff] %vm1679_vm1, %v1661_v14  ;;  %v1598_v6 = vadd.f32 %v2731_v23, %v1527_v3  ;;  %v1395_v21 = vadd.f32 %v1394_v25, %v1009_v15  ;;  %v1429_v27 = vpop.f32.mrf.mxu1 }
 0x1ce   : > { %v1011_v20 = vpop.f32.mrf.mxu0 }
 0x1cf   : > { %v1662_v22 = vmax.f32 %v1598_v6, 0.0  ;;  %v1528_v26 = vmul.f32 %v2723_v7, %v1395_v21  ;;  %v1431_v32 = vpop.f32.mrf.mxu1 }
 0x1d0   : > { %v1014_v13 = vpop.f32.mrf.mxu0 }
 0x1d1   : > { %1727 = vst.msk [vmem:[%s2449_s9 + $0x178] sm:$0xff] %vm1679_vm1, %v1662_v22  ;;  %v1599_v4 = vadd.f32 %v2731_v23, %v1528_v26  ;;  %v1400_v29 = vadd.f32 %v1399_v35, %v1014_v13  ;;  %v1434_v36 = vpop.f32.mrf.mxu1 }
 0x1d2   : > { %v1016_v28 = vpop.f32.mrf.mxu0 }
 0x1d3   : > { %v1663_v11 = vmax.f32 %v1599_v4, 0.0  ;;  %v1529_v33 = vmul.f32 %v2723_v7, %v1400_v29  ;;  %v1436_v39 = vpop.f32.mrf.mxu1 }
 0x1d4   : > { %v1019_v25 = vpop.f32.mrf.mxu0 }
 0x1d5   : > { %1728 = vst.msk [vmem:[%s2449_s9 + $0x180] sm:$0xff] %vm1679_vm1, %v1663_v11  ;;  %v1600_v34 = vadd.f32 %v2731_v23, %v1529_v33  ;;  %v1405_v37 = vadd.f32 %v1404_v48, %v1019_v25  ;;  %v1439_v19 = vpop.f32.mrf.mxu1 }
 0x1d6   : > { %v1021_v16 = vpop.f32.mrf.mxu0 }
 0x1d7   : > { %v1664_v38 = vmax.f32 %v1600_v34, 0.0  ;;  %v1530_v40 = vmul.f32 %v2723_v7, %v1405_v37  ;;  %v1441_v47 = vpop.f32.mrf.mxu1 }
 0x1d8   : > { %v1024_v35 = vpop.f32.mrf.mxu0 }
 0x1d9   : > { %1729 = vst.msk [vmem:[%s2449_s9 + $0x188] sm:$0xff] %vm1679_vm1, %v1664_v38  ;;  %v1601_v41 = vadd.f32 %v2731_v23, %v1530_v40  ;;  %v1410_v46 = vadd.f32 %v1409_v57, %v1024_v35  ;;  %v1444_v50 = vpop.f32.mrf.mxu1 }
 0x1da   : > { %v1026_v44 = vpop.f32.mrf.mxu0 }
 0x1db   : > { %v1665_v31 = vmax.f32 %v1601_v41, 0.0  ;;  %v1531_v45 = vmul.f32 %v2723_v7, %v1410_v46  ;;  %v1446_v56 = vpop.f32.mrf.mxu1 }
 0x1dc   : > { %v1029_v48 = vpop.f32.mrf.mxu0 }
 0x1dd   : > { %1730 = vst.msk [vmem:[%s2449_s9 + $0x190] sm:$0xff] %vm1679_vm1, %v1665_v31  ;;  %v1602_v49 = vadd.f32 %v2731_v23, %v1531_v45  ;;  %v1415_v52 = vadd.f32 %v1414_v2, %v1029_v48  ;;  %v1449_v58 = vpop.f32.mrf.mxu1 }
 0x1de   : > { %v1031_v51 = vpop.f32.mrf.mxu0 }
 0x1df   : > { %v1666_v53 = vmax.f32 %v1602_v49, 0.0  ;;  %v1532_v30 = vmul.f32 %v2723_v7, %v1415_v52  ;;  %v1451_v62 = vpop.f32.mrf.mxu1 }
 0x1e0   : > { %v1034_v57 = vpop.f32.mrf.mxu0 }
 0x1e1   : > { %1731 = vst.msk [vmem:[%s2449_s9 + $0x198] sm:$0xff] %vm1679_vm1, %v1666_v53  ;;  %v1603_v43 = vadd.f32 %v2731_v23, %v1532_v30  ;;  %v1420_v60 = vadd.f32 %v1419_v18, %v1034_v57  ;;  %v1454_v63 = vpop.f32.mrf.mxu1 }
 0x1e2   : > { %v1036_v59 = vpop.f32.mrf.mxu0 }
 0x1e3   : > { %v1667_v61 = vmax.f32 %v1603_v43, 0.0  ;;  %v1533_v0 = vmul.f32 %v2723_v7, %v1420_v60  ;;  %v1456_v8 = vpop.f32.mrf.mxu1 }
 0x1e4   : > { %v1039_v2 = vpop.f32.mrf.mxu0 }
 0x1e5   : > { %1732 = vst.msk [vmem:[%s2449_s9 + $0x1a0] sm:$0xff] %vm1679_vm1, %v1667_v61  ;;  %v1604_v42 = vadd.f32 %v2731_v23, %v1533_v0  ;;  %v1425_v5 = vadd.f32 %v1424_v17, %v1039_v2  ;;  %v1459_v12 = vpop.f32.mrf.mxu1 }
 0x1e6   : > { %v1041_v55 = vpop.f32.mrf.mxu0 }
 0x1e7   : > { %v1668_v1 = vmax.f32 %v1604_v42, 0.0  ;;  %v1534_v9 = vmul.f32 %v2723_v7, %v1425_v5  ;;  %v1461_v3 = vpop.f32.mrf.mxu1 }
 0x1e8   : > { %v1044_v18 = vpop.f32.mrf.mxu0 }
 0x1e9   : > { %1733 = vst.msk [vmem:[%s2449_s9 + $0x1a8] sm:$0xff] %vm1679_vm1, %v1668_v1  ;;  %v1605_v10 = vadd.f32 %v2731_v23, %v1534_v9  ;;  %v1430_v54 = vadd.f32 %v1429_v27, %v1044_v18  ;;  %v1464_v21 = vpop.f32.mrf.mxu1 }
 0x1ea   : > { %v1046_v14 = vpop.f32.mrf.mxu0 }
 0x1eb   : > { %v1669_v15 = vmax.f32 %v1605_v10, 0.0  ;;  %v1535_v6 = vmul.f32 %v2723_v7, %v1430_v54  ;;  %v1466_v26 = vpop.f32.mrf.mxu1 }
 0x1ec   : > { %v1049_v17 = vpop.f32.mrf.mxu0 }
 0x1ed   : > { %1734 = vst.msk [vmem:[%s2449_s9 + $0x1b0] sm:$0xff] %vm1679_vm1, %v1669_v15  ;;  %v1606_v20 = vadd.f32 %v2731_v23, %v1535_v6  ;;  %v1435_v24 = vadd.f32 %v1434_v36, %v1049_v17  ;;  %v1469_v29 = vpop.f32.mrf.mxu1 }
 0x1ee   : > { %v1051_v22 = vpop.f32.mrf.mxu0 }
 0x1ef   : > { %v1670_v13 = vmax.f32 %v1606_v20, 0.0  ;;  %v1536_v4 = vmul.f32 %v2723_v7, %v1435_v24  ;;  %v1471_v33 = vpop.f32.mrf.mxu1 }
 0x1f0   : > { %v1054_v27 = vpop.f32.mrf.mxu0 }
 0x1f1   : > { %1735 = vst.msk [vmem:[%s2449_s9 + $0x1b8] sm:$0xff] %vm1679_vm1, %v1670_v13  ;;  %v1607_v28 = vadd.f32 %v2731_v23, %v1536_v4  ;;  %v1440_v32 = vadd.f32 %v1439_v19, %v1054_v27 }
 0x1f2   : > { %v1056_v11 = vpop.f32.mrf.mxu0 }
 0x1f3   : > { %v1671_v25 = vmax.f32 %v1607_v28, 0.0  ;;  %v1537_v34 = vmul.f32 %v2723_v7, %v1440_v32 }
 0x1f4   : > { %v1059_v36 = vpop.f32.mrf.mxu0 }
 0x1f5   : > { %1736 = vst.msk [vmem:[%s2449_s9 + $0x1c0] sm:$0xff] %vm1679_vm1, %v1671_v25  ;;  %v1608_v37 = vadd.f32 %v2731_v23, %v1537_v34  ;;  %v1445_v16 = vadd.f32 %v1444_v50, %v1059_v36 }
 0x1f6   : > { %v1061_v39 = vpop.f32.mrf.mxu0 }
 0x1f7   : > { %v1672_v38 = vmax.f32 %v1608_v37, 0.0  ;;  %v1538_v40 = vmul.f32 %v2723_v7, %v1445_v16 }
 0x1f8   : > { %v1064_v35 = vpop.f32.mrf.mxu0 }
 0x1f9   : > { %1737 = vst.msk [vmem:[%s2449_s9 + $0x1c8] sm:$0xff] %vm1679_vm1, %v1672_v38  ;;  %v1609_v19 = vadd.f32 %v2731_v23, %v1538_v40  ;;  %v1450_v41 = vadd.f32 %v1449_v58, %v1064_v35 }
 0x1fa   : > { %v1066_v46 = vpop.f32.mrf.mxu0 }
 0x1fb   : > { %v1673_v44 = vmax.f32 %v1609_v19, 0.0  ;;  %v1539_v47 = vmul.f32 %v2723_v7, %v1450_v41 }
 0x1fc   : > { %v1069_v31 = vpop.f32.mrf.mxu0 }
 0x1fd   : > { %1738 = vst.msk [vmem:[%s2449_s9 + $0x1d0] sm:$0xff] %vm1679_vm1, %v1673_v44  ;;  %v1610_v45 = vadd.f32 %v2731_v23, %v1539_v47  ;;  %v1455_v48 = vadd.f32 %v1454_v63, %v1069_v31 }
 0x1fe   : > { %v1071_v50 = vpop.f32.mrf.mxu0 }
 0x1ff   : > { %v1674_v49 = vmax.f32 %v1610_v45, 0.0  ;;  %v1540_v52 = vmul.f32 %v2723_v7, %v1455_v48 }
 0x200   : > { %v1074_v51 = vpop.f32.mrf.mxu0 }
 0x201   : > { %1739 = vst.msk [vmem:[%s2449_s9 + $0x1d8] sm:$0xff] %vm1679_vm1, %v1674_v49  ;;  %v1611_v56 = vadd.f32 %v2731_v23, %v1540_v52  ;;  %v1460_v53 = vadd.f32 %v1459_v12, %v1074_v51 }
 0x202   : > { %v1076_v30 = vpop.f32.mrf.mxu0 }
 0x203   : > { %v1675_v57 = vmax.f32 %v1611_v56, 0.0  ;;  %v1541_v58 = vmul.f32 %v2723_v7, %v1460_v53 }
 0x204   : > { %v1079_v43 = vpop.f32.mrf.mxu0 }
 0x205   : > { %1740 = vst.msk [vmem:[%s2449_s9 + $0x1e0] sm:$0xff] %vm1679_vm1, %v1675_v57  ;;  %v1612_v60 = vadd.f32 %v2731_v23, %v1541_v58  ;;  %v1465_v59 = vadd.f32 %v1464_v21, %v1079_v43 }
 0x206   : > { %v1081_v62 = vpop.f32.mrf.mxu0 }
 0x207   : > { %v1676_v61 = vmax.f32 %v1612_v60, 0.0  ;;  %v1542_v0 = vmul.f32 %v2723_v7, %v1465_v59 }
 0x208   : > { %v1084_v2 = vpop.f32.mrf.mxu0 }
 0x209   : > { %1741 = vst.msk [vmem:[%s2449_s9 + $0x1e8] sm:$0xff] %vm1679_vm1, %v1676_v61  ;;  %v1613_v63 = vadd.f32 %v2731_v23, %v1542_v0  ;;  %v1470_v42 = vadd.f32 %v1469_v29, %v1084_v2 }
 0x20a   : > { %v1086_v5 = vpop.f32.mrf.mxu0 }
 0x20b   : > { %v1677_v55 = vmax.f32 %v1613_v63, 0.0  ;;  %v1543_v8 = vmul.f32 %v2723_v7, %v1470_v42 }
 0x20d   : > { %1742 = vst.msk [vmem:[%s2449_s9 + $0x1f0] sm:$0xff] %vm1679_vm1, %v1677_v55  ;;  %v1614_v1 = vadd.f32 %v2731_v23, %v1543_v8 }
 0x20f   : > { %v1678_v9 = vmax.f32 %v1614_v1, 0.0 }
 0x211   : > { %1743 = vst.msk [vmem:[%s2449_s9 + $0x1f8] sm:$0xff] %vm1679_vm1, %v1678_v9 }
 0x212 PF: > { %s14_s15 = sadd.s32 1, %s1896_s15  }
 0x213   : > { %p11_p4 = scmp.ge.s32.totalorder %s14_s15, 6  }
 0x215   :  { %13 = sbr.rel (!%p11_p4) target bundleno = 1 (0x1), region = 66 }

// kernel: cnnplus_forward.5
= control target key start
LH: loop header
LB: loop body
LE: loop exit
PB: predicated region body
PF: predicated region fallthrough
CT: control target
= control target key end

     0   :  { %s3144_s0 = inlined_call_operand.vmem [shape: f32[8,3136], index: 0, kind: input, shape index: {}]   ;;  %s3145_s1 = inlined_call_operand.vmem [shape: f32[3136,128], index: 1, kind: input, shape index: {}]   ;;  %s3146_s2 = inlined_call_operand.vmem [shape: f32[1,128], index: 2, kind: input, shape index: {}]   ;;  %s3147_s3 = inlined_call_operand.vmem [shape: f32[1,128], index: 3, kind: input, shape index: {}]   ;;  %s3148_s4 = inlined_call_operand.hbm [shape: f32[8,128], index: 4, kind: output, shape index: {}]  }
   0x1   :  { %v74_v0 = vld [vmem:[%s3145_s1 + $0xf8] sm:$0xff]  ;;  %v73_v4 = vld [vmem:[%s3145_s1 + $0xf0] sm:$0xff]  ;;  %v72_v8 = vld [vmem:[%s3145_s1 + $0xe8] sm:$0xff] }
   0x2   :  { %v106_v1 = vld [vmem:[%s3145_s1 + $0x1f8] sm:$0xff]  ;;  %1383 = vmatprep.subr.mxu0 %v74_v0  ;;  %v105_v5 = vld [vmem:[%s3145_s1 + $0x1f0] sm:$0xff]  ;;  %v104_v9 = vld [vmem:[%s3145_s1 + $0x1e8] sm:$0xff] }
   0x3   :  { %v58_v2 = vld [vmem:[%s3145_s1 + $0x78] sm:$0xff]  ;;  %1418 = vmatprep.subr.mxu1 %v106_v1  ;;  %v57_v6 = vld [vmem:[%s3145_s1 + $0x70] sm:$0xff]  ;;  %v56_v10 = vld [vmem:[%s3145_s1 + $0x68] sm:$0xff] }
   0x4   :  { %v90_v3 = vld [vmem:[%s3145_s1 + $0x178] sm:$0xff]  ;;  %1384 = vmatpush3.msra.mxu0 %v58_v2  ;;  %v89_v7 = vld [vmem:[%s3145_s1 + $0x170] sm:$0xff]  ;;  %v88_v11 = vld [vmem:[%s3145_s1 + $0x168] sm:$0xff] }
   0x5   :  { %1419 = vmatpush3.msra.mxu1 %v90_v3  ;;  %1385 = vmatprep.subr.mxu0 %v73_v4  ;;  %v71_v12 = vld [vmem:[%s3145_s1 + $0xe0] sm:$0xff]  ;;  %v70_v16 = vld [vmem:[%s3145_s1 + $0xd8] sm:$0xff]  ;;  %v69_v20 = vld [vmem:[%s3145_s1 + $0xd0] sm:$0xff] }
   0x6   :  { %1420 = vmatprep.subr.mxu1 %v105_v5  ;;  %1386 = vmatpush3.msra.mxu0 %v57_v6  ;;  %v103_v13 = vld [vmem:[%s3145_s1 + $0x1e0] sm:$0xff]  ;;  %v102_v17 = vld [vmem:[%s3145_s1 + $0x1d8] sm:$0xff]  ;;  %v101_v21 = vld [vmem:[%s3145_s1 + $0x1d0] sm:$0xff] }
   0x7   :  { %1421 = vmatpush3.msra.mxu1 %v89_v7  ;;  %1387 = vmatprep.subr.mxu0 %v72_v8  ;;  %v55_v14 = vld [vmem:[%s3145_s1 + $0x60] sm:$0xff]  ;;  %v54_v18 = vld [vmem:[%s3145_s1 + $0x58] sm:$0xff]  ;;  %v53_v22 = vld [vmem:[%s3145_s1 + $0x50] sm:$0xff] }
   0x8   :  { %1422 = vmatprep.subr.mxu1 %v104_v9  ;;  %v87_v15 = vld [vmem:[%s3145_s1 + $0x160] sm:$0xff]  ;;  %1388 = vmatpush3.msra.mxu0 %v56_v10  ;;  %v86_v19 = vld [vmem:[%s3145_s1 + $0x158] sm:$0xff]  ;;  %v85_v23 = vld [vmem:[%s3145_s1 + $0x150] sm:$0xff] }
   0x9   :  { %1423 = vmatpush3.msra.mxu1 %v88_v11  ;;  %1389 = vmatprep.subr.mxu0 %v71_v12  ;;  %v68_v24 = vld [vmem:[%s3145_s1 + $0xc8] sm:$0xff]  ;;  %v67_v28 = vld [vmem:[%s3145_s1 + $0xc0] sm:$0xff]  ;;  %v66_v32 = vld [vmem:[%s3145_s1 + $0xb8] sm:$0xff] }
   0xa   :  { %1424 = vmatprep.subr.mxu1 %v103_v13  ;;  %1390 = vmatpush3.msra.mxu0 %v55_v14  ;;  %v100_v25 = vld [vmem:[%s3145_s1 + $0x1c8] sm:$0xff]  ;;  %v99_v29 = vld [vmem:[%s3145_s1 + $0x1c0] sm:$0xff]  ;;  %v98_v33 = vld [vmem:[%s3145_s1 + $0x1b8] sm:$0xff] }
   0xb   :  { %1425 = vmatpush3.msra.mxu1 %v87_v15  ;;  %1391 = vmatprep.subr.mxu0 %v70_v16  ;;  %v52_v26 = vld [vmem:[%s3145_s1 + $0x48] sm:$0xff]  ;;  %v51_v30 = vld [vmem:[%s3145_s1 + $0x40] sm:$0xff]  ;;  %v50_v34 = vld [vmem:[%s3145_s1 + $0x38] sm:$0xff] }
   0xc   :  { %1426 = vmatprep.subr.mxu1 %v102_v17  ;;  %1392 = vmatpush3.msra.mxu0 %v54_v18  ;;  %v84_v27 = vld [vmem:[%s3145_s1 + $0x148] sm:$0xff]  ;;  %v83_v31 = vld [vmem:[%s3145_s1 + $0x140] sm:$0xff]  ;;  %v82_v35 = vld [vmem:[%s3145_s1 + $0x138] sm:$0xff] }
   0xd   :  { %1427 = vmatpush3.msra.mxu1 %v86_v19  ;;  %1393 = vmatprep.subr.mxu0 %v69_v20  ;;  %v65_v36 = vld [vmem:[%s3145_s1 + $0xb0] sm:$0xff]  ;;  %v64_v40 = vld [vmem:[%s3145_s1 + $0xa8] sm:$0xff]  ;;  %v63_v44 = vld [vmem:[%s3145_s1 + $0xa0] sm:$0xff] }
   0xe   :  { %1428 = vmatprep.subr.mxu1 %v101_v21  ;;  %1394 = vmatpush3.msra.mxu0 %v53_v22  ;;  %v97_v37 = vld [vmem:[%s3145_s1 + $0x1b0] sm:$0xff]  ;;  %v96_v41 = vld [vmem:[%s3145_s1 + $0x1a8] sm:$0xff]  ;;  %v95_v45 = vld [vmem:[%s3145_s1 + $0x1a0] sm:$0xff] }
   0xf   :  { %1429 = vmatpush3.msra.mxu1 %v85_v23  ;;  %1395 = vmatprep.subr.mxu0 %v68_v24  ;;  %v49_v38 = vld [vmem:[%s3145_s1 + $0x30] sm:$0xff]  ;;  %v48_v42 = vld [vmem:[%s3145_s1 + $0x28] sm:$0xff]  ;;  %v47_v46 = vld [vmem:[%s3145_s1 + $0x20] sm:$0xff] }
  0x10   :  { %1430 = vmatprep.subr.mxu1 %v100_v25  ;;  %1396 = vmatpush3.msra.mxu0 %v52_v26  ;;  %v81_v39 = vld [vmem:[%s3145_s1 + $0x130] sm:$0xff]  ;;  %v80_v43 = vld [vmem:[%s3145_s1 + $0x128] sm:$0xff]  ;;  %v79_v47 = vld [vmem:[%s3145_s1 + $0x120] sm:$0xff] }
  0x11   :  { %1431 = vmatpush3.msra.mxu1 %v84_v27  ;;  %1397 = vmatprep.subr.mxu0 %v67_v28  ;;  %v62_v48 = vld [vmem:[%s3145_s1 + $0x98] sm:$0xff]  ;;  %v61_v52 = vld [vmem:[%s3145_s1 + $0x90] sm:$0xff]  ;;  %v60_v56 = vld [vmem:[%s3145_s1 + $0x88] sm:$0xff] }
  0x12   :  { %1432 = vmatprep.subr.mxu1 %v99_v29  ;;  %1398 = vmatpush3.msra.mxu0 %v51_v30  ;;  %v94_v49 = vld [vmem:[%s3145_s1 + $0x198] sm:$0xff]  ;;  %v93_v53 = vld [vmem:[%s3145_s1 + $0x190] sm:$0xff]  ;;  %v92_v57 = vld [vmem:[%s3145_s1 + $0x188] sm:$0xff] }
  0x13   :  { %1433 = vmatpush3.msra.mxu1 %v83_v31  ;;  %1399 = vmatprep.subr.mxu0 %v66_v32  ;;  %v46_v50 = vld [vmem:[%s3145_s1 + $0x18] sm:$0xff]  ;;  %v45_v54 = vld [vmem:[%s3145_s1 + $0x10] sm:$0xff]  ;;  %v44_v58 = vld [vmem:[%s3145_s1 + $0x8] sm:$0xff] }
  0x14   :  { %1434 = vmatprep.subr.mxu1 %v98_v33  ;;  %1400 = vmatpush3.msra.mxu0 %v50_v34  ;;  %v78_v51 = vld [vmem:[%s3145_s1 + $0x118] sm:$0xff]  ;;  %v77_v55 = vld [vmem:[%s3145_s1 + $0x110] sm:$0xff]  ;;  %v76_v59 = vld [vmem:[%s3145_s1 + $0x108] sm:$0xff] }
  0x15   :  { %1435 = vmatpush3.msra.mxu1 %v82_v35  ;;  %1401 = vmatprep.subr.mxu0 %v65_v36  ;;  %v59_v60 = vld [vmem:[%s3145_s1 + $0x80] sm:$0xff]  ;;  %v19_v63 = vld [vmem:[%s3144_s0 + $0x8] sm:$0xff]  ;;  %v21_v1 = vld [vmem:[%s3144_s0 + $0x18] sm:$0xff] }
  0x16   :  { %1436 = vmatprep.subr.mxu1 %v97_v37  ;;  %1402 = vmatpush3.msra.mxu0 %v49_v38  ;;  %v91_v61 = vld [vmem:[%s3145_s1 + $0x180] sm:$0xff]  ;;  %v20_v3 = vld [vmem:[%s3144_s0 + $0x10] sm:$0xff]  ;;  %v138_v4 = vld [vmem:[%s3145_s1 + $0x2f8] sm:$0xff] }
  0x17   :  { %1437 = vmatpush3.msra.mxu1 %v81_v39  ;;  %1403 = vmatprep.subr.mxu0 %v64_v40  ;;  %v43_v62 = vld [vmem:[%s3145_s1] sm:$0xff]  ;;  %v170_v5 = vld [vmem:[%s3145_s1 + $0x3f8] sm:$0xff]  ;;  %v137_v8 = vld [vmem:[%s3145_s1 + $0x2f0] sm:$0xff] }
  0x18   :  { %1438 = vmatprep.subr.mxu1 %v96_v41  ;;  %1404 = vmatpush3.msra.mxu0 %v48_v42  ;;  %v75_v0 = vld [vmem:[%s3145_s1 + $0x100] sm:$0xff]  ;;  %v122_v6 = vld [vmem:[%s3145_s1 + $0x278] sm:$0xff]  ;;  %v169_v9 = vld [vmem:[%s3145_s1 + $0x3f0] sm:$0xff] }
  0x19   :  { %1439 = vmatpush3.msra.mxu1 %v80_v43  ;;  %1405 = vmatprep.subr.mxu0 %v63_v44  ;;  %v18_v2 = vld [vmem:[%s3144_s0] sm:$0xff]  ;;  %v154_v7 = vld [vmem:[%s3145_s1 + $0x378] sm:$0xff]  ;;  %v121_v10 = vld [vmem:[%s3145_s1 + $0x270] sm:$0xff] }
  0x1a   :  { %1440 = vmatprep.subr.mxu1 %v95_v45  ;;  %1406 = vmatpush3.msra.mxu0 %v47_v46  ;;  %v153_v11 = vld [vmem:[%s3145_s1 + $0x370] sm:$0xff]  ;;  %v136_v12 = vld [vmem:[%s3145_s1 + $0x2e8] sm:$0xff]  ;;  %v135_v16 = vld [vmem:[%s3145_s1 + $0x2e0] sm:$0xff] }
  0x1b   :  { %1441 = vmatpush3.msra.mxu1 %v79_v47  ;;  %1407 = vmatprep.subr.mxu0 %v62_v48  ;;  %v168_v13 = vld [vmem:[%s3145_s1 + $0x3e8] sm:$0xff]  ;;  %v167_v17 = vld [vmem:[%s3145_s1 + $0x3e0] sm:$0xff]  ;;  %v134_v20 = vld [vmem:[%s3145_s1 + $0x2d8] sm:$0xff] }
  0x1c   :  { %1442 = vmatprep.subr.mxu1 %v94_v49  ;;  %1408 = vmatpush3.msra.mxu0 %v46_v50  ;;  %v120_v14 = vld [vmem:[%s3145_s1 + $0x268] sm:$0xff]  ;;  %v119_v18 = vld [vmem:[%s3145_s1 + $0x260] sm:$0xff]  ;;  %v166_v21 = vld [vmem:[%s3145_s1 + $0x3d8] sm:$0xff] }
  0x1d   :  { %1443 = vmatpush3.msra.mxu1 %v78_v51  ;;  %1409 = vmatprep.subr.mxu0 %v61_v52  ;;  %v152_v15 = vld [vmem:[%s3145_s1 + $0x368] sm:$0xff]  ;;  %v151_v19 = vld [vmem:[%s3145_s1 + $0x360] sm:$0xff]  ;;  %v118_v22 = vld [vmem:[%s3145_s1 + $0x258] sm:$0xff] }
  0x1e   :  { %1444 = vmatprep.subr.mxu1 %v93_v53  ;;  %1410 = vmatpush3.msra.mxu0 %v45_v54  ;;  %v150_v23 = vld [vmem:[%s3145_s1 + $0x358] sm:$0xff]  ;;  %v133_v24 = vld [vmem:[%s3145_s1 + $0x2d0] sm:$0xff]  ;;  %v132_v28 = vld [vmem:[%s3145_s1 + $0x2c8] sm:$0xff] }
  0x1f   :  { %1445 = vmatpush3.msra.mxu1 %v77_v55  ;;  %1411 = vmatprep.subr.mxu0 %v60_v56  ;;  %v165_v25 = vld [vmem:[%s3145_s1 + $0x3d0] sm:$0xff]  ;;  %v164_v29 = vld [vmem:[%s3145_s1 + $0x3c8] sm:$0xff]  ;;  %v131_v32 = vld [vmem:[%s3145_s1 + $0x2c0] sm:$0xff] }
  0x20   :  { %1446 = vmatprep.subr.mxu1 %v92_v57  ;;  %1412 = vmatpush3.msra.mxu0 %v44_v58  ;;  %v117_v26 = vld [vmem:[%s3145_s1 + $0x250] sm:$0xff]  ;;  %v116_v30 = vld [vmem:[%s3145_s1 + $0x248] sm:$0xff]  ;;  %v163_v33 = vld [vmem:[%s3145_s1 + $0x3c0] sm:$0xff] }
  0x21   :  { %1447 = vmatpush3.msra.mxu1 %v76_v59  ;;  %1413 = vmatprep.subr.mxu0 %v59_v60  ;;  %v149_v27 = vld [vmem:[%s3145_s1 + $0x350] sm:$0xff]  ;;  %v148_v31 = vld [vmem:[%s3145_s1 + $0x348] sm:$0xff]  ;;  %v115_v34 = vld [vmem:[%s3145_s1 + $0x240] sm:$0xff] }
  0x22   :  { %1448 = vmatprep.subr.mxu1 %v91_v61  ;;  %1414 = vmatpush3.msra.mxu0 %v43_v62  ;;  %v147_v35 = vld [vmem:[%s3145_s1 + $0x340] sm:$0xff]  ;;  %v130_v36 = vld [vmem:[%s3145_s1 + $0x2b8] sm:$0xff]  ;;  %v129_v40 = vld [vmem:[%s3145_s1 + $0x2b0] sm:$0xff] }
  0x23   :  { %503 = vmatprep.mubr.f32.mxu0 %v19_v63  ;;  %1449 = vmatpush3.msra.mxu1 %v75_v0  ;;  %v162_v37 = vld [vmem:[%s3145_s1 + $0x3b8] sm:$0xff]  ;;  %v161_v41 = vld [vmem:[%s3145_s1 + $0x3b0] sm:$0xff]  ;;  %v128_v44 = vld [vmem:[%s3145_s1 + $0x2a8] sm:$0xff] }
  0x24   :  { %573 = vmatprep.mubr.f32.mxu1 %v21_v1  ;;  %504 = vmatmul.mubr.f32.vlgmr.msra.gmra.mxu0 %v18_v2  ;;  %v114_v38 = vld [vmem:[%s3145_s1 + $0x238] sm:$0xff]  ;;  %v113_v42 = vld [vmem:[%s3145_s1 + $0x230] sm:$0xff]  ;;  %v160_v45 = vld [vmem:[%s3145_s1 + $0x3a8] sm:$0xff] }
  0x25   :  { %574 = vmatmul.mubr.f32.vlgmr.msra.gmra.mxu1 %v20_v3  ;;  %1453 = vmatprep.subr.mxu0 %v138_v4  ;;  %v146_v39 = vld [vmem:[%s3145_s1 + $0x338] sm:$0xff]  ;;  %v145_v43 = vld [vmem:[%s3145_s1 + $0x330] sm:$0xff]  ;;  %v112_v46 = vld [vmem:[%s3145_s1 + $0x228] sm:$0xff] }
  0x26   :  { %1488 = vmatprep.subr.mxu1 %v170_v5  ;;  %1454 = vmatpush3.msra.mxu0 %v122_v6  ;;  %v144_v47 = vld [vmem:[%s3145_s1 + $0x328] sm:$0xff]  ;;  %v127_v48 = vld [vmem:[%s3145_s1 + $0x2a0] sm:$0xff]  ;;  %v126_v52 = vld [vmem:[%s3145_s1 + $0x298] sm:$0xff] }
  0x27   :  { %1489 = vmatpush3.msra.mxu1 %v154_v7  ;;  %1455 = vmatprep.subr.mxu0 %v137_v8  ;;  %v159_v49 = vld [vmem:[%s3145_s1 + $0x3a0] sm:$0xff]  ;;  %v158_v53 = vld [vmem:[%s3145_s1 + $0x398] sm:$0xff]  ;;  %v125_v56 = vld [vmem:[%s3145_s1 + $0x290] sm:$0xff] }
  0x28   :  { %1490 = vmatprep.subr.mxu1 %v169_v9  ;;  %1456 = vmatpush3.msra.mxu0 %v121_v10  ;;  %v111_v50 = vld [vmem:[%s3145_s1 + $0x220] sm:$0xff]  ;;  %v110_v54 = vld [vmem:[%s3145_s1 + $0x218] sm:$0xff]  ;;  %v157_v57 = vld [vmem:[%s3145_s1 + $0x390] sm:$0xff] }
  0x29   :  { %1491 = vmatpush3.msra.mxu1 %v153_v11  ;;  %1457 = vmatprep.subr.mxu0 %v136_v12  ;;  %v143_v51 = vld [vmem:[%s3145_s1 + $0x320] sm:$0xff]  ;;  %v142_v55 = vld [vmem:[%s3145_s1 + $0x318] sm:$0xff]  ;;  %v109_v58 = vld [vmem:[%s3145_s1 + $0x210] sm:$0xff] }
  0x2a   :  { %1492 = vmatprep.subr.mxu1 %v168_v13  ;;  %1458 = vmatpush3.msra.mxu0 %v120_v14  ;;  %v141_v59 = vld [vmem:[%s3145_s1 + $0x310] sm:$0xff]  ;;  %v124_v60 = vld [vmem:[%s3145_s1 + $0x288] sm:$0xff]  ;;  %v123_v0 = vld [vmem:[%s3145_s1 + $0x280] sm:$0xff] }
  0x2b   :  { %1493 = vmatpush3.msra.mxu1 %v152_v15  ;;  %1459 = vmatprep.subr.mxu0 %v135_v16  ;;  %v156_v61 = vld [vmem:[%s3145_s1 + $0x388] sm:$0xff]  ;;  %v107_v2 = vld [vmem:[%s3145_s1 + $0x200] sm:$0xff]  ;;  %v202_v5 = vld [vmem:[%s3145_s1 + $0x4f8] sm:$0xff] }
  0x2c   :  { %1494 = vmatprep.subr.mxu1 %v167_v17  ;;  %1460 = vmatpush3.msra.mxu0 %v119_v18  ;;  %v108_v62 = vld [vmem:[%s3145_s1 + $0x208] sm:$0xff]  ;;  %v155_v3 = vld [vmem:[%s3145_s1 + $0x380] sm:$0xff]  ;;  %v25_v7 = vld [vmem:[%s3144_s0 + $0x38] sm:$0xff] }
  0x2d   :  { %1495 = vmatpush3.msra.mxu1 %v151_v19  ;;  %1461 = vmatprep.subr.mxu0 %v134_v20  ;;  %v23_v63 = vld [vmem:[%s3144_s0 + $0x28] sm:$0xff]  ;;  %v22_v4 = vld [vmem:[%s3144_s0 + $0x20] sm:$0xff]  ;;  %v186_v8 = vld [vmem:[%s3145_s1 + $0x478] sm:$0xff] }
  0x2e   :  { %1496 = vmatprep.subr.mxu1 %v166_v21  ;;  %1462 = vmatpush3.msra.mxu0 %v118_v22  ;;  %v140_v1 = vld [vmem:[%s3145_s1 + $0x308] sm:$0xff]  ;;  %v139_v6 = vld [vmem:[%s3145_s1 + $0x300] sm:$0xff]  ;;  %v24_v9 = vld [vmem:[%s3144_s0 + $0x30] sm:$0xff] }
  0x2f   :  { %1497 = vmatpush3.msra.mxu1 %v150_v23  ;;  %1463 = vmatprep.subr.mxu0 %v133_v24  ;;  %v201_v10 = vld [vmem:[%s3145_s1 + $0x4f0] sm:$0xff]  ;;  %v234_v11 = vld [vmem:[%s3145_s1 + $0x5f8] sm:$0xff]  ;;  %v200_v14 = vld [vmem:[%s3145_s1 + $0x4e8] sm:$0xff] }
  0x30   :  { %1498 = vmatprep.subr.mxu1 %v165_v25  ;;  %1464 = vmatpush3.msra.mxu0 %v117_v26  ;;  %v185_v12 = vld [vmem:[%s3145_s1 + $0x470] sm:$0xff]  ;;  %v218_v13 = vld [vmem:[%s3145_s1 + $0x578] sm:$0xff]  ;;  %v184_v16 = vld [vmem:[%s3145_s1 + $0x468] sm:$0xff] }
  0x31   :  { %1499 = vmatpush3.msra.mxu1 %v149_v27  ;;  %1465 = vmatprep.subr.mxu0 %v132_v28  ;;  %v233_v15 = vld [vmem:[%s3145_s1 + $0x5f0] sm:$0xff]  ;;  %v199_v18 = vld [vmem:[%s3145_s1 + $0x4e0] sm:$0xff]  ;;  %v232_v19 = vld [vmem:[%s3145_s1 + $0x5e8] sm:$0xff] }
  0x32   :  { %1500 = vmatprep.subr.mxu1 %v164_v29  ;;  %1466 = vmatpush3.msra.mxu0 %v116_v30  ;;  %v217_v17 = vld [vmem:[%s3145_s1 + $0x570] sm:$0xff]  ;;  %v183_v20 = vld [vmem:[%s3145_s1 + $0x460] sm:$0xff]  ;;  %v216_v21 = vld [vmem:[%s3145_s1 + $0x568] sm:$0xff] }
  0x33   :  { %1501 = vmatpush3.msra.mxu1 %v148_v31  ;;  %1467 = vmatprep.subr.mxu0 %v131_v32  ;;  %v198_v22 = vld [vmem:[%s3145_s1 + $0x4d8] sm:$0xff]  ;;  %v231_v23 = vld [vmem:[%s3145_s1 + $0x5e0] sm:$0xff]  ;;  %v197_v26 = vld [vmem:[%s3145_s1 + $0x4d0] sm:$0xff] }
  0x34   :  { %1502 = vmatprep.subr.mxu1 %v163_v33  ;;  %1468 = vmatpush3.msra.mxu0 %v115_v34  ;;  %v182_v24 = vld [vmem:[%s3145_s1 + $0x458] sm:$0xff]  ;;  %v215_v25 = vld [vmem:[%s3145_s1 + $0x560] sm:$0xff]  ;;  %v181_v28 = vld [vmem:[%s3145_s1 + $0x450] sm:$0xff] }
  0x35   :  { %1503 = vmatpush3.msra.mxu1 %v147_v35  ;;  %1469 = vmatprep.subr.mxu0 %v130_v36  ;;  %v230_v27 = vld [vmem:[%s3145_s1 + $0x5d8] sm:$0xff]  ;;  %v196_v30 = vld [vmem:[%s3145_s1 + $0x4c8] sm:$0xff]  ;;  %v229_v31 = vld [vmem:[%s3145_s1 + $0x5d0] sm:$0xff] }
  0x36   :  { %1504 = vmatprep.subr.mxu1 %v162_v37  ;;  %1470 = vmatpush3.msra.mxu0 %v114_v38  ;;  %v214_v29 = vld [vmem:[%s3145_s1 + $0x558] sm:$0xff]  ;;  %v180_v32 = vld [vmem:[%s3145_s1 + $0x448] sm:$0xff]  ;;  %v213_v33 = vld [vmem:[%s3145_s1 + $0x550] sm:$0xff] }
  0x37   :  { %1505 = vmatpush3.msra.mxu1 %v146_v39  ;;  %1471 = vmatprep.subr.mxu0 %v129_v40  ;;  %v195_v34 = vld [vmem:[%s3145_s1 + $0x4c0] sm:$0xff]  ;;  %v228_v35 = vld [vmem:[%s3145_s1 + $0x5c8] sm:$0xff]  ;;  %v194_v38 = vld [vmem:[%s3145_s1 + $0x4b8] sm:$0xff] }
  0x38   :  { %1506 = vmatprep.subr.mxu1 %v161_v41  ;;  %1472 = vmatpush3.msra.mxu0 %v113_v42  ;;  %v179_v36 = vld [vmem:[%s3145_s1 + $0x440] sm:$0xff]  ;;  %v212_v37 = vld [vmem:[%s3145_s1 + $0x548] sm:$0xff]  ;;  %v178_v40 = vld [vmem:[%s3145_s1 + $0x438] sm:$0xff] }
  0x39   :  { %1507 = vmatpush3.msra.mxu1 %v145_v43  ;;  %1473 = vmatprep.subr.mxu0 %v128_v44  ;;  %v227_v39 = vld [vmem:[%s3145_s1 + $0x5c0] sm:$0xff]  ;;  %v193_v42 = vld [vmem:[%s3145_s1 + $0x4b0] sm:$0xff]  ;;  %v226_v43 = vld [vmem:[%s3145_s1 + $0x5b8] sm:$0xff] }
  0x3a   :  { %1508 = vmatprep.subr.mxu1 %v160_v45  ;;  %1474 = vmatpush3.msra.mxu0 %v112_v46  ;;  %v211_v41 = vld [vmem:[%s3145_s1 + $0x540] sm:$0xff]  ;;  %v177_v44 = vld [vmem:[%s3145_s1 + $0x430] sm:$0xff]  ;;  %v210_v45 = vld [vmem:[%s3145_s1 + $0x538] sm:$0xff] }
  0x3b   :  { %1509 = vmatpush3.msra.mxu1 %v144_v47  ;;  %1475 = vmatprep.subr.mxu0 %v127_v48  ;;  %v192_v46 = vld [vmem:[%s3145_s1 + $0x4a8] sm:$0xff]  ;;  %v225_v47 = vld [vmem:[%s3145_s1 + $0x5b0] sm:$0xff] }
  0x3c   :  { %1510 = vmatprep.subr.mxu1 %v159_v49  ;;  %1476 = vmatpush3.msra.mxu0 %v111_v50  ;;  %v176_v48 = vld [vmem:[%s3145_s1 + $0x428] sm:$0xff]  ;;  %v209_v49 = vld [vmem:[%s3145_s1 + $0x530] sm:$0xff]  ;;  %v191_v50 = vld [vmem:[%s3145_s1 + $0x4a0] sm:$0xff] }
  0x3d   :  { %1511 = vmatpush3.msra.mxu1 %v143_v51  ;;  %1477 = vmatprep.subr.mxu0 %v126_v52  ;;  %v224_v51 = vld [vmem:[%s3145_s1 + $0x5a8] sm:$0xff]  ;;  %v175_v52 = vld [vmem:[%s3145_s1 + $0x420] sm:$0xff] }
  0x3e   :  { %1512 = vmatprep.subr.mxu1 %v158_v53  ;;  %1478 = vmatpush3.msra.mxu0 %v110_v54  ;;  %v208_v53 = vld [vmem:[%s3145_s1 + $0x528] sm:$0xff]  ;;  %v190_v54 = vld [vmem:[%s3145_s1 + $0x498] sm:$0xff] }
  0x3f   :  { %1513 = vmatpush3.msra.mxu1 %v142_v55  ;;  %1479 = vmatprep.subr.mxu0 %v125_v56  ;;  %v223_v55 = vld [vmem:[%s3145_s1 + $0x5a0] sm:$0xff]  ;;  %v174_v56 = vld [vmem:[%s3145_s1 + $0x418] sm:$0xff] }
  0x40   :  { %1514 = vmatprep.subr.mxu1 %v157_v57  ;;  %1480 = vmatpush3.msra.mxu0 %v109_v58  ;;  %v207_v57 = vld [vmem:[%s3145_s1 + $0x520] sm:$0xff]  ;;  %v189_v58 = vld [vmem:[%s3145_s1 + $0x490] sm:$0xff] }
  0x41   :  { %1515 = vmatpush3.msra.mxu1 %v141_v59  ;;  %1481 = vmatprep.subr.mxu0 %v124_v60  ;;  %v222_v59 = vld [vmem:[%s3145_s1 + $0x598] sm:$0xff]  ;;  %v173_v60 = vld [vmem:[%s3145_s1 + $0x410] sm:$0xff] }
  0x42   :  { %1516 = vmatprep.subr.mxu1 %v156_v61  ;;  %1482 = vmatpush3.msra.mxu0 %v108_v62  ;;  %v206_v61 = vld [vmem:[%s3145_s1 + $0x518] sm:$0xff]  ;;  %v188_v62 = vld [vmem:[%s3145_s1 + $0x488] sm:$0xff] }
  0x43   :  { %643 = vmatprep.mubr.f32.mxu0 %v23_v63  ;;  %1483 = vmatprep.subr.mxu0 %v123_v0  ;;  %v221_v63 = vld [vmem:[%s3145_s1 + $0x590] sm:$0xff]  ;;  %v172_v0 = vld [vmem:[%s3145_s1 + $0x408] sm:$0xff] }
  0x44   :  { %1517 = vmatpush3.msra.mxu1 %v140_v1  ;;  %1484 = vmatpush3.msra.mxu0 %v107_v2  ;;  %v205_v1 = vld [vmem:[%s3145_s1 + $0x510] sm:$0xff]  ;;  %v187_v2 = vld [vmem:[%s3145_s1 + $0x480] sm:$0xff] }
  0x45   :  { %1518 = vmatprep.subr.mxu1 %v155_v3  ;;  %644 = vmatmul.mubr.f32.vlgmr.msra.gmra.mxu0 %v22_v4  ;;  %v220_v3 = vld [vmem:[%s3145_s1 + $0x588] sm:$0xff]  ;;  %v171_v4 = vld [vmem:[%s3145_s1 + $0x400] sm:$0xff] }
  0x46   :  { %1523 = vmatprep.subr.mxu0 %v202_v5  ;;  %1519 = vmatpush3.msra.mxu1 %v139_v6  ;;  %v27_v5 = vld [vmem:[%s3144_s0 + $0x48] sm:$0xff] }
  0x47   :  { %713 = vmatprep.mubr.f32.mxu1 %v25_v7  ;;  %1524 = vmatpush3.msra.mxu0 %v186_v8  ;;  %v204_v6 = vld [vmem:[%s3145_s1 + $0x508] sm:$0xff]  ;;  %v26_v7 = vld [vmem:[%s3144_s0 + $0x40] sm:$0xff] }
  0x48   :  { %714 = vmatmul.mubr.f32.vlgmr.msra.gmra.mxu1 %v24_v9  ;;  %1525 = vmatprep.subr.mxu0 %v201_v10  ;;  %v219_v8 = vld [vmem:[%s3145_s1 + $0x580] sm:$0xff]  ;;  %v266_v9 = vld [vmem:[%s3145_s1 + $0x6f8] sm:$0xff] }
  0x49   :  { %1558 = vmatprep.subr.mxu1 %v234_v11  ;;  %1526 = vmatpush3.msra.mxu0 %v185_v12  ;;  %v203_v10 = vld [vmem:[%s3145_s1 + $0x500] sm:$0xff]  ;;  %v29_v11 = vld [vmem:[%s3144_s0 + $0x58] sm:$0xff] }
  0x4a   :  { %1559 = vmatpush3.msra.mxu1 %v218_v13  ;;  %1527 = vmatprep.subr.mxu0 %v200_v14  ;;  %v250_v12 = vld [vmem:[%s3145_s1 + $0x678] sm:$0xff]  ;;  %v28_v13 = vld [vmem:[%s3144_s0 + $0x50] sm:$0xff] }
  0x4b   :  { %1560 = vmatprep.subr.mxu1 %v233_v15  ;;  %1528 = vmatpush3.msra.mxu0 %v184_v16  ;;  %v265_v14 = vld [vmem:[%s3145_s1 + $0x6f0] sm:$0xff]  ;;  %v298_v15 = vld [vmem:[%s3145_s1 + $0x7f8] sm:$0xff] }
  0x4c   :  { %1561 = vmatpush3.msra.mxu1 %v217_v17  ;;  %1529 = vmatprep.subr.mxu0 %v199_v18  ;;  %v249_v16 = vld [vmem:[%s3145_s1 + $0x670] sm:$0xff]  ;;  %v282_v17 = vld [vmem:[%s3145_s1 + $0x778] sm:$0xff]  ;;  %v264_v18 = vld [vmem:[%s3145_s1 + $0x6e8] sm:$0xff] }
  0x4d   :  { %1562 = vmatprep.subr.mxu1 %v232_v19  ;;  %1530 = vmatpush3.msra.mxu0 %v183_v20  ;;  %v297_v19 = vld [vmem:[%s3145_s1 + $0x7f0] sm:$0xff]  ;;  %v248_v20 = vld [vmem:[%s3145_s1 + $0x668] sm:$0xff] }
  0x4e   :  { %1563 = vmatpush3.msra.mxu1 %v216_v21  ;;  %1531 = vmatprep.subr.mxu0 %v198_v22  ;;  %v281_v21 = vld [vmem:[%s3145_s1 + $0x770] sm:$0xff]  ;;  %v263_v22 = vld [vmem:[%s3145_s1 + $0x6e0] sm:$0xff] }
  0x4f   :  { %1564 = vmatprep.subr.mxu1 %v231_v23  ;;  %1532 = vmatpush3.msra.mxu0 %v182_v24  ;;  %v296_v23 = vld [vmem:[%s3145_s1 + $0x7e8] sm:$0xff]  ;;  %v247_v24 = vld [vmem:[%s3145_s1 + $0x660] sm:$0xff] }
  0x50   :  { %1565 = vmatpush3.msra.mxu1 %v215_v25  ;;  %1533 = vmatprep.subr.mxu0 %v197_v26  ;;  %v280_v25 = vld [vmem:[%s3145_s1 + $0x768] sm:$0xff]  ;;  %v262_v26 = vld [vmem:[%s3145_s1 + $0x6d8] sm:$0xff] }
  0x51   :  { %1566 = vmatprep.subr.mxu1 %v230_v27  ;;  %1534 = vmatpush3.msra.mxu0 %v181_v28  ;;  %v295_v27 = vld [vmem:[%s3145_s1 + $0x7e0] sm:$0xff]  ;;  %v246_v28 = vld [vmem:[%s3145_s1 + $0x658] sm:$0xff] }
  0x52   :  { %1567 = vmatpush3.msra.mxu1 %v214_v29  ;;  %1535 = vmatprep.subr.mxu0 %v196_v30  ;;  %v279_v29 = vld [vmem:[%s3145_s1 + $0x760] sm:$0xff]  ;;  %v261_v30 = vld [vmem:[%s3145_s1 + $0x6d0] sm:$0xff] }
  0x53   :  { %1568 = vmatprep.subr.mxu1 %v229_v31  ;;  %1536 = vmatpush3.msra.mxu0 %v180_v32  ;;  %v294_v31 = vld [vmem:[%s3145_s1 + $0x7d8] sm:$0xff]  ;;  %v245_v32 = vld [vmem:[%s3145_s1 + $0x650] sm:$0xff] }
  0x54   :  { %1569 = vmatpush3.msra.mxu1 %v213_v33  ;;  %1537 = vmatprep.subr.mxu0 %v195_v34  ;;  %v278_v33 = vld [vmem:[%s3145_s1 + $0x758] sm:$0xff]  ;;  %v260_v34 = vld [vmem:[%s3145_s1 + $0x6c8] sm:$0xff] }
  0x55   :  { %1570 = vmatprep.subr.mxu1 %v228_v35  ;;  %1538 = vmatpush3.msra.mxu0 %v179_v36  ;;  %v293_v35 = vld [vmem:[%s3145_s1 + $0x7d0] sm:$0xff]  ;;  %v244_v36 = vld [vmem:[%s3145_s1 + $0x648] sm:$0xff] }
  0x56   :  { %1571 = vmatpush3.msra.mxu1 %v212_v37  ;;  %1539 = vmatprep.subr.mxu0 %v194_v38  ;;  %v277_v37 = vld [vmem:[%s3145_s1 + $0x750] sm:$0xff]  ;;  %v259_v38 = vld [vmem:[%s3145_s1 + $0x6c0] sm:$0xff] }
  0x57   :  { %1572 = vmatprep.subr.mxu1 %v227_v39  ;;  %1540 = vmatpush3.msra.mxu0 %v178_v40  ;;  %v292_v39 = vld [vmem:[%s3145_s1 + $0x7c8] sm:$0xff]  ;;  %v243_v40 = vld [vmem:[%s3145_s1 + $0x640] sm:$0xff] }
  0x58   :  { %1573 = vmatpush3.msra.mxu1 %v211_v41  ;;  %1541 = vmatprep.subr.mxu0 %v193_v42  ;;  %v276_v41 = vld [vmem:[%s3145_s1 + $0x748] sm:$0xff]  ;;  %v258_v42 = vld [vmem:[%s3145_s1 + $0x6b8] sm:$0xff] }
  0x59   :  { %1574 = vmatprep.subr.mxu1 %v226_v43  ;;  %1542 = vmatpush3.msra.mxu0 %v177_v44  ;;  %v291_v43 = vld [vmem:[%s3145_s1 + $0x7c0] sm:$0xff]  ;;  %v242_v44 = vld [vmem:[%s3145_s1 + $0x638] sm:$0xff] }
  0x5a   :  { %1575 = vmatpush3.msra.mxu1 %v210_v45  ;;  %1543 = vmatprep.subr.mxu0 %v192_v46  ;;  %v275_v45 = vld [vmem:[%s3145_s1 + $0x740] sm:$0xff]  ;;  %v257_v46 = vld [vmem:[%s3145_s1 + $0x6b0] sm:$0xff] }
  0x5b   :  { %1576 = vmatprep.subr.mxu1 %v225_v47  ;;  %1544 = vmatpush3.msra.mxu0 %v176_v48  ;;  %v290_v47 = vld [vmem:[%s3145_s1 + $0x7b8] sm:$0xff]  ;;  %v241_v48 = vld [vmem:[%s3145_s1 + $0x630] sm:$0xff] }
  0x5c   :  { %1577 = vmatpush3.msra.mxu1 %v209_v49  ;;  %1545 = vmatprep.subr.mxu0 %v191_v50  ;;  %v274_v49 = vld [vmem:[%s3145_s1 + $0x738] sm:$0xff]  ;;  %v256_v50 = vld [vmem:[%s3145_s1 + $0x6a8] sm:$0xff] }
  0x5d   :  { %1578 = vmatprep.subr.mxu1 %v224_v51  ;;  %1546 = vmatpush3.msra.mxu0 %v175_v52  ;;  %v289_v51 = vld [vmem:[%s3145_s1 + $0x7b0] sm:$0xff]  ;;  %v240_v52 = vld [vmem:[%s3145_s1 + $0x628] sm:$0xff] }
  0x5e   :  { %1579 = vmatpush3.msra.mxu1 %v208_v53  ;;  %1547 = vmatprep.subr.mxu0 %v190_v54  ;;  %v273_v53 = vld [vmem:[%s3145_s1 + $0x730] sm:$0xff]  ;;  %v255_v54 = vld [vmem:[%s3145_s1 + $0x6a0] sm:$0xff] }
  0x5f   :  { %1580 = vmatprep.subr.mxu1 %v223_v55  ;;  %1548 = vmatpush3.msra.mxu0 %v174_v56  ;;  %v288_v55 = vld [vmem:[%s3145_s1 + $0x7a8] sm:$0xff]  ;;  %v239_v56 = vld [vmem:[%s3145_s1 + $0x620] sm:$0xff] }
  0x60   :  { %1581 = vmatpush3.msra.mxu1 %v207_v57  ;;  %1549 = vmatprep.subr.mxu0 %v189_v58  ;;  %v272_v57 = vld [vmem:[%s3145_s1 + $0x728] sm:$0xff]  ;;  %v254_v58 = vld [vmem:[%s3145_s1 + $0x698] sm:$0xff] }
  0x61   :  { %1582 = vmatprep.subr.mxu1 %v222_v59  ;;  %1550 = vmatpush3.msra.mxu0 %v173_v60  ;;  %v287_v59 = vld [vmem:[%s3145_s1 + $0x7a0] sm:$0xff]  ;;  %v238_v60 = vld [vmem:[%s3145_s1 + $0x618] sm:$0xff] }
  0x62   :  { %1583 = vmatpush3.msra.mxu1 %v206_v61  ;;  %1551 = vmatprep.subr.mxu0 %v188_v62  ;;  %v271_v61 = vld [vmem:[%s3145_s1 + $0x720] sm:$0xff]  ;;  %v253_v62 = vld [vmem:[%s3145_s1 + $0x690] sm:$0xff] }
  0x63   :  { %1584 = vmatprep.subr.mxu1 %v221_v63  ;;  %1552 = vmatpush3.msra.mxu0 %v172_v0  ;;  %v286_v63 = vld [vmem:[%s3145_s1 + $0x798] sm:$0xff]  ;;  %v237_v0 = vld [vmem:[%s3145_s1 + $0x610] sm:$0xff] }
  0x64   :  { %1585 = vmatpush3.msra.mxu1 %v205_v1  ;;  %1553 = vmatprep.subr.mxu0 %v187_v2  ;;  %v270_v1 = vld [vmem:[%s3145_s1 + $0x718] sm:$0xff]  ;;  %v252_v2 = vld [vmem:[%s3145_s1 + $0x688] sm:$0xff] }
  0x65   :  { %1586 = vmatprep.subr.mxu1 %v220_v3  ;;  %1554 = vmatpush3.msra.mxu0 %v171_v4  ;;  %v285_v3 = vld [vmem:[%s3145_s1 + $0x790] sm:$0xff]  ;;  %v236_v4 = vld [vmem:[%s3145_s1 + $0x608] sm:$0xff] }
  0x66   :  { %783 = vmatprep.mubr.f32.mxu0 %v27_v5  ;;  %1587 = vmatpush3.msra.mxu1 %v204_v6  ;;  %v269_v5 = vld [vmem:[%s3145_s1 + $0x710] sm:$0xff]  ;;  %v251_v6 = vld [vmem:[%s3145_s1 + $0x680] sm:$0xff] }
  0x67   :  { %784 = vmatmul.mubr.f32.vlgmr.msra.gmra.mxu0 %v26_v7  ;;  %1588 = vmatprep.subr.mxu1 %v219_v8  ;;  %v284_v7 = vld [vmem:[%s3145_s1 + $0x788] sm:$0xff]  ;;  %v235_v8 = vld [vmem:[%s3145_s1 + $0x600] sm:$0xff] }
  0x68   :  { %1593 = vmatprep.subr.mxu0 %v266_v9  ;;  %1589 = vmatpush3.msra.mxu1 %v203_v10  ;;  %v31_v9 = vld [vmem:[%s3144_s0 + $0x68] sm:$0xff] }
  0x69   :  { %853 = vmatprep.mubr.f32.mxu1 %v29_v11  ;;  %1594 = vmatpush3.msra.mxu0 %v250_v12  ;;  %v268_v10 = vld [vmem:[%s3145_s1 + $0x708] sm:$0xff]  ;;  %v30_v11 = vld [vmem:[%s3144_s0 + $0x60] sm:$0xff] }
  0x6a   :  { %854 = vmatmul.mubr.f32.vlgmr.msra.gmra.mxu1 %v28_v13  ;;  %1595 = vmatprep.subr.mxu0 %v265_v14  ;;  %v283_v12 = vld [vmem:[%s3145_s1 + $0x780] sm:$0xff]  ;;  %v330_v13 = vld [vmem:[%s3145_s1 + $0x8f8] sm:$0xff] }
  0x6b   :  { %1628 = vmatprep.subr.mxu1 %v298_v15  ;;  %1596 = vmatpush3.msra.mxu0 %v249_v16  ;;  %v267_v14 = vld [vmem:[%s3145_s1 + $0x700] sm:$0xff]  ;;  %v33_v15 = vld [vmem:[%s3144_s0 + $0x78] sm:$0xff] }
  0x6c   :  { %1629 = vmatpush3.msra.mxu1 %v282_v17  ;;  %1597 = vmatprep.subr.mxu0 %v264_v18  ;;  %v314_v16 = vld [vmem:[%s3145_s1 + $0x878] sm:$0xff]  ;;  %v32_v17 = vld [vmem:[%s3144_s0 + $0x70] sm:$0xff] }
  0x6d   :  { %1630 = vmatprep.subr.mxu1 %v297_v19  ;;  %1598 = vmatpush3.msra.mxu0 %v248_v20  ;;  %v329_v18 = vld [vmem:[%s3145_s1 + $0x8f0] sm:$0xff]  ;;  %v362_v19 = vld [vmem:[%s3145_s1 + $0x9f8] sm:$0xff] }
  0x6e   :  { %1631 = vmatpush3.msra.mxu1 %v281_v21  ;;  %1599 = vmatprep.subr.mxu0 %v263_v22  ;;  %v313_v20 = vld [vmem:[%s3145_s1 + $0x870] sm:$0xff]  ;;  %v346_v21 = vld [vmem:[%s3145_s1 + $0x978] sm:$0xff]  ;;  %v328_v22 = vld [vmem:[%s3145_s1 + $0x8e8] sm:$0xff] }
  0x6f   :  { %1632 = vmatprep.subr.mxu1 %v296_v23  ;;  %1600 = vmatpush3.msra.mxu0 %v247_v24  ;;  %v361_v23 = vld [vmem:[%s3145_s1 + $0x9f0] sm:$0xff]  ;;  %v312_v24 = vld [vmem:[%s3145_s1 + $0x868] sm:$0xff] }
  0x70   :  { %1633 = vmatpush3.msra.mxu1 %v280_v25  ;;  %1601 = vmatprep.subr.mxu0 %v262_v26  ;;  %v345_v25 = vld [vmem:[%s3145_s1 + $0x970] sm:$0xff]  ;;  %v327_v26 = vld [vmem:[%s3145_s1 + $0x8e0] sm:$0xff] }
  0x71   :  { %1634 = vmatprep.subr.mxu1 %v295_v27  ;;  %1602 = vmatpush3.msra.mxu0 %v246_v28  ;;  %v360_v27 = vld [vmem:[%s3145_s1 + $0x9e8] sm:$0xff] }
  0x72   :  { %1635 = vmatpush3.msra.mxu1 %v279_v29  ;;  %1603 = vmatprep.subr.mxu0 %v261_v30 }
  0x73   :  { %1636 = vmatprep.subr.mxu1 %v294_v31  ;;  %1604 = vmatpush3.msra.mxu0 %v245_v32 }
  0x74   :  { %1637 = vmatpush3.msra.mxu1 %v278_v33  ;;  %1605 = vmatprep.subr.mxu0 %v260_v34 }
  0x75   :  { %1638 = vmatprep.subr.mxu1 %v293_v35  ;;  %1606 = vmatpush3.msra.mxu0 %v244_v36 }
  0x76   :  { %1639 = vmatpush3.msra.mxu1 %v277_v37  ;;  %1607 = vmatprep.subr.mxu0 %v259_v38 }
  0x77   :  { %1640 = vmatprep.subr.mxu1 %v292_v39  ;;  %1608 = vmatpush3.msra.mxu0 %v243_v40 }
  0x78   :  { %1641 = vmatpush3.msra.mxu1 %v276_v41  ;;  %1609 = vmatprep.subr.mxu0 %v258_v42 }
  0x79   :  { %1642 = vmatprep.subr.mxu1 %v291_v43  ;;  %1610 = vmatpush3.msra.mxu0 %v242_v44 }
  0x7a   :  { %1643 = vmatpush3.msra.mxu1 %v275_v45  ;;  %1611 = vmatprep.subr.mxu0 %v257_v46 }
  0x7b   :  { %1644 = vmatprep.subr.mxu1 %v290_v47  ;;  %1612 = vmatpush3.msra.mxu0 %v241_v48 }
  0x7c   :  { %1645 = vmatpush3.msra.mxu1 %v274_v49  ;;  %1613 = vmatprep.subr.mxu0 %v256_v50 }
  0x7d   :  { %1646 = vmatprep.subr.mxu1 %v289_v51  ;;  %1614 = vmatpush3.msra.mxu0 %v240_v52 }
  0x7e   :  { %1647 = vmatpush3.msra.mxu1 %v273_v53  ;;  %1615 = vmatprep.subr.mxu0 %v255_v54 }
  0x7f   :  { %1648 = vmatprep.subr.mxu1 %v288_v55  ;;  %1616 = vmatpush3.msra.mxu0 %v239_v56 }
  0x80   :  { %1649 = vmatpush3.msra.mxu1 %v272_v57  ;;  %1617 = vmatprep.subr.mxu0 %v254_v58 }
  0x81   :  { %1650 = vmatprep.subr.mxu1 %v287_v59  ;;  %1618 = vmatpush3.msra.mxu0 %v238_v60 }
  0x82   :  { %1651 = vmatpush3.msra.mxu1 %v271_v61  ;;  %1619 = vmatprep.subr.mxu0 %v253_v62 }
  0x83   :  { %1652 = vmatprep.subr.mxu1 %v286_v63  ;;  %1620 = vmatpush3.msra.mxu0 %v237_v0 }
  0x84   :  { %1653 = vmatpush3.msra.mxu1 %v270_v1  ;;  %1621 = vmatprep.subr.mxu0 %v252_v2 }
  0x85   :  { %1654 = vmatprep.subr.mxu1 %v285_v3  ;;  %1622 = vmatpush3.msra.mxu0 %v236_v4 }
  0x86   :  { %1655 = vmatpush3.msra.mxu1 %v269_v5  ;;  %1623 = vmatprep.subr.mxu0 %v251_v6 }
  0x87   :  { %1656 = vmatprep.subr.mxu1 %v284_v7  ;;  %1624 = vmatpush3.msra.mxu0 %v235_v8 }
  0x88   :  { %923 = vmatprep.mubr.f32.mxu0 %v31_v9  ;;  %1657 = vmatpush3.msra.mxu1 %v268_v10 }
  0x89   :  { %924 = vmatmul.mubr.f32.vlgmr.msra.gmra.mxu0 %v30_v11  ;;  %1658 = vmatprep.subr.mxu1 %v283_v12 }
  0x8a   :  { %1663 = vmatprep.subr.mxu0 %v330_v13  ;;  %1659 = vmatpush3.msra.mxu1 %v267_v14 }
  0x8b   :  { %993 = vmatprep.mubr.f32.mxu1 %v33_v15  ;;  %1664 = vmatpush3.msra.mxu0 %v314_v16 }
  0x8c   :  { %994 = vmatmul.mubr.f32.vlgmr.msra.gmra.mxu1 %v32_v17  ;;  %1665 = vmatprep.subr.mxu0 %v329_v18 }
  0x8d   :  { %1698 = vmatprep.subr.mxu1 %v362_v19  ;;  %1666 = vmatpush3.msra.mxu0 %v313_v20 }
  0x8e   :  { %1699 = vmatpush3.msra.mxu1 %v346_v21 }
  0x8f   :  { %9 = vsyncpa [#allocation3], 0  ;;  %1667 = vmatprep.subr.mxu0 %v328_v22  ;;  %1700 = vmatprep.subr.mxu1 %v361_v23  ;;  %v311_v28 = vld [vmem:[%s3145_s1 + $0x860] sm:$0xff]  ;;  %v344_v29 = vld [vmem:[%s3145_s1 + $0x968] sm:$0xff]  ;;  %vm1857_vm0 = vmmov 0   ;;  %vm435_vm1 = vcmask 523264  }
  0x90   :  { %1668 = vmatpush3.msra.mxu0 %v312_v24  ;;  %1701 = vmatpush3.msra.mxu1 %v345_v25  ;;  %v326_v30 = vld [vmem:[%s3145_s1 + $0x8d8] sm:$0xff]  ;;  %v359_v31 = vld [vmem:[%s3145_s1 + $0x9e0] sm:$0xff]  ;;  %v325_v34 = vld [vmem:[%s3145_s1 + $0x8d0] sm:$0xff]  ;;  %s1858_s19 = smov [#allocation2]  }
  0x91   :  { %1669 = vmatprep.subr.mxu0 %v327_v26  ;;  %1702 = vmatprep.subr.mxu1 %v360_v27  ;;  %v310_v32 = vld [vmem:[%s3145_s1 + $0x858] sm:$0xff]  ;;  %v343_v33 = vld [vmem:[%s3145_s1 + $0x960] sm:$0xff]  ;;  %v309_v36 = vld [vmem:[%s3145_s1 + $0x850] sm:$0xff]  ;;  %s1372_s20 = sshll.u32 %s1858_s19, 4  ;;  %s1373_s20 = int_to_ptr.vmem [resolvable:$true] %s1372_s20 }
  0x92   :  { %1670 = vmatpush3.msra.mxu0 %v311_v28  ;;  %1703 = vmatpush3.msra.mxu1 %v344_v29  ;;  %v358_v35 = vld [vmem:[%s3145_s1 + $0x9d8] sm:$0xff]  ;;  %v324_v38 = vld [vmem:[%s3145_s1 + $0x8c8] sm:$0xff]  ;;  %v357_v39 = vld [vmem:[%s3145_s1 + $0x9d0] sm:$0xff]  ;;  %s1834_s21 = scalar_lea.vmem %s1373_s20, 128  ;;  %p1839_p1 = scmp.lt.s32.totalorder %s1373_s20, %s1373_s20 }
  0x93   :  { %1671 = vmatprep.subr.mxu0 %v326_v30  ;;  %1704 = vmatprep.subr.mxu1 %v359_v31  ;;  %v342_v37 = vld [vmem:[%s3145_s1 + $0x958] sm:$0xff]  ;;  %v308_v40 = vld [vmem:[%s3145_s1 + $0x848] sm:$0xff]  ;;  %v341_v41 = vld [vmem:[%s3145_s1 + $0x950] sm:$0xff]  ;;  %p1835_p0 = scmp.ne.s32.totalorder %s1373_s20, %s1834_s21  ;;  %p1840_p2 = scmp.lt.s32.totalorder %s1834_s21, %s1834_s21 }
  0x94   :  { %1672 = vmatpush3.msra.mxu0 %v310_v32  ;;  %1705 = vmatpush3.msra.mxu1 %v343_v33  ;;  %v323_v42 = vld [vmem:[%s3145_s1 + $0x8c0] sm:$0xff]  ;;  %v356_v43 = vld [vmem:[%s3145_s1 + $0x9c8] sm:$0xff]  ;;  %v322_v46 = vld [vmem:[%s3145_s1 + $0x8b8] sm:$0xff] }
  0x95   :  { %1673 = vmatprep.subr.mxu0 %v325_v34  ;;  %1706 = vmatprep.subr.mxu1 %v358_v35  ;;  %v307_v44 = vld [vmem:[%s3145_s1 + $0x840] sm:$0xff]  ;;  %v340_v45 = vld [vmem:[%s3145_s1 + $0x948] sm:$0xff]  ;;  %v306_v48 = vld [vmem:[%s3145_s1 + $0x838] sm:$0xff]  ;;  %p1841_p3 = por %p1840_p2, %p1839_p1 }
  0x96   :  { %1674 = vmatpush3.msra.mxu0 %v309_v36  ;;  %1707 = vmatpush3.msra.mxu1 %v342_v37  ;;  %v355_v47 = vld [vmem:[%s3145_s1 + $0x9c0] sm:$0xff]  ;;  %v321_v50 = vld [vmem:[%s3145_s1 + $0x8b0] sm:$0xff]  ;;  %v354_v51 = vld [vmem:[%s3145_s1 + $0x9b8] sm:$0xff] }
  0x97   :  { %1675 = vmatprep.subr.mxu0 %v324_v38  ;;  %1708 = vmatprep.subr.mxu1 %v357_v39  ;;  %v339_v49 = vld [vmem:[%s3145_s1 + $0x940] sm:$0xff]  ;;  %v305_v52 = vld [vmem:[%s3145_s1 + $0x830] sm:$0xff]  ;;  %v338_v53 = vld [vmem:[%s3145_s1 + $0x938] sm:$0xff]  ;;  %p1842_p4 = pnand %p1841_p3, %p1835_p0 }
  0x98   :  { %1676 = vmatpush3.msra.mxu0 %v308_v40  ;;  %1709 = vmatpush3.msra.mxu1 %v341_v41  ;;  %v320_v54 = vld [vmem:[%s3145_s1 + $0x8a8] sm:$0xff]  ;;  %v353_v55 = vld [vmem:[%s3145_s1 + $0x9b0] sm:$0xff]  ;;  %v319_v58 = vld [vmem:[%s3145_s1 + $0x8a0] sm:$0xff] }
  0x99   :  { %1677 = vmatprep.subr.mxu0 %v323_v42  ;;  %1710 = vmatprep.subr.mxu1 %v356_v43  ;;  %v304_v56 = vld [vmem:[%s3145_s1 + $0x828] sm:$0xff]  ;;  %v337_v57 = vld [vmem:[%s3145_s1 + $0x930] sm:$0xff]  ;;  %v303_v60 = vld [vmem:[%s3145_s1 + $0x820] sm:$0xff] }
  0x9a   :  { %1678 = vmatpush3.msra.mxu0 %v307_v44  ;;  %1711 = vmatpush3.msra.mxu1 %v340_v45  ;;  %v352_v59 = vld [vmem:[%s3145_s1 + $0x9a8] sm:$0xff]  ;;  %v318_v62 = vld [vmem:[%s3145_s1 + $0x898] sm:$0xff]  ;;  %v351_v63 = vld [vmem:[%s3145_s1 + $0x9a0] sm:$0xff] }
  0x9b   :  { %1679 = vmatprep.subr.mxu0 %v322_v46  ;;  %1712 = vmatprep.subr.mxu1 %v355_v47  ;;  %v336_v61 = vld [vmem:[%s3145_s1 + $0x928] sm:$0xff]  ;;  %v302_v0 = vld [vmem:[%s3145_s1 + $0x818] sm:$0xff]  ;;  %v335_v1 = vld [vmem:[%s3145_s1 + $0x920] sm:$0xff] }
  0x9c   :  { %1680 = vmatpush3.msra.mxu0 %v306_v48  ;;  %1713 = vmatpush3.msra.mxu1 %v339_v49  ;;  %v317_v2 = vld [vmem:[%s3145_s1 + $0x890] sm:$0xff]  ;;  %v350_v3 = vld [vmem:[%s3145_s1 + $0x998] sm:$0xff]  ;;  %v316_v6 = vld [vmem:[%s3145_s1 + $0x888] sm:$0xff] }
  0x9d   :  { %1681 = vmatprep.subr.mxu0 %v321_v50  ;;  %1714 = vmatprep.subr.mxu1 %v354_v51  ;;  %v301_v4 = vld [vmem:[%s3145_s1 + $0x810] sm:$0xff]  ;;  %v334_v5 = vld [vmem:[%s3145_s1 + $0x918] sm:$0xff]  ;;  %v300_v8 = vld [vmem:[%s3145_s1 + $0x808] sm:$0xff] }
  0x9e   :  { %1682 = vmatpush3.msra.mxu0 %v305_v52  ;;  %1715 = vmatpush3.msra.mxu1 %v338_v53  ;;  %v349_v7 = vld [vmem:[%s3145_s1 + $0x990] sm:$0xff]  ;;  %v315_v10 = vld [vmem:[%s3145_s1 + $0x880] sm:$0xff]  ;;  %v348_v11 = vld [vmem:[%s3145_s1 + $0x988] sm:$0xff] }
  0x9f   :  { %1683 = vmatprep.subr.mxu0 %v320_v54  ;;  %1716 = vmatprep.subr.mxu1 %v353_v55  ;;  %v333_v9 = vld [vmem:[%s3145_s1 + $0x910] sm:$0xff]  ;;  %v299_v12 = vld [vmem:[%s3145_s1 + $0x800] sm:$0xff]  ;;  %v35_v13 = vld [vmem:[%s3144_s0 + $0x88] sm:$0xff] }
  0xa0   :  { %1684 = vmatpush3.msra.mxu0 %v304_v56  ;;  %1717 = vmatpush3.msra.mxu1 %v337_v57  ;;  %v332_v14 = vld [vmem:[%s3145_s1 + $0x908] sm:$0xff]  ;;  %v34_v15 = vld [vmem:[%s3144_s0 + $0x80] sm:$0xff]  ;;  %v394_v17 = vld [vmem:[%s3145_s1 + $0xaf8] sm:$0xff] }
  0xa1   :  { %1685 = vmatprep.subr.mxu0 %v319_v58  ;;  %1718 = vmatprep.subr.mxu1 %v352_v59  ;;  %v347_v16 = vld [vmem:[%s3145_s1 + $0x980] sm:$0xff]  ;;  %v37_v19 = vld [vmem:[%s3144_s0 + $0x98] sm:$0xff]  ;;  %v36_v21 = vld [vmem:[%s3144_s0 + $0x90] sm:$0xff] }
  0xa2   :  { %1686 = vmatpush3.msra.mxu0 %v303_v60  ;;  %1719 = vmatpush3.msra.mxu1 %v336_v61  ;;  %v331_v18 = vld [vmem:[%s3145_s1 + $0x900] sm:$0xff]  ;;  %v378_v20 = vld [vmem:[%s3145_s1 + $0xa78] sm:$0xff]  ;;  %v393_v22 = vld [vmem:[%s3145_s1 + $0xaf0] sm:$0xff] }
  0xa3   :  { %1687 = vmatprep.subr.mxu0 %v318_v62  ;;  %1720 = vmatprep.subr.mxu1 %v351_v63  ;;  %v426_v23 = vld [vmem:[%s3145_s1 + $0xbf8] sm:$0xff]  ;;  %v377_v24 = vld [vmem:[%s3145_s1 + $0xa70] sm:$0xff]  ;;  %v392_v26 = vld [vmem:[%s3145_s1 + $0xae8] sm:$0xff] }
  0xa4   :  { %1688 = vmatpush3.msra.mxu0 %v302_v0  ;;  %1721 = vmatpush3.msra.mxu1 %v335_v1  ;;  %v410_v25 = vld [vmem:[%s3145_s1 + $0xb78] sm:$0xff]  ;;  %v425_v27 = vld [vmem:[%s3145_s1 + $0xbf0] sm:$0xff]  ;;  %v376_v28 = vld [vmem:[%s3145_s1 + $0xa68] sm:$0xff] }
  0xa5   :  { %1689 = vmatprep.subr.mxu0 %v317_v2  ;;  %1722 = vmatprep.subr.mxu1 %v350_v3  ;;  %v409_v29 = vld [vmem:[%s3145_s1 + $0xb70] sm:$0xff]  ;;  %v391_v30 = vld [vmem:[%s3145_s1 + $0xae0] sm:$0xff]  ;;  %v424_v31 = vld [vmem:[%s3145_s1 + $0xbe8] sm:$0xff] }
  0xa6   :  { %1690 = vmatpush3.msra.mxu0 %v301_v4  ;;  %1723 = vmatpush3.msra.mxu1 %v334_v5  ;;  %v375_v32 = vld [vmem:[%s3145_s1 + $0xa60] sm:$0xff]  ;;  %v408_v33 = vld [vmem:[%s3145_s1 + $0xb68] sm:$0xff]  ;;  %v390_v34 = vld [vmem:[%s3145_s1 + $0xad8] sm:$0xff] }
  0xa7   :  { %1691 = vmatprep.subr.mxu0 %v316_v6  ;;  %1724 = vmatprep.subr.mxu1 %v349_v7  ;;  %v423_v35 = vld [vmem:[%s3145_s1 + $0xbe0] sm:$0xff]  ;;  %v374_v36 = vld [vmem:[%s3145_s1 + $0xa58] sm:$0xff]  ;;  %v389_v38 = vld [vmem:[%s3145_s1 + $0xad0] sm:$0xff] }
  0xa8   :  { %1692 = vmatpush3.msra.mxu0 %v300_v8  ;;  %1725 = vmatpush3.msra.mxu1 %v333_v9  ;;  %v407_v37 = vld [vmem:[%s3145_s1 + $0xb60] sm:$0xff]  ;;  %v422_v39 = vld [vmem:[%s3145_s1 + $0xbd8] sm:$0xff]  ;;  %v373_v40 = vld [vmem:[%s3145_s1 + $0xa50] sm:$0xff] }
  0xa9   :  { %1693 = vmatprep.subr.mxu0 %v315_v10  ;;  %1726 = vmatprep.subr.mxu1 %v348_v11  ;;  %v406_v41 = vld [vmem:[%s3145_s1 + $0xb58] sm:$0xff]  ;;  %v388_v42 = vld [vmem:[%s3145_s1 + $0xac8] sm:$0xff]  ;;  %v421_v43 = vld [vmem:[%s3145_s1 + $0xbd0] sm:$0xff] }
  0xaa   :  { %1694 = vmatpush3.msra.mxu0 %v299_v12  ;;  %1063 = vmatprep.mubr.f32.mxu0 %v35_v13  ;;  %v372_v44 = vld [vmem:[%s3145_s1 + $0xa48] sm:$0xff]  ;;  %v405_v45 = vld [vmem:[%s3145_s1 + $0xb50] sm:$0xff]  ;;  %v387_v46 = vld [vmem:[%s3145_s1 + $0xac0] sm:$0xff] }
  0xab   :  { %1727 = vmatpush3.msra.mxu1 %v332_v14  ;;  %1064 = vmatmul.mubr.f32.vlgmr.msra.gmra.mxu0 %v34_v15  ;;  %v420_v47 = vld [vmem:[%s3145_s1 + $0xbc8] sm:$0xff]  ;;  %v371_v48 = vld [vmem:[%s3145_s1 + $0xa40] sm:$0xff]  ;;  %v386_v50 = vld [vmem:[%s3145_s1 + $0xab8] sm:$0xff] }
  0xac   :  { %1728 = vmatprep.subr.mxu1 %v347_v16  ;;  %1733 = vmatprep.subr.mxu0 %v394_v17  ;;  %v404_v49 = vld [vmem:[%s3145_s1 + $0xb48] sm:$0xff]  ;;  %v419_v51 = vld [vmem:[%s3145_s1 + $0xbc0] sm:$0xff]  ;;  %v370_v52 = vld [vmem:[%s3145_s1 + $0xa38] sm:$0xff] }
  0xad   :  { %1729 = vmatpush3.msra.mxu1 %v331_v18  ;;  %1133 = vmatprep.mubr.f32.mxu1 %v37_v19  ;;  %v403_v53 = vld [vmem:[%s3145_s1 + $0xb40] sm:$0xff]  ;;  %v385_v54 = vld [vmem:[%s3145_s1 + $0xab0] sm:$0xff]  ;;  %v418_v55 = vld [vmem:[%s3145_s1 + $0xbb8] sm:$0xff] }
  0xae   :  { %1734 = vmatpush3.msra.mxu0 %v378_v20  ;;  %1134 = vmatmul.mubr.f32.vlgmr.msra.gmra.mxu1 %v36_v21  ;;  %v369_v56 = vld [vmem:[%s3145_s1 + $0xa30] sm:$0xff]  ;;  %v402_v57 = vld [vmem:[%s3145_s1 + $0xb38] sm:$0xff]  ;;  %v384_v58 = vld [vmem:[%s3145_s1 + $0xaa8] sm:$0xff] }
  0xaf   :  { %1735 = vmatprep.subr.mxu0 %v393_v22  ;;  %1768 = vmatprep.subr.mxu1 %v426_v23  ;;  %v417_v59 = vld [vmem:[%s3145_s1 + $0xbb0] sm:$0xff]  ;;  %v368_v60 = vld [vmem:[%s3145_s1 + $0xa28] sm:$0xff]  ;;  %v383_v62 = vld [vmem:[%s3145_s1 + $0xaa0] sm:$0xff] }
  0xb0   :  { %1736 = vmatpush3.msra.mxu0 %v377_v24  ;;  %1769 = vmatpush3.msra.mxu1 %v410_v25  ;;  %v401_v61 = vld [vmem:[%s3145_s1 + $0xb30] sm:$0xff]  ;;  %v416_v63 = vld [vmem:[%s3145_s1 + $0xba8] sm:$0xff]  ;;  %v367_v0 = vld [vmem:[%s3145_s1 + $0xa20] sm:$0xff]  ;;  %v1856_v25 = vmov 0.0  }
  0xb1   :  { %1737 = vmatprep.subr.mxu0 %v392_v26  ;;  %1770 = vmatprep.subr.mxu1 %v425_v27  ;;  %v400_v1 = vld [vmem:[%s3145_s1 + $0xb28] sm:$0xff]  ;;  %v382_v2 = vld [vmem:[%s3145_s1 + $0xa98] sm:$0xff]  ;;  %v415_v3 = vld [vmem:[%s3145_s1 + $0xba0] sm:$0xff] }
  0xb2   :  { %1738 = vmatpush3.msra.mxu0 %v376_v28  ;;  %1771 = vmatpush3.msra.mxu1 %v409_v29  ;;  %v366_v4 = vld [vmem:[%s3145_s1 + $0xa18] sm:$0xff]  ;;  %v399_v5 = vld [vmem:[%s3145_s1 + $0xb20] sm:$0xff]  ;;  %v381_v6 = vld [vmem:[%s3145_s1 + $0xa90] sm:$0xff] }
  0xb3   :  { %1739 = vmatprep.subr.mxu0 %v391_v30  ;;  %1772 = vmatprep.subr.mxu1 %v424_v31  ;;  %v414_v7 = vld [vmem:[%s3145_s1 + $0xb98] sm:$0xff]  ;;  %v365_v8 = vld [vmem:[%s3145_s1 + $0xa10] sm:$0xff]  ;;  %v380_v10 = vld [vmem:[%s3145_s1 + $0xa88] sm:$0xff] }
  0xb4   :  { %1740 = vmatpush3.msra.mxu0 %v375_v32  ;;  %1773 = vmatpush3.msra.mxu1 %v408_v33  ;;  %v398_v9 = vld [vmem:[%s3145_s1 + $0xb18] sm:$0xff]  ;;  %v413_v11 = vld [vmem:[%s3145_s1 + $0xb90] sm:$0xff]  ;;  %v364_v12 = vld [vmem:[%s3145_s1 + $0xa08] sm:$0xff] }
  0xb5   :  { %1741 = vmatprep.subr.mxu0 %v390_v34  ;;  %1774 = vmatprep.subr.mxu1 %v423_v35  ;;  %v397_v13 = vld [vmem:[%s3145_s1 + $0xb10] sm:$0xff]  ;;  %v379_v14 = vld [vmem:[%s3145_s1 + $0xa80] sm:$0xff]  ;;  %v412_v15 = vld [vmem:[%s3145_s1 + $0xb88] sm:$0xff] }
  0xb6   :  { %1742 = vmatpush3.msra.mxu0 %v374_v36  ;;  %1775 = vmatpush3.msra.mxu1 %v407_v37  ;;  %v363_v16 = vld [vmem:[%s3145_s1 + $0xa00] sm:$0xff]  ;;  %v39_v17 = vld [vmem:[%s3144_s0 + $0xa8] sm:$0xff]  ;;  %v41_v22 = vld [vmem:[%s3144_s0 + $0xb8] sm:$0xff] }
  0xb7   :  { %1743 = vmatprep.subr.mxu0 %v389_v38  ;;  %1776 = vmatprep.subr.mxu1 %v422_v39  ;;  %v396_v18 = vld [vmem:[%s3145_s1 + $0xb08] sm:$0xff]  ;;  %v38_v19 = vld [vmem:[%s3144_s0 + $0xa0] sm:$0xff]  ;;  %v434_v23 = vld [vmem:[%s3145_s1 + $0xc38] sm:$0xff] }
  0xb8   :  { %1744 = vmatpush3.msra.mxu0 %v373_v40  ;;  %1777 = vmatpush3.msra.mxu1 %v406_v41  ;;  %v411_v20 = vld [vmem:[%s3145_s1 + $0xb80] sm:$0xff]  ;;  %v40_v24 = vld [vmem:[%s3144_s0 + $0xb0] sm:$0xff]  ;;  %v432_v27 = vld [vmem:[%s3145_s1 + $0xc28] sm:$0xff] }
  0xb9   :  { %1745 = vmatprep.subr.mxu0 %v388_v42  ;;  %1778 = vmatprep.subr.mxu1 %v421_v43  ;;  %v395_v21 = vld [vmem:[%s3145_s1 + $0xb00] sm:$0xff]  ;;  %v433_v26 = vld [vmem:[%s3145_s1 + $0xc30] sm:$0xff]  ;;  %v430_v29 = vld [vmem:[%s3145_s1 + $0xc18] sm:$0xff] }
  0xba   :  { %1746 = vmatpush3.msra.mxu0 %v372_v44  ;;  %1779 = vmatpush3.msra.mxu1 %v405_v45  ;;  %v431_v28 = vld [vmem:[%s3145_s1 + $0xc20] sm:$0xff]  ;;  %v429_v30 = vld [vmem:[%s3145_s1 + $0xc10] sm:$0xff]  ;;  %v428_v31 = vld [vmem:[%s3145_s1 + $0xc08] sm:$0xff] }
  0xbb   :  { %1747 = vmatprep.subr.mxu0 %v387_v46  ;;  %1780 = vmatprep.subr.mxu1 %v420_v47  ;;  %v427_v32 = vld [vmem:[%s3145_s1 + $0xc00] sm:$0xff] }
  0xbc   :  { %1748 = vmatpush3.msra.mxu0 %v371_v48  ;;  %1781 = vmatpush3.msra.mxu1 %v404_v49  ;;  %v42_v33 = vld [vmem:[%s3144_s0 + $0xc0] sm:$0xff] }
  0xbd   :  { %1749 = vmatprep.subr.mxu0 %v386_v50  ;;  %1782 = vmatprep.subr.mxu1 %v419_v51 }
  0xbe   :  { %1750 = vmatpush3.msra.mxu0 %v370_v52  ;;  %1783 = vmatpush3.msra.mxu1 %v403_v53 }
  0xbf   :  { %1751 = vmatprep.subr.mxu0 %v385_v54  ;;  %1784 = vmatprep.subr.mxu1 %v418_v55 }
  0xc0   :  { %1752 = vmatpush3.msra.mxu0 %v369_v56  ;;  %1785 = vmatpush3.msra.mxu1 %v402_v57 }
  0xc1   :  { %1753 = vmatprep.subr.mxu0 %v384_v58  ;;  %1786 = vmatprep.subr.mxu1 %v417_v59 }
  0xc2   :  { %1754 = vmatpush3.msra.mxu0 %v368_v60  ;;  %1787 = vmatpush3.msra.mxu1 %v401_v61 }
  0xc3   :  { %1755 = vmatprep.subr.mxu0 %v383_v62  ;;  %1788 = vmatprep.subr.mxu1 %v416_v63 }
  0xc4   :  { %1756 = vmatpush3.msra.mxu0 %v367_v0  ;;  %1789 = vmatpush3.msra.mxu1 %v400_v1 }
  0xc5   :  { %1757 = vmatprep.subr.mxu0 %v382_v2  ;;  %1790 = vmatprep.subr.mxu1 %v415_v3 }
  0xc6   :  { %1758 = vmatpush3.msra.mxu0 %v366_v4  ;;  %1791 = vmatpush3.msra.mxu1 %v399_v5 }
  0xc7   :  { %1759 = vmatprep.subr.mxu0 %v381_v6  ;;  %1792 = vmatprep.subr.mxu1 %v414_v7 }
  0xc8   :  { %1760 = vmatpush3.msra.mxu0 %v365_v8  ;;  %1793 = vmatpush3.msra.mxu1 %v398_v9 }
  0xc9   :  { %1761 = vmatprep.subr.mxu0 %v380_v10  ;;  %1794 = vmatprep.subr.mxu1 %v413_v11 }
  0xca   :  { %1762 = vmatpush3.msra.mxu0 %v364_v12  ;;  %1795 = vmatpush3.msra.mxu1 %v397_v13 }
  0xcb   :  { %1763 = vmatprep.subr.mxu0 %v379_v14  ;;  %1796 = vmatprep.subr.mxu1 %v412_v15 }
  0xcc   :  { %1764 = vmatpush3.msra.mxu0 %v363_v16  ;;  %1203 = vmatprep.mubr.f32.mxu0 %v39_v17 }
  0xcd   :  { %1797 = vmatpush3.msra.mxu1 %v396_v18  ;;  %1204 = vmatmul.mubr.f32.vlgmr.msra.gmra.mxu0 %v38_v19  ;;  %v1381_v18 = vld [vmem:[%s3146_s2] ss:$0 sm:$0xff] }
  0xce   :  { %1798 = vmatprep.subr.mxu1 %v411_v20  ;;  %1812 = vmatprep.subr.mxu0 %v1856_v25 }
  0xcf   :  { %1799 = vmatpush3.msra.mxu1 %v395_v21  ;;  %1273 = vmatprep.mubr.f32.mxu1 %v41_v22  ;;  %v1382_v21 = vld [vmem:[%s3147_s3] ss:$0 sm:$0xff] }
  0xd0   :  { %1813 = vmatpush3.msra.mxu0 %v434_v23  ;;  %1274 = vmatmul.mubr.f32.vlgmr.msra.gmra.mxu1 %v40_v24 }
  0xd1   :  { %1814 = vmatprep.subr.mxu0 %v1856_v25  ;;  %1828 = vmatprep.mubr.msk.f32.mxu0 %vm1857_vm0, %v1856_v25 }
  0xd2   :  { %1815 = vmatpush3.msra.mxu0 %v433_v26 }
  0xd3   :  { %1816 = vmatprep.subr.mxu0 %v1856_v25 }
  0xd4   :  { %1817 = vmatpush3.msra.mxu0 %v432_v27 }
  0xd5   :  { %1818 = vmatprep.subr.mxu0 %v1856_v25 }
  0xd6   :  { %1819 = vmatpush3.msra.mxu0 %v431_v28 }
  0xd7   :  { %1820 = vmatprep.subr.mxu0 %v1856_v25 }
  0xd8   :  { %1821 = vmatpush3.msra.mxu0 %v430_v29 }
  0xd9   :  { %1822 = vmatprep.subr.mxu0 %v1856_v25 }
  0xda   :  { %1823 = vmatpush3.msra.mxu0 %v429_v30 }
  0xdb   :  { %1824 = vmatprep.subr.mxu0 %v1856_v25 }
  0xdc   :  { %1825 = vmatpush3.msra.mxu0 %v428_v31 }
  0xdd   :  { %1826 = vmatprep.subr.mxu0 %v1856_v25 }
  0xde   :  { %1827 = vmatpush3.msra.mxu0 %v427_v32 }
  0xdf   :  { %1829 = vmatmul.mubr.msk.f32.vlgmr.msra.gmra.mxu0 %vm435_vm1, %v42_v33 }
  0xe4   :  { %v1415_v34 = vpop.f32.mrf.mxu0 }
  0xe5   :  { %v1450_v35 = vpop.f32.mrf.mxu1 }
  0xe6   :  { %v1416_v36 = vpop.f32.mrf.mxu0 }
  0xe7   :  { %v1451_v38 = vpop.f32.mrf.mxu1  ;;  %v1417_v41 = vadd.f32 %v1416_v36, %v1415_v34 }
  0xe8   :  { %v1452_v42 = vadd.f32 %v1451_v38, %v1450_v35 }
  0xea   :  { %v576_v46 = vadd.f32 %v1452_v42, %v1417_v41 }
 0x105   :  { %v1485_v37 = vpop.f32.mrf.mxu0 }
 0x107   :  { %v1486_v39 = vpop.f32.mrf.mxu0 }
 0x108   :  { %v1520_v40 = vpop.f32.mrf.mxu1  ;;  %v1487_v44 = vadd.f32 %v1486_v39, %v1485_v37 }
 0x10a   :  { %v1521_v45 = vpop.f32.mrf.mxu1  ;;  %v646_v49 = vadd.f32 %v1487_v44, %v576_v46 }
 0x10b   :  { %v1522_v50 = vadd.f32 %v1521_v45, %v1520_v40 }
 0x10d   :  { %v716_v54 = vadd.f32 %v1522_v50, %v646_v49 }
 0x127   :  { %v1555_v43 = vpop.f32.mrf.mxu0 }
 0x129   :  { %v1556_v47 = vpop.f32.mrf.mxu0 }
 0x12a   :  { %v1590_v48 = vpop.f32.mrf.mxu1  ;;  %v1557_v52 = vadd.f32 %v1556_v47, %v1555_v43 }
 0x12c   :  { %v1591_v53 = vpop.f32.mrf.mxu1  ;;  %v786_v57 = vadd.f32 %v1557_v52, %v716_v54 }
 0x12d   :  { %v1592_v58 = vadd.f32 %v1591_v53, %v1590_v48 }
 0x12f   :  { %v856_v62 = vadd.f32 %v1592_v58, %v786_v57 }
 0x149   :  { %v1625_v51 = vpop.f32.mrf.mxu0 }
 0x14b   :  { %v1626_v55 = vpop.f32.mrf.mxu0 }
 0x14c   :  { %v1660_v56 = vpop.f32.mrf.mxu1  ;;  %v1627_v60 = vadd.f32 %v1626_v55, %v1625_v51 }
 0x14e   :  { %v1661_v61 = vpop.f32.mrf.mxu1  ;;  %v926_v1 = vadd.f32 %v1627_v60, %v856_v62 }
 0x14f   :  { %v1662_v2 = vadd.f32 %v1661_v61, %v1660_v56 }
 0x151   :  { %v996_v6 = vadd.f32 %v1662_v2, %v926_v1 }
 0x16b   :  { %v1695_v59 = vpop.f32.mrf.mxu0 }
 0x16d   :  { %v1696_v63 = vpop.f32.mrf.mxu0 }
 0x16e   :  { %v1730_v0 = vpop.f32.mrf.mxu1  ;;  %v1697_v4 = vadd.f32 %v1696_v63, %v1695_v59 }
 0x170   :  { %v1731_v5 = vpop.f32.mrf.mxu1  ;;  %v1066_v9 = vadd.f32 %v1697_v4, %v996_v6 }
 0x171   :  { %v1732_v10 = vadd.f32 %v1731_v5, %v1730_v0 }
 0x173   :  { %v1136_v13 = vadd.f32 %v1732_v10, %v1066_v9 }
 0x18d   :  { %v1765_v3 = vpop.f32.mrf.mxu0 }
 0x18f   :  { %v1766_v7 = vpop.f32.mrf.mxu0 }
 0x190   :  { %v1800_v8 = vpop.f32.mrf.mxu1  ;;  %v1767_v11 = vadd.f32 %v1766_v7, %v1765_v3 }
 0x192   :  { %v1801_v12 = vpop.f32.mrf.mxu1  ;;  %v1206_v14 = vadd.f32 %v1767_v11, %v1136_v13 }
 0x193   :  { %v1802_v15 = vadd.f32 %v1801_v12, %v1800_v8 }
 0x195   :  { %v1276_v16 = vadd.f32 %v1802_v15, %v1206_v14 }
 0x19f   :  { %v1345_v17 = vpop.f32.mrf.mxu0 }
 0x1a0   :  { %v1346_v19 = vadd.f32 %v1345_v17, %v1276_v16 }
 0x1a1   :  { %v1830_v20 = vpop.f32.mrf.mxu0 }
 0x1a2   :  { %v1356_v22 = vmul.f32 %v1381_v18, %v1346_v19 }
 0x1a4   :  { %v1364_v23 = vadd.f32 %v1382_v21, %v1356_v22 }
 0x1a6   :  { %1365 = vst [vmem:[#allocation2] sm:$0xff] %v1364_v23 }
 0x1a7   :  { %1845 = shalt.err (!%p1842_p4)
}
 0x1a8   :  { %1375 = dma.vmem_to_hbm [thread:$0]  %s1373_s20, 128, %s3148_s4, [#allocation3]  }
 0x1a9   :  { %1854 = dma.done.wait [#allocation3], 128  }
 0x1aa   :  { %1855 = vsyncadd [#allocation3], 4294967168 }
 0x1ab   :  { %1379 = vsyncpa [#allocation3], 1 }

</bundles_post_ra>
